<compile_context>
chip_gen: v7x
topology: tpu7x:2x2x1
jax: 0.10.0
libtpu: 0.0.40
codegen_flags: <defaults>
</compile_context>

<pallas_src>
import functools

import jax
import jax.numpy as jnp
import numpy as np
from jax.experimental import pallas as pl
from jax.experimental.pallas import tpu as pltpu

EPS = 1e-5
HIGH = jax.lax.Precision.HIGHEST   # used only in the pure-JAX reference


def _round_up(a, m):
    return (a + m - 1) // m * m


def _interp_matrix(n_out, n_in):
    """1-D linear interpolation matrix, align_corners=True (PyTorch bilinear)."""
    if n_in == 1:
        return np.ones((n_out, 1), np.float32)
    src = np.arange(n_out, dtype=np.float64) * (n_in - 1) / (n_out - 1)
    lo = np.clip(np.floor(src).astype(np.int64), 0, n_in - 2)
    frac = src - lo
    m = np.zeros((n_out, n_in), np.float64)
    rows = np.arange(n_out)
    m[rows, lo] += 1.0 - frac
    m[rows, lo + 1] += frac
    return m.astype(np.float32)


def _group_sum_matrix(c_in, add_dim):
    """(C1, C1out) 0/1 operator implementing the 'additive' channel group sum."""
    g, r = divmod(c_in, add_dim)
    s = np.zeros((c_in, g + r), np.float32)
    for c in range(g * add_dim):
        s[c, c // add_dim] = 1.0
    for i in range(r):
        s[g * add_dim + i, g + i] = 1.0
    return s


def _up_fused_kernel(x1cm_ref, x2p_ref, st_ref, ubd_ref, mask_ref, sel_ref,
                     w1a_ref, w1b_ref, b1_ref, g1_ref, be1_ref,
                     w2t_ref, b2_ref, g2_ref, be2_ref,
                     o_ref, h1_ref,
                     *, B, Wp, HpWp, G, n_valid, eps):
    Cout = o_ref.shape[1]
    Npad = B * HpWp
    Ntot = h1_ref.shape[1]
    inv_n = 1.0 / float(n_valid)

    # ---- upsample (bilinear x2) + additive group-sum + re-center pad -------
    # Two matmuls, batched over B: group-sum operator, then a precomputed
    # "upsample and place into the guarded padded-flat layout" operator whose
    # non-target columns (pad ring, guards) are exact zeros.
    xs = jnp.dot(st_ref[...], x1cm_ref[...],
                 preferred_element_type=jnp.float32)          # (C1out, B*H1*W1)
    xup = jnp.dot(xs, ubd_ref[...],
                  preferred_element_type=jnp.float32)         # (C1out, Ntot)

    mask = mask_ref[...]                                      # (1, Npad) validity

    # 3x3 tap offsets in the flattened padded layout (row width Wp).
    offs = [(dy - 1) * Wp + (dx - 1) for dy in range(3) for dx in range(3)]

    # ---- conv1: 9 taps x {skip channels, upsampled channels} ---------------
    # Accumulator is (Cout, B*Hp*Wp): Cout on sublanes, spatial on lanes.
    acc = jnp.zeros((Cout, Npad), jnp.float32)
    for k, off in enumerate(offs):
        s = G + off
        acc = acc + jnp.dot(w1a_ref[k], x2p_ref[:, s:s + Npad],
                            preferred_element_type=jnp.float32)
        acc = acc + jnp.dot(w1b_ref[k], xup[:, s:s + Npad],
                            preferred_element_type=jnp.float32)
    acc = acc + b1_ref[...]                                   # conv bias

    # BatchNorm (biased batch stats over valid pixels only) + ReLU.
    accm = acc * mask
    mu = jnp.sum(accm, axis=1, keepdims=True) * inv_n
    var = jnp.sum(accm * acc, axis=1, keepdims=True) * inv_n - mu * mu
    sc = g1_ref[...] * jax.lax.rsqrt(var + eps)
    sh = be1_ref[...] - mu * sc
    h1 = jnp.maximum(acc * sc + sh, 0.0) * mask               # ring stays exactly 0

    # Place h1 into its guarded slot; zero only the guard columns (the interior
    # is fully overwritten -- no double zero-fill of the whole buffer).
    h1_ref[:, :G] = jnp.zeros((Cout, G), jnp.float32)
    h1_ref[:, G + Npad:] = jnp.zeros((Cout, Ntot - G - Npad), jnp.float32)
    h1_ref[:, G:G + Npad] = h1

    # ---- conv2: 9 accumulate matmuls from the guarded h1 -------------------
    acc2 = jnp.zeros((Cout, Npad), jnp.float32)
    for k, off in enumerate(offs):
        s = G + off
        acc2 = acc2 + jnp.dot(w2t_ref[k], h1_ref[:, s:s + Npad],
                              preferred_element_type=jnp.float32)
    acc2 = acc2 + b2_ref[...]

    # ---- drop the pad ring (0/1 selection matmul), BN2 + ReLU, store -------
    sel = sel_ref[...]                                        # (Hp*Wp, H*W)
    bands = []
    s1 = jnp.zeros((Cout, 1), jnp.float32)
    s2 = jnp.zeros((Cout, 1), jnp.float32)
    for b in range(B):
        band = jnp.dot(acc2[:, b * HpWp:(b + 1) * HpWp], sel,
                       preferred_element_type=jnp.float32)    # (Cout, H*W) compact
        bands.append(band)
        s1 = s1 + jnp.sum(band, axis=1, keepdims=True)
        s2 = s2 + jnp.sum(band * band, axis=1, keepdims=True)
    mu2 = s1 * inv_n
    var2 = s2 * inv_n - mu2 * mu2
    sc2 = g2_ref[...] * jax.lax.rsqrt(var2 + eps)
    sh2 = be2_ref[...] - mu2 * sc2
    for b in range(B):
        o_ref[b] = jnp.maximum(bands[b] * sc2 + sh2, 0.0)     # lane-dense (Cout, H*W)


def up_forward(params, x1, x2, additive_dim=4):
    """Full `up` forward (bilinear=True, additive=True, skip_connection=True)."""
    B, C1, H1, W1 = x1.shape
    B2, C2, H2, W2 = x2.shape
    assert B2 == B
    h_up, w_up = 2 * H1, 2 * W1
    g, r = divmod(C1, additive_dim)
    c1out = g + r
    cin1 = params["w1"].shape[2]
    cout = params["w1"].shape[-1]
    assert cin1 == C2 + c1out
    off_y = (H2 - h_up) // 2
    off_x = (W2 - w_up) // 2
    # TODO(synk): negative re-center pad (PyTorch F.pad crop) is not handled.
    assert off_y >= 0 and off_x >= 0

    Hp, Wp = H2 + 2, W2 + 2
    HpWp = Hp * Wp
    Npad = B * HpWp
    HW = H2 * W2
    H1W1 = H1 * W1
    G = _round_up(Wp + 1, 128)                     # lane-aligned left guard
    Ntot = _round_up(G + Npad + Wp + 1, 128)       # guarded total lane width

    # ---- constant operators, baked once per shape (numpy) ------------------
    U = np.kron(_interp_matrix(h_up, H1), _interp_matrix(w_up, W1))  # (hu*wu, H1*W1)
    cols = (G + (1 + off_y + np.arange(h_up))[:, None] * Wp
            + (1 + off_x + np.arange(w_up))[None, :]).reshape(-1)
    ubd = np.zeros((B * H1W1, Ntot), np.float32)   # upsample + place, block-diag in B
    for b in range(B):
        ubd[b * H1W1:(b + 1) * H1W1, b * HpWp + cols] = U.T
    st = _group_sum_matrix(C1, additive_dim).T     # (c1out, C1)

    valid = ((1 + np.arange(H2))[:, None] * Wp
             + 1 + np.arange(W2)[None, :]).reshape(-1)          # (H2*W2,)
    m1 = np.zeros((HpWp,), np.float32)
    m1[valid] = 1.0
    mask = np.tile(m1, B)[None, :]                 # (1, Npad) validity mask
    sel = np.zeros((HpWp, HW), np.float32)         # padded-flat -> compact selector
    sel[valid, np.arange(HW)] = 1.0

    # ---- cheap wrapper-side layout plumbing (all tiny, lane-dense) ----------
    f32 = jnp.float32
    x1cm = jnp.transpose(x1.astype(f32).reshape(B, C1, H1W1),
                         (1, 0, 2)).reshape(C1, B * H1W1)
    x2p = jnp.pad(x2.astype(f32), ((0, 0), (0, 0), (1, 1), (1, 1)))
    x2p = jnp.transpose(x2p, (1, 0, 2, 3)).reshape(C2, Npad)
    x2p = jnp.pad(x2p, ((0, 0), (G, Ntot - G - Npad)))          # (C2, Ntot), guarded

    w1t = jnp.transpose(params["w1"].astype(f32), (0, 1, 3, 2)).reshape(9, cout, cin1)
    w1a = w1t[:, :, :C2]                                        # taps for skip channels
    w1b = w1t[:, :, C2:]                                        # taps for upsampled chans
    w2t = jnp.transpose(params["w2"].astype(f32), (0, 1, 3, 2)).reshape(9, cout, cout)

    kernel = functools.partial(_up_fused_kernel, B=B, Wp=Wp, HpWp=HpWp,
                               G=G, n_valid=B * HW, eps=EPS)
    out = pl.pallas_call(
        kernel,
        out_shape=jax.ShapeDtypeStruct((B, cout, HW), f32),
        scratch_shapes=[pltpu.VMEM((cout, Ntot), f32)],         # guarded h1
    )(x1cm, x2p, jnp.asarray(st), jnp.asarray(ubd),
      jnp.asarray(mask), jnp.asarray(sel),
      w1a, w1b,
      params["b1"].astype(f32).reshape(cout, 1),
      params["g1"].astype(f32).reshape(cout, 1),
      params["be1"].astype(f32).reshape(cout, 1),
      w2t,
      params["b2"].astype(f32).reshape(cout, 1),
      params["g2"].astype(f32).reshape(cout, 1),
      params["be2"].astype(f32).reshape(cout, 1))
    return out.reshape(B, cout, H2, W2)            # pure metadata reshape -> NCHW


# ---------------------------------------------------------------------------
# Pure-JAX reference (mirrors the PyTorch module) for sanity checking.
# ---------------------------------------------------------------------------
def reference_up(params, x1, x2, additive_dim=4):
    B, C, H, W = x1.shape
    uh = jnp.asarray(_interp_matrix(2 * H, H))
    uw = jnp.asarray(_interp_matrix(2 * W, W))
    xu = jnp.einsum("ph,bchw->bcpw", uh, x1, precision=HIGH)
    xu = jnp.einsum("qw,bcpw->bcpq", uw, xu, precision=HIGH)
    G = C // additive_dim
    main = xu[:, :G * additive_dim].reshape(B, G, additive_dim, 2 * H, 2 * W).sum(2)
    rem = xu[:, G * additive_dim:]
    xu = jnp.concatenate([main, rem], axis=1)
    dY = x2.shape[2] - xu.shape[2]
    dX = x2.shape[3] - xu.shape[3]
    xu = jnp.pad(xu, ((0, 0), (0, 0),
                      (dY // 2, dY - dY // 2), (dX // 2, dX - dX // 2)))
    x = jnp.concatenate([x2, xu], axis=1)
    x = jnp.transpose(x, (0, 2, 3, 1))

    def cbr(x, w, b, g, be):
        y = jax.lax.conv_general_dilated(
            x, w, (1, 1), "SAME",
            dimension_numbers=("NHWC", "HWIO", "NHWC")) + b
        mu = y.mean((0, 1, 2), keepdims=True)
        var = ((y - mu) ** 2).mean((0, 1, 2), keepdims=True)
        return jnp.maximum((y - mu) * g * jax.lax.rsqrt(var + EPS) + be, 0.0)

    x = cbr(x, params["w1"], params["b1"], params["g1"], params["be1"])
    x = cbr(x, params["w2"], params["b2"], params["g2"], params["be2"])
    return jnp.transpose(x, (0, 3, 1, 2))


if __name__ == "__main__":
    in_ch, out_ch, additive_dim = 16, 8, 4
    B, H, W = 2, 8, 8                 # x1 spatial; x2 is 2x in each spatial dim

    # channel bookkeeping, mirroring up.__init__
    add_ch = in_ch // 2
    if add_ch % additive_dim == 0:
        conv_in = in_ch // 2 + add_ch // additive_dim
    else:
        conv_in = in_ch // 2 + add_ch // additive_dim + add_ch % additive_dim

    key = jax.random.PRNGKey(0)
    ks = jax.random.split(key, 10)
    x1 = jax.random.normal(ks[0], (B, in_ch // 2, H, W), jnp.float32)
    x2 = jax.random.normal(ks[1], (B, in_ch // 2, 2 * H, 2 * W), jnp.float32)

    params = {
        "w1": 0.1 * jax.random.normal(ks[2], (3, 3, conv_in, out_ch), jnp.float32),
        "b1": 0.05 * jax.random.normal(ks[3], (out_ch,), jnp.float32),
        "g1": 1.0 + 0.1 * jax.random.normal(ks[4], (out_ch,), jnp.float32),
        "be1": 0.1 * jax.random.normal(ks[5], (out_ch,), jnp.float32),
        "w2": 0.1 * jax.random.normal(ks[6], (3, 3, out_ch, out_ch), jnp.float32),
        "b2": 0.05 * jax.random.normal(ks[7], (out_ch,), jnp.float32),
        "g2": 1.0 + 0.1 * jax.random.normal(ks[8], (out_ch,), jnp.float32),
        "be2": 0.1 * jax.random.normal(ks[9], (out_ch,), jnp.float32),
    }

    out = jax.block_until_ready(up_forward(params, x1, x2, additive_dim))
    ref = jax.block_until_ready(reference_up(params, x1, x2, additive_dim))
    assert out.shape == (B, out_ch, 2 * H, 2 * W), out.shape
    # Tolerance accounts for default (bf16-input / f32-accum) MXU precision on
    # every in-kernel matmul (HIGHEST was dropped everywhere per perf review),
    # propagated through two BatchNorm normalizations.
    np.testing.assert_allclose(np.asarray(out), np.asarray(ref), rtol=4e-2, atol=4e-2)
    print("KERNEL_OK")
</pallas_src>

<mosaic_0001>
module attributes {stable_mosaic.version = 11 : i64} {
  func.func @_up_fused_kernel(%arg0: memref<8x128xf32, #tpu.memory_space<vmem>>, %arg1: memref<8x896xf32, #tpu.memory_space<vmem>>, %arg2: memref<2x8xf32, #tpu.memory_space<vmem>>, %arg3: memref<128x896xf32, #tpu.memory_space<vmem>>, %arg4: memref<1x648xf32, #tpu.memory_space<vmem>>, %arg5: memref<324x256xf32, #tpu.memory_space<vmem>>, %arg6: memref<9x8x8xf32, #tpu.memory_space<vmem>>, %arg7: memref<9x8x2xf32, #tpu.memory_space<vmem>>, %arg8: memref<8x1xf32, #tpu.memory_space<vmem>>, %arg9: memref<8x1xf32, #tpu.memory_space<vmem>>, %arg10: memref<8x1xf32, #tpu.memory_space<vmem>>, %arg11: memref<9x8x8xf32, #tpu.memory_space<vmem>>, %arg12: memref<8x1xf32, #tpu.memory_space<vmem>>, %arg13: memref<8x1xf32, #tpu.memory_space<vmem>>, %arg14: memref<8x1xf32, #tpu.memory_space<vmem>>, %arg15: memref<2x8x256xf32, #tpu.memory_space<vmem>>, %arg16: memref<8x896xf32, #tpu.memory_space<vmem>>) attributes {dimension_semantics = [], scalar_prefetch = 0 : i64, scratch_operands = 1 : i64, tpu.core_type = #tpu.core_type<tc>} {
    %c0 = arith.constant 0 : index
    %c0_0 = arith.constant 0 : index
    %0 = vector.load %arg2[%c0, %c0_0] : memref<2x8xf32, #tpu.memory_space<vmem>>, vector<2x8xf32>
    %c0_1 = arith.constant 0 : index
    %c0_2 = arith.constant 0 : index
    %1 = vector.load %arg0[%c0_1, %c0_2] : memref<8x128xf32, #tpu.memory_space<vmem>>, vector<8x128xf32>
    %cst = arith.constant dense<0.000000e+00> : vector<2x128xf32>
    %2 = tpu.matmul %0, %1, %cst {dimension_numbers = #tpu.dot_dimension_numbers<[1], [0], [0], [1], [0, 0, 1, 1], [], []>} : vector<2x8xf32>, vector<8x128xf32>, vector<2x128xf32> -> vector<2x128xf32>
    %c0_3 = arith.constant 0 : index
    %c0_4 = arith.constant 0 : index
    %3 = vector.load %arg3[%c0_3, %c0_4] : memref<128x896xf32, #tpu.memory_space<vmem>>, vector<128x896xf32>
    %cst_5 = arith.constant dense<0.000000e+00> : vector<2x896xf32>
    %4 = tpu.matmul %2, %3, %cst_5 {dimension_numbers = #tpu.dot_dimension_numbers<[1], [0], [0], [1], [0, 0, 1, 1], [], []>} : vector<2x128xf32>, vector<128x896xf32>, vector<2x896xf32> -> vector<2x896xf32>
    %c0_6 = arith.constant 0 : index
    %c0_7 = arith.constant 0 : index
    %5 = vector.load %arg4[%c0_6, %c0_7] : memref<1x648xf32, #tpu.memory_space<vmem>>, vector<1x648xf32>
    %cst_8 = arith.constant 0.000000e+00 : f32
    %6 = vector.broadcast %cst_8 : f32 to vector<8x648xf32>
    %c0_9 = arith.constant 0 : index
    %c0_10 = arith.constant 0 : index
    %c0_11 = arith.constant 0 : index
    %7 = vector.load %arg6[%c0_9, %c0_10, %c0_11] : memref<9x8x8xf32, #tpu.memory_space<vmem>>, vector<1x8x8xf32>
    %8 = vector.shape_cast %7 : vector<1x8x8xf32> to vector<8x8xf32>
    %c0_12 = arith.constant 0 : index
    %c109 = arith.constant 109 : index
    %9 = vector.load %arg1[%c0_12, %c109] : memref<8x896xf32, #tpu.memory_space<vmem>>, vector<8x648xf32>
    %cst_13 = arith.constant dense<0.000000e+00> : vector<8x648xf32>
    %10 = tpu.matmul %8, %9, %cst_13 {dimension_numbers = #tpu.dot_dimension_numbers<[1], [0], [0], [1], [0, 0, 1, 1], [], []>} : vector<8x8xf32>, vector<8x648xf32>, vector<8x648xf32> -> vector<8x648xf32>
    %11 = arith.addf %6, %10 : vector<8x648xf32>
    %c0_14 = arith.constant 0 : index
    %c0_15 = arith.constant 0 : index
    %c0_16 = arith.constant 0 : index
    %12 = vector.load %arg7[%c0_14, %c0_15, %c0_16] : memref<9x8x2xf32, #tpu.memory_space<vmem>>, vector<1x8x2xf32>
    %13 = vector.shape_cast %12 : vector<1x8x2xf32> to vector<8x2xf32>
    %14 = vector.extract_strided_slice %4 {offsets = [0, 109], sizes = [2, 648], strides = [1, 1]} : vector<2x896xf32> to vector<2x648xf32>
    %cst_17 = arith.constant dense<0.000000e+00> : vector<8x648xf32>
    %15 = tpu.matmul %13, %14, %cst_17 {dimension_numbers = #tpu.dot_dimension_numbers<[1], [0], [0], [1], [0, 0, 1, 1], [], []>} : vector<8x2xf32>, vector<2x648xf32>, vector<8x648xf32> -> vector<8x648xf32>
    %16 = arith.addf %11, %15 : vector<8x648xf32>
    %c1 = arith.constant 1 : index
    %c0_18 = arith.constant 0 : index
    %c0_19 = arith.constant 0 : index
    %17 = vector.load %arg6[%c1, %c0_18, %c0_19] : memref<9x8x8xf32, #tpu.memory_space<vmem>>, vector<1x8x8xf32>
    %18 = vector.shape_cast %17 : vector<1x8x8xf32> to vector<8x8xf32>
    %c0_20 = arith.constant 0 : index
    %c110 = arith.constant 110 : index
    %19 = vector.load %arg1[%c0_20, %c110] : memref<8x896xf32, #tpu.memory_space<vmem>>, vector<8x648xf32>
    %cst_21 = arith.constant dense<0.000000e+00> : vector<8x648xf32>
    %20 = tpu.matmul %18, %19, %cst_21 {dimension_numbers = #tpu.dot_dimension_numbers<[1], [0], [0], [1], [0, 0, 1, 1], [], []>} : vector<8x8xf32>, vector<8x648xf32>, vector<8x648xf32> -> vector<8x648xf32>
    %21 = arith.addf %16, %20 : vector<8x648xf32>
    %c1_22 = arith.constant 1 : index
    %c0_23 = arith.constant 0 : index
    %c0_24 = arith.constant 0 : index
    %22 = vector.load %arg7[%c1_22, %c0_23, %c0_24] : memref<9x8x2xf32, #tpu.memory_space<vmem>>, vector<1x8x2xf32>
    %23 = vector.shape_cast %22 : vector<1x8x2xf32> to vector<8x2xf32>
    %24 = vector.extract_strided_slice %4 {offsets = [0, 110], sizes = [2, 648], strides = [1, 1]} : vector<2x896xf32> to vector<2x648xf32>
    %cst_25 = arith.constant dense<0.000000e+00> : vector<8x648xf32>
    %25 = tpu.matmul %23, %24, %cst_25 {dimension_numbers = #tpu.dot_dimension_numbers<[1], [0], [0], [1], [0, 0, 1, 1], [], []>} : vector<8x2xf32>, vector<2x648xf32>, vector<8x648xf32> -> vector<8x648xf32>
    %26 = arith.addf %21, %25 : vector<8x648xf32>
    %c2 = arith.constant 2 : index
    %c0_26 = arith.constant 0 : index
    %c0_27 = arith.constant 0 : index
    %27 = vector.load %arg6[%c2, %c0_26, %c0_27] : memref<9x8x8xf32, #tpu.memory_space<vmem>>, vector<1x8x8xf32>
    %28 = vector.shape_cast %27 : vector<1x8x8xf32> to vector<8x8xf32>
    %c0_28 = arith.constant 0 : index
    %c111 = arith.constant 111 : index
    %29 = vector.load %arg1[%c0_28, %c111] : memref<8x896xf32, #tpu.memory_space<vmem>>, vector<8x648xf32>
    %cst_29 = arith.constant dense<0.000000e+00> : vector<8x648xf32>
    %30 = tpu.matmul %28, %29, %cst_29 {dimension_numbers = #tpu.dot_dimension_numbers<[1], [0], [0], [1], [0, 0, 1, 1], [], []>} : vector<8x8xf32>, vector<8x648xf32>, vector<8x648xf32> -> vector<8x648xf32>
    %31 = arith.addf %26, %30 : vector<8x648xf32>
    %c2_30 = arith.constant 2 : index
    %c0_31 = arith.constant 0 : index
    %c0_32 = arith.constant 0 : index
    %32 = vector.load %arg7[%c2_30, %c0_31, %c0_32] : memref<9x8x2xf32, #tpu.memory_space<vmem>>, vector<1x8x2xf32>
    %33 = vector.shape_cast %32 : vector<1x8x2xf32> to vector<8x2xf32>
    %34 = vector.extract_strided_slice %4 {offsets = [0, 111], sizes = [2, 648], strides = [1, 1]} : vector<2x896xf32> to vector<2x648xf32>
    %cst_33 = arith.constant dense<0.000000e+00> : vector<8x648xf32>
    %35 = tpu.matmul %33, %34, %cst_33 {dimension_numbers = #tpu.dot_dimension_numbers<[1], [0], [0], [1], [0, 0, 1, 1], [], []>} : vector<8x2xf32>, vector<2x648xf32>, vector<8x648xf32> -> vector<8x648xf32>
    %36 = arith.addf %31, %35 : vector<8x648xf32>
    %c3 = arith.constant 3 : index
    %c0_34 = arith.constant 0 : index
    %c0_35 = arith.constant 0 : index
    %37 = vector.load %arg6[%c3, %c0_34, %c0_35] : memref<9x8x8xf32, #tpu.memory_space<vmem>>, vector<1x8x8xf32>
    %38 = vector.shape_cast %37 : vector<1x8x8xf32> to vector<8x8xf32>
    %c0_36 = arith.constant 0 : index
    %c127 = arith.constant 127 : index
    %39 = vector.load %arg1[%c0_36, %c127] : memref<8x896xf32, #tpu.memory_space<vmem>>, vector<8x648xf32>
    %cst_37 = arith.constant dense<0.000000e+00> : vector<8x648xf32>
    %40 = tpu.matmul %38, %39, %cst_37 {dimension_numbers = #tpu.dot_dimension_numbers<[1], [0], [0], [1], [0, 0, 1, 1], [], []>} : vector<8x8xf32>, vector<8x648xf32>, vector<8x648xf32> -> vector<8x648xf32>
    %41 = arith.addf %36, %40 : vector<8x648xf32>
    %c3_38 = arith.constant 3 : index
    %c0_39 = arith.constant 0 : index
    %c0_40 = arith.constant 0 : index
    %42 = vector.load %arg7[%c3_38, %c0_39, %c0_40] : memref<9x8x2xf32, #tpu.memory_space<vmem>>, vector<1x8x2xf32>
    %43 = vector.shape_cast %42 : vector<1x8x2xf32> to vector<8x2xf32>
    %44 = vector.extract_strided_slice %4 {offsets = [0, 127], sizes = [2, 648], strides = [1, 1]} : vector<2x896xf32> to vector<2x648xf32>
    %cst_41 = arith.constant dense<0.000000e+00> : vector<8x648xf32>
    %45 = tpu.matmul %43, %44, %cst_41 {dimension_numbers = #tpu.dot_dimension_numbers<[1], [0], [0], [1], [0, 0, 1, 1], [], []>} : vector<8x2xf32>, vector<2x648xf32>, vector<8x648xf32> -> vector<8x648xf32>
    %46 = arith.addf %41, %45 : vector<8x648xf32>
    %c4 = arith.constant 4 : index
    %c0_42 = arith.constant 0 : index
    %c0_43 = arith.constant 0 : index
    %47 = vector.load %arg6[%c4, %c0_42, %c0_43] : memref<9x8x8xf32, #tpu.memory_space<vmem>>, vector<1x8x8xf32>
    %48 = vector.shape_cast %47 : vector<1x8x8xf32> to vector<8x8xf32>
    %c0_44 = arith.constant 0 : index
    %c128 = arith.constant 128 : index
    %49 = vector.load %arg1[%c0_44, %c128] : memref<8x896xf32, #tpu.memory_space<vmem>>, vector<8x648xf32>
    %cst_45 = arith.constant dense<0.000000e+00> : vector<8x648xf32>
    %50 = tpu.matmul %48, %49, %cst_45 {dimension_numbers = #tpu.dot_dimension_numbers<[1], [0], [0], [1], [0, 0, 1, 1], [], []>} : vector<8x8xf32>, vector<8x648xf32>, vector<8x648xf32> -> vector<8x648xf32>
    %51 = arith.addf %46, %50 : vector<8x648xf32>
    %c4_46 = arith.constant 4 : index
    %c0_47 = arith.constant 0 : index
    %c0_48 = arith.constant 0 : index
    %52 = vector.load %arg7[%c4_46, %c0_47, %c0_48] : memref<9x8x2xf32, #tpu.memory_space<vmem>>, vector<1x8x2xf32>
    %53 = vector.shape_cast %52 : vector<1x8x2xf32> to vector<8x2xf32>
    %54 = vector.extract_strided_slice %4 {offsets = [0, 128], sizes = [2, 648], strides = [1, 1]} : vector<2x896xf32> to vector<2x648xf32>
    %cst_49 = arith.constant dense<0.000000e+00> : vector<8x648xf32>
    %55 = tpu.matmul %53, %54, %cst_49 {dimension_numbers = #tpu.dot_dimension_numbers<[1], [0], [0], [1], [0, 0, 1, 1], [], []>} : vector<8x2xf32>, vector<2x648xf32>, vector<8x648xf32> -> vector<8x648xf32>
    %56 = arith.addf %51, %55 : vector<8x648xf32>
    %c5 = arith.constant 5 : index
    %c0_50 = arith.constant 0 : index
    %c0_51 = arith.constant 0 : index
    %57 = vector.load %arg6[%c5, %c0_50, %c0_51] : memref<9x8x8xf32, #tpu.memory_space<vmem>>, vector<1x8x8xf32>
    %58 = vector.shape_cast %57 : vector<1x8x8xf32> to vector<8x8xf32>
    %c0_52 = arith.constant 0 : index
    %c129 = arith.constant 129 : index
    %59 = vector.load %arg1[%c0_52, %c129] : memref<8x896xf32, #tpu.memory_space<vmem>>, vector<8x648xf32>
    %cst_53 = arith.constant dense<0.000000e+00> : vector<8x648xf32>
    %60 = tpu.matmul %58, %59, %cst_53 {dimension_numbers = #tpu.dot_dimension_numbers<[1], [0], [0], [1], [0, 0, 1, 1], [], []>} : vector<8x8xf32>, vector<8x648xf32>, vector<8x648xf32> -> vector<8x648xf32>
    %61 = arith.addf %56, %60 : vector<8x648xf32>
    %c5_54 = arith.constant 5 : index
    %c0_55 = arith.constant 0 : index
    %c0_56 = arith.constant 0 : index
    %62 = vector.load %arg7[%c5_54, %c0_55, %c0_56] : memref<9x8x2xf32, #tpu.memory_space<vmem>>, vector<1x8x2xf32>
    %63 = vector.shape_cast %62 : vector<1x8x2xf32> to vector<8x2xf32>
    %64 = vector.extract_strided_slice %4 {offsets = [0, 129], sizes = [2, 648], strides = [1, 1]} : vector<2x896xf32> to vector<2x648xf32>
    %cst_57 = arith.constant dense<0.000000e+00> : vector<8x648xf32>
    %65 = tpu.matmul %63, %64, %cst_57 {dimension_numbers = #tpu.dot_dimension_numbers<[1], [0], [0], [1], [0, 0, 1, 1], [], []>} : vector<8x2xf32>, vector<2x648xf32>, vector<8x648xf32> -> vector<8x648xf32>
    %66 = arith.addf %61, %65 : vector<8x648xf32>
    %c6 = arith.constant 6 : index
    %c0_58 = arith.constant 0 : index
    %c0_59 = arith.constant 0 : index
    %67 = vector.load %arg6[%c6, %c0_58, %c0_59] : memref<9x8x8xf32, #tpu.memory_space<vmem>>, vector<1x8x8xf32>
    %68 = vector.shape_cast %67 : vector<1x8x8xf32> to vector<8x8xf32>
    %c0_60 = arith.constant 0 : index
    %c145 = arith.constant 145 : index
    %69 = vector.load %arg1[%c0_60, %c145] : memref<8x896xf32, #tpu.memory_space<vmem>>, vector<8x648xf32>
    %cst_61 = arith.constant dense<0.000000e+00> : vector<8x648xf32>
    %70 = tpu.matmul %68, %69, %cst_61 {dimension_numbers = #tpu.dot_dimension_numbers<[1], [0], [0], [1], [0, 0, 1, 1], [], []>} : vector<8x8xf32>, vector<8x648xf32>, vector<8x648xf32> -> vector<8x648xf32>
    %71 = arith.addf %66, %70 : vector<8x648xf32>
    %c6_62 = arith.constant 6 : index
    %c0_63 = arith.constant 0 : index
    %c0_64 = arith.constant 0 : index
    %72 = vector.load %arg7[%c6_62, %c0_63, %c0_64] : memref<9x8x2xf32, #tpu.memory_space<vmem>>, vector<1x8x2xf32>
    %73 = vector.shape_cast %72 : vector<1x8x2xf32> to vector<8x2xf32>
    %74 = vector.extract_strided_slice %4 {offsets = [0, 145], sizes = [2, 648], strides = [1, 1]} : vector<2x896xf32> to vector<2x648xf32>
    %cst_65 = arith.constant dense<0.000000e+00> : vector<8x648xf32>
    %75 = tpu.matmul %73, %74, %cst_65 {dimension_numbers = #tpu.dot_dimension_numbers<[1], [0], [0], [1], [0, 0, 1, 1], [], []>} : vector<8x2xf32>, vector<2x648xf32>, vector<8x648xf32> -> vector<8x648xf32>
    %76 = arith.addf %71, %75 : vector<8x648xf32>
    %c7 = arith.constant 7 : index
    %c0_66 = arith.constant 0 : index
    %c0_67 = arith.constant 0 : index
    %77 = vector.load %arg6[%c7, %c0_66, %c0_67] : memref<9x8x8xf32, #tpu.memory_space<vmem>>, vector<1x8x8xf32>
    %78 = vector.shape_cast %77 : vector<1x8x8xf32> to vector<8x8xf32>
    %c0_68 = arith.constant 0 : index
    %c146 = arith.constant 146 : index
    %79 = vector.load %arg1[%c0_68, %c146] : memref<8x896xf32, #tpu.memory_space<vmem>>, vector<8x648xf32>
    %cst_69 = arith.constant dense<0.000000e+00> : vector<8x648xf32>
    %80 = tpu.matmul %78, %79, %cst_69 {dimension_numbers = #tpu.dot_dimension_numbers<[1], [0], [0], [1], [0, 0, 1, 1], [], []>} : vector<8x8xf32>, vector<8x648xf32>, vector<8x648xf32> -> vector<8x648xf32>
    %81 = arith.addf %76, %80 : vector<8x648xf32>
    %c7_70 = arith.constant 7 : index
    %c0_71 = arith.constant 0 : index
    %c0_72 = arith.constant 0 : index
    %82 = vector.load %arg7[%c7_70, %c0_71, %c0_72] : memref<9x8x2xf32, #tpu.memory_space<vmem>>, vector<1x8x2xf32>
    %83 = vector.shape_cast %82 : vector<1x8x2xf32> to vector<8x2xf32>
    %84 = vector.extract_strided_slice %4 {offsets = [0, 146], sizes = [2, 648], strides = [1, 1]} : vector<2x896xf32> to vector<2x648xf32>
    %cst_73 = arith.constant dense<0.000000e+00> : vector<8x648xf32>
    %85 = tpu.matmul %83, %84, %cst_73 {dimension_numbers = #tpu.dot_dimension_numbers<[1], [0], [0], [1], [0, 0, 1, 1], [], []>} : vector<8x2xf32>, vector<2x648xf32>, vector<8x648xf32> -> vector<8x648xf32>
    %86 = arith.addf %81, %85 : vector<8x648xf32>
    %c8 = arith.constant 8 : index
    %c0_74 = arith.constant 0 : index
    %c0_75 = arith.constant 0 : index
    %87 = vector.load %arg6[%c8, %c0_74, %c0_75] : memref<9x8x8xf32, #tpu.memory_space<vmem>>, vector<1x8x8xf32>
    %88 = vector.shape_cast %87 : vector<1x8x8xf32> to vector<8x8xf32>
    %c0_76 = arith.constant 0 : index
    %c147 = arith.constant 147 : index
    %89 = vector.load %arg1[%c0_76, %c147] : memref<8x896xf32, #tpu.memory_space<vmem>>, vector<8x648xf32>
    %cst_77 = arith.constant dense<0.000000e+00> : vector<8x648xf32>
    %90 = tpu.matmul %88, %89, %cst_77 {dimension_numbers = #tpu.dot_dimension_numbers<[1], [0], [0], [1], [0, 0, 1, 1], [], []>} : vector<8x8xf32>, vector<8x648xf32>, vector<8x648xf32> -> vector<8x648xf32>
    %91 = arith.addf %86, %90 : vector<8x648xf32>
    %c8_78 = arith.constant 8 : index
    %c0_79 = arith.constant 0 : index
    %c0_80 = arith.constant 0 : index
    %92 = vector.load %arg7[%c8_78, %c0_79, %c0_80] : memref<9x8x2xf32, #tpu.memory_space<vmem>>, vector<1x8x2xf32>
    %93 = vector.shape_cast %92 : vector<1x8x2xf32> to vector<8x2xf32>
    %94 = vector.extract_strided_slice %4 {offsets = [0, 147], sizes = [2, 648], strides = [1, 1]} : vector<2x896xf32> to vector<2x648xf32>
    %cst_81 = arith.constant dense<0.000000e+00> : vector<8x648xf32>
    %95 = tpu.matmul %93, %94, %cst_81 {dimension_numbers = #tpu.dot_dimension_numbers<[1], [0], [0], [1], [0, 0, 1, 1], [], []>} : vector<8x2xf32>, vector<2x648xf32>, vector<8x648xf32> -> vector<8x648xf32>
    %96 = arith.addf %91, %95 : vector<8x648xf32>
    %c0_82 = arith.constant 0 : index
    %c0_83 = arith.constant 0 : index
    %97 = vector.load %arg8[%c0_82, %c0_83] : memref<8x1xf32, #tpu.memory_space<vmem>>, vector<8x1xf32>
    %98 = vector.broadcast %97 : vector<8x1xf32> to vector<8x648xf32>
    %99 = arith.addf %96, %98 : vector<8x648xf32>
    %100 = vector.broadcast %5 : vector<1x648xf32> to vector<8x648xf32>
    %101 = arith.mulf %99, %100 : vector<8x648xf32>
    %cst_84 = arith.constant dense<0.000000e+00> : vector<8xf32>
    %102 = vector.multi_reduction <add>, %101, %cst_84 [1] : vector<8x648xf32> to vector<8xf32>
    %103 = vector.shape_cast %102 : vector<8xf32> to vector<8x1xf32>
    %cst_85 = arith.constant 0.001953125 : f32
    %104 = vector.broadcast %cst_85 : f32 to vector<8x1xf32>
    %105 = arith.mulf %103, %104 : vector<8x1xf32>
    %106 = arith.mulf %101, %99 : vector<8x648xf32>
    %cst_86 = arith.constant dense<0.000000e+00> : vector<8xf32>
    %107 = vector.multi_reduction <add>, %106, %cst_86 [1] : vector<8x648xf32> to vector<8xf32>
    %108 = vector.shape_cast %107 : vector<8xf32> to vector<8x1xf32>
    %cst_87 = arith.constant 0.001953125 : f32
    %109 = vector.broadcast %cst_87 : f32 to vector<8x1xf32>
    %110 = arith.mulf %108, %109 : vector<8x1xf32>
    %111 = arith.mulf %105, %105 : vector<8x1xf32>
    %112 = arith.subf %110, %111 : vector<8x1xf32>
    %c0_88 = arith.constant 0 : index
    %c0_89 = arith.constant 0 : index
    %113 = vector.load %arg9[%c0_88, %c0_89] : memref<8x1xf32, #tpu.memory_space<vmem>>, vector<8x1xf32>
    %cst_90 = arith.constant 9.99999974E-6 : f32
    %114 = vector.broadcast %cst_90 : f32 to vector<8x1xf32>
    %115 = arith.addf %112, %114 : vector<8x1xf32>
    %116 = math.rsqrt %115 : vector<8x1xf32>
    %117 = arith.mulf %113, %116 : vector<8x1xf32>
    %c0_91 = arith.constant 0 : index
    %c0_92 = arith.constant 0 : index
    %118 = vector.load %arg10[%c0_91, %c0_92] : memref<8x1xf32, #tpu.memory_space<vmem>>, vector<8x1xf32>
    %119 = arith.mulf %105, %117 : vector<8x1xf32>
    %120 = arith.subf %118, %119 : vector<8x1xf32>
    %121 = vector.broadcast %117 : vector<8x1xf32> to vector<8x648xf32>
    %122 = arith.mulf %99, %121 : vector<8x648xf32>
    %123 = vector.broadcast %120 : vector<8x1xf32> to vector<8x648xf32>
    %124 = arith.addf %122, %123 : vector<8x648xf32>
    %cst_93 = arith.constant 0.000000e+00 : f32
    %125 = vector.broadcast %cst_93 : f32 to vector<8x648xf32>
    %126 = arith.maximumf %124, %125 : vector<8x648xf32>
    %127 = vector.broadcast %5 : vector<1x648xf32> to vector<8x648xf32>
    %128 = arith.mulf %126, %127 : vector<8x648xf32>
    %cst_94 = arith.constant 0.000000e+00 : f32
    %129 = vector.broadcast %cst_94 : f32 to vector<8x128xf32>
    %c0_95 = arith.constant 0 : index
    %c0_96 = arith.constant 0 : index
    %130 = vector.load %arg16[%c0_95, %c0_96] : memref<8x896xf32, #tpu.memory_space<vmem>>, vector<8x128xf32>
    tpu.vector_store %arg16[%c0_95, %c0_96], %129 {strides = array<i32>} : memref<8x896xf32, #tpu.memory_space<vmem>>, vector<8x128xf32>,
    %cst_97 = arith.constant 0.000000e+00 : f32
    %131 = vector.broadcast %cst_97 : f32 to vector<8x120xf32>
    %c0_98 = arith.constant 0 : index
    %c776 = arith.constant 776 : index
    %132 = vector.load %arg16[%c0_98, %c776] : memref<8x896xf32, #tpu.memory_space<vmem>>, vector<8x120xf32>
    tpu.vector_store %arg16[%c0_98, %c776], %131 {strides = array<i32>} : memref<8x896xf32, #tpu.memory_space<vmem>>, vector<8x120xf32>,
    %c0_99 = arith.constant 0 : index
    %c128_100 = arith.constant 128 : index
    %133 = vector.load %arg16[%c0_99, %c128_100] : memref<8x896xf32, #tpu.memory_space<vmem>>, vector<8x648xf32>
    tpu.vector_store %arg16[%c0_99, %c128_100], %128 {strides = array<i32>} : memref<8x896xf32, #tpu.memory_space<vmem>>, vector<8x648xf32>,
    %cst_101 = arith.constant 0.000000e+00 : f32
    %134 = vector.broadcast %cst_101 : f32 to vector<8x648xf32>
    %c0_102 = arith.constant 0 : index
    %c0_103 = arith.constant 0 : index
    %c0_104 = arith.constant 0 : index
    %135 = vector.load %arg11[%c0_102, %c0_103, %c0_104] : memref<9x8x8xf32, #tpu.memory_space<vmem>>, vector<1x8x8xf32>
    %136 = vector.shape_cast %135 : vector<1x8x8xf32> to vector<8x8xf32>
    %c0_105 = arith.constant 0 : index
    %c109_106 = arith.constant 109 : index
    %137 = vector.load %arg16[%c0_105, %c109_106] : memref<8x896xf32, #tpu.memory_space<vmem>>, vector<8x648xf32>
    %cst_107 = arith.constant dense<0.000000e+00> : vector<8x648xf32>
    %138 = tpu.matmul %136, %137, %cst_107 {dimension_numbers = #tpu.dot_dimension_numbers<[1], [0], [0], [1], [0, 0, 1, 1], [], []>} : vector<8x8xf32>, vector<8x648xf32>, vector<8x648xf32> -> vector<8x648xf32>
    %139 = arith.addf %134, %138 : vector<8x648xf32>
    %c1_108 = arith.constant 1 : index
    %c0_109 = arith.constant 0 : index
    %c0_110 = arith.constant 0 : index
    %140 = vector.load %arg11[%c1_108, %c0_109, %c0_110] : memref<9x8x8xf32, #tpu.memory_space<vmem>>, vector<1x8x8xf32>
    %141 = vector.shape_cast %140 : vector<1x8x8xf32> to vector<8x8xf32>
    %c0_111 = arith.constant 0 : index
    %c110_112 = arith.constant 110 : index
    %142 = vector.load %arg16[%c0_111, %c110_112] : memref<8x896xf32, #tpu.memory_space<vmem>>, vector<8x648xf32>
    %cst_113 = arith.constant dense<0.000000e+00> : vector<8x648xf32>
    %143 = tpu.matmul %141, %142, %cst_113 {dimension_numbers = #tpu.dot_dimension_numbers<[1], [0], [0], [1], [0, 0, 1, 1], [], []>} : vector<8x8xf32>, vector<8x648xf32>, vector<8x648xf32> -> vector<8x648xf32>
    %144 = arith.addf %139, %143 : vector<8x648xf32>
    %c2_114 = arith.constant 2 : index
    %c0_115 = arith.constant 0 : index
    %c0_116 = arith.constant 0 : index
    %145 = vector.load %arg11[%c2_114, %c0_115, %c0_116] : memref<9x8x8xf32, #tpu.memory_space<vmem>>, vector<1x8x8xf32>
    %146 = vector.shape_cast %145 : vector<1x8x8xf32> to vector<8x8xf32>
    %c0_117 = arith.constant 0 : index
    %c111_118 = arith.constant 111 : index
    %147 = vector.load %arg16[%c0_117, %c111_118] : memref<8x896xf32, #tpu.memory_space<vmem>>, vector<8x648xf32>
    %cst_119 = arith.constant dense<0.000000e+00> : vector<8x648xf32>
    %148 = tpu.matmul %146, %147, %cst_119 {dimension_numbers = #tpu.dot_dimension_numbers<[1], [0], [0], [1], [0, 0, 1, 1], [], []>} : vector<8x8xf32>, vector<8x648xf32>, vector<8x648xf32> -> vector<8x648xf32>
    %149 = arith.addf %144, %148 : vector<8x648xf32>
    %c3_120 = arith.constant 3 : index
    %c0_121 = arith.constant 0 : index
    %c0_122 = arith.constant 0 : index
    %150 = vector.load %arg11[%c3_120, %c0_121, %c0_122] : memref<9x8x8xf32, #tpu.memory_space<vmem>>, vector<1x8x8xf32>
    %151 = vector.shape_cast %150 : vector<1x8x8xf32> to vector<8x8xf32>
    %c0_123 = arith.constant 0 : index
    %c127_124 = arith.constant 127 : index
    %152 = vector.load %arg16[%c0_123, %c127_124] : memref<8x896xf32, #tpu.memory_space<vmem>>, vector<8x648xf32>
    %cst_125 = arith.constant dense<0.000000e+00> : vector<8x648xf32>
    %153 = tpu.matmul %151, %152, %cst_125 {dimension_numbers = #tpu.dot_dimension_numbers<[1], [0], [0], [1], [0, 0, 1, 1], [], []>} : vector<8x8xf32>, vector<8x648xf32>, vector<8x648xf32> -> vector<8x648xf32>
    %154 = arith.addf %149, %153 : vector<8x648xf32>
    %c4_126 = arith.constant 4 : index
    %c0_127 = arith.constant 0 : index
    %c0_128 = arith.constant 0 : index
    %155 = vector.load %arg11[%c4_126, %c0_127, %c0_128] : memref<9x8x8xf32, #tpu.memory_space<vmem>>, vector<1x8x8xf32>
    %156 = vector.shape_cast %155 : vector<1x8x8xf32> to vector<8x8xf32>
    %c0_129 = arith.constant 0 : index
    %c128_130 = arith.constant 128 : index
    %157 = vector.load %arg16[%c0_129, %c128_130] : memref<8x896xf32, #tpu.memory_space<vmem>>, vector<8x648xf32>
    %cst_131 = arith.constant dense<0.000000e+00> : vector<8x648xf32>
    %158 = tpu.matmul %156, %157, %cst_131 {dimension_numbers = #tpu.dot_dimension_numbers<[1], [0], [0], [1], [0, 0, 1, 1], [], []>} : vector<8x8xf32>, vector<8x648xf32>, vector<8x648xf32> -> vector<8x648xf32>
    %159 = arith.addf %154, %158 : vector<8x648xf32>
    %c5_132 = arith.constant 5 : index
    %c0_133 = arith.constant 0 : index
    %c0_134 = arith.constant 0 : index
    %160 = vector.load %arg11[%c5_132, %c0_133, %c0_134] : memref<9x8x8xf32, #tpu.memory_space<vmem>>, vector<1x8x8xf32>
    %161 = vector.shape_cast %160 : vector<1x8x8xf32> to vector<8x8xf32>
    %c0_135 = arith.constant 0 : index
    %c129_136 = arith.constant 129 : index
    %162 = vector.load %arg16[%c0_135, %c129_136] : memref<8x896xf32, #tpu.memory_space<vmem>>, vector<8x648xf32>
    %cst_137 = arith.constant dense<0.000000e+00> : vector<8x648xf32>
    %163 = tpu.matmul %161, %162, %cst_137 {dimension_numbers = #tpu.dot_dimension_numbers<[1], [0], [0], [1], [0, 0, 1, 1], [], []>} : vector<8x8xf32>, vector<8x648xf32>, vector<8x648xf32> -> vector<8x648xf32>
    %164 = arith.addf %159, %163 : vector<8x648xf32>
    %c6_138 = arith.constant 6 : index
    %c0_139 = arith.constant 0 : index
    %c0_140 = arith.constant 0 : index
    %165 = vector.load %arg11[%c6_138, %c0_139, %c0_140] : memref<9x8x8xf32, #tpu.memory_space<vmem>>, vector<1x8x8xf32>
    %166 = vector.shape_cast %165 : vector<1x8x8xf32> to vector<8x8xf32>
    %c0_141 = arith.constant 0 : index
    %c145_142 = arith.constant 145 : index
    %167 = vector.load %arg16[%c0_141, %c145_142] : memref<8x896xf32, #tpu.memory_space<vmem>>, vector<8x648xf32>
    %cst_143 = arith.constant dense<0.000000e+00> : vector<8x648xf32>
    %168 = tpu.matmul %166, %167, %cst_143 {dimension_numbers = #tpu.dot_dimension_numbers<[1], [0], [0], [1], [0, 0, 1, 1], [], []>} : vector<8x8xf32>, vector<8x648xf32>, vector<8x648xf32> -> vector<8x648xf32>
    %169 = arith.addf %164, %168 : vector<8x648xf32>
    %c7_144 = arith.constant 7 : index
    %c0_145 = arith.constant 0 : index
    %c0_146 = arith.constant 0 : index
    %170 = vector.load %arg11[%c7_144, %c0_145, %c0_146] : memref<9x8x8xf32, #tpu.memory_space<vmem>>, vector<1x8x8xf32>
    %171 = vector.shape_cast %170 : vector<1x8x8xf32> to vector<8x8xf32>
    %c0_147 = arith.constant 0 : index
    %c146_148 = arith.constant 146 : index
    %172 = vector.load %arg16[%c0_147, %c146_148] : memref<8x896xf32, #tpu.memory_space<vmem>>, vector<8x648xf32>
    %cst_149 = arith.constant dense<0.000000e+00> : vector<8x648xf32>
    %173 = tpu.matmul %171, %172, %cst_149 {dimension_numbers = #tpu.dot_dimension_numbers<[1], [0], [0], [1], [0, 0, 1, 1], [], []>} : vector<8x8xf32>, vector<8x648xf32>, vector<8x648xf32> -> vector<8x648xf32>
    %174 = arith.addf %169, %173 : vector<8x648xf32>
    %c8_150 = arith.constant 8 : index
    %c0_151 = arith.constant 0 : index
    %c0_152 = arith.constant 0 : index
    %175 = vector.load %arg11[%c8_150, %c0_151, %c0_152] : memref<9x8x8xf32, #tpu.memory_space<vmem>>, vector<1x8x8xf32>
    %176 = vector.shape_cast %175 : vector<1x8x8xf32> to vector<8x8xf32>
    %c0_153 = arith.constant 0 : index
    %c147_154 = arith.constant 147 : index
    %177 = vector.load %arg16[%c0_153, %c147_154] : memref<8x896xf32, #tpu.memory_space<vmem>>, vector<8x648xf32>
    %cst_155 = arith.constant dense<0.000000e+00> : vector<8x648xf32>
    %178 = tpu.matmul %176, %177, %cst_155 {dimension_numbers = #tpu.dot_dimension_numbers<[1], [0], [0], [1], [0, 0, 1, 1], [], []>} : vector<8x8xf32>, vector<8x648xf32>, vector<8x648xf32> -> vector<8x648xf32>
    %179 = arith.addf %174, %178 : vector<8x648xf32>
    %c0_156 = arith.constant 0 : index
    %c0_157 = arith.constant 0 : index
    %180 = vector.load %arg12[%c0_156, %c0_157] : memref<8x1xf32, #tpu.memory_space<vmem>>, vector<8x1xf32>
    %181 = vector.broadcast %180 : vector<8x1xf32> to vector<8x648xf32>
    %182 = arith.addf %179, %181 : vector<8x648xf32>
    %c0_158 = arith.constant 0 : index
    %c0_159 = arith.constant 0 : index
    %183 = vector.load %arg5[%c0_158, %c0_159] : memref<324x256xf32, #tpu.memory_space<vmem>>, vector<324x256xf32>
    %cst_160 = arith.constant 0.000000e+00 : f32
    %184 = vector.broadcast %cst_160 : f32 to vector<8x1xf32>
    %cst_161 = arith.constant 0.000000e+00 : f32
    %185 = vector.broadcast %cst_161 : f32 to vector<8x1xf32>
    %186 = vector.extract_strided_slice %182 {offsets = [0, 0], sizes = [8, 324], strides = [1, 1]} : vector<8x648xf32> to vector<8x324xf32>
    %cst_162 = arith.constant dense<0.000000e+00> : vector<8x256xf32>
    %187 = tpu.matmul %186, %183, %cst_162 {dimension_numbers = #tpu.dot_dimension_numbers<[1], [0], [0], [1], [0, 0, 1, 1], [], []>} : vector<8x324xf32>, vector<324x256xf32>, vector<8x256xf32> -> vector<8x256xf32>
    %cst_163 = arith.constant dense<0.000000e+00> : vector<8xf32>
    %188 = vector.multi_reduction <add>, %187, %cst_163 [1] : vector<8x256xf32> to vector<8xf32>
    %189 = vector.shape_cast %188 : vector<8xf32> to vector<8x1xf32>
    %190 = arith.addf %184, %189 : vector<8x1xf32>
    %191 = arith.mulf %187, %187 : vector<8x256xf32>
    %cst_164 = arith.constant dense<0.000000e+00> : vector<8xf32>
    %192 = vector.multi_reduction <add>, %191, %cst_164 [1] : vector<8x256xf32> to vector<8xf32>
    %193 = vector.shape_cast %192 : vector<8xf32> to vector<8x1xf32>
    %194 = arith.addf %185, %193 : vector<8x1xf32>
    %195 = vector.extract_strided_slice %182 {offsets = [0, 324], sizes = [8, 324], strides = [1, 1]} : vector<8x648xf32> to vector<8x324xf32>
    %cst_165 = arith.constant dense<0.000000e+00> : vector<8x256xf32>
    %196 = tpu.matmul %195, %183, %cst_165 {dimension_numbers = #tpu.dot_dimension_numbers<[1], [0], [0], [1], [0, 0, 1, 1], [], []>} : vector<8x324xf32>, vector<324x256xf32>, vector<8x256xf32> -> vector<8x256xf32>
    %cst_166 = arith.constant dense<0.000000e+00> : vector<8xf32>
    %197 = vector.multi_reduction <add>, %196, %cst_166 [1] : vector<8x256xf32> to vector<8xf32>
    %198 = vector.shape_cast %197 : vector<8xf32> to vector<8x1xf32>
    %199 = arith.addf %190, %198 : vector<8x1xf32>
    %200 = arith.mulf %196, %196 : vector<8x256xf32>
    %cst_167 = arith.constant dense<0.000000e+00> : vector<8xf32>
    %201 = vector.multi_reduction <add>, %200, %cst_167 [1] : vector<8x256xf32> to vector<8xf32>
    %202 = vector.shape_cast %201 : vector<8xf32> to vector<8x1xf32>
    %203 = arith.addf %194, %202 : vector<8x1xf32>
    %cst_168 = arith.constant 0.001953125 : f32
    %204 = vector.broadcast %cst_168 : f32 to vector<8x1xf32>
    %205 = arith.mulf %199, %204 : vector<8x1xf32>
    %cst_169 = arith.constant 0.001953125 : f32
    %206 = vector.broadcast %cst_169 : f32 to vector<8x1xf32>
    %207 = arith.mulf %203, %206 : vector<8x1xf32>
    %208 = arith.mulf %205, %205 : vector<8x1xf32>
    %209 = arith.subf %207, %208 : vector<8x1xf32>
    %c0_170 = arith.constant 0 : index
    %c0_171 = arith.constant 0 : index
    %210 = vector.load %arg13[%c0_170, %c0_171] : memref<8x1xf32, #tpu.memory_space<vmem>>, vector<8x1xf32>
    %cst_172 = arith.constant 9.99999974E-6 : f32
    %211 = vector.broadcast %cst_172 : f32 to vector<8x1xf32>
    %212 = arith.addf %209, %211 : vector<8x1xf32>
    %213 = math.rsqrt %212 : vector<8x1xf32>
    %214 = arith.mulf %210, %213 : vector<8x1xf32>
    %c0_173 = arith.constant 0 : index
    %c0_174 = arith.constant 0 : index
    %215 = vector.load %arg14[%c0_173, %c0_174] : memref<8x1xf32, #tpu.memory_space<vmem>>, vector<8x1xf32>
    %216 = arith.mulf %205, %214 : vector<8x1xf32>
    %217 = arith.subf %215, %216 : vector<8x1xf32>
    %218 = vector.broadcast %214 : vector<8x1xf32> to vector<8x256xf32>
    %219 = arith.mulf %187, %218 : vector<8x256xf32>
    %220 = vector.broadcast %217 : vector<8x1xf32> to vector<8x256xf32>
    %221 = arith.addf %219, %220 : vector<8x256xf32>
    %cst_175 = arith.constant 0.000000e+00 : f32
    %222 = vector.broadcast %cst_175 : f32 to vector<8x256xf32>
    %223 = arith.maximumf %221, %222 : vector<8x256xf32>
    %c0_176 = arith.constant 0 : index
    %c0_177 = arith.constant 0 : index
    %c0_178 = arith.constant 0 : index
    %224 = vector.load %arg15[%c0_176, %c0_177, %c0_178] : memref<2x8x256xf32, #tpu.memory_space<vmem>>, vector<1x8x256xf32>
    %225 = vector.shape_cast %224 : vector<1x8x256xf32> to vector<8x256xf32>
    %226 = vector.shape_cast %223 : vector<8x256xf32> to vector<1x8x256xf32>
    tpu.vector_store %arg15[%c0_176, %c0_177, %c0_178], %226 {strides = array<i32>} : memref<2x8x256xf32, #tpu.memory_space<vmem>>, vector<1x8x256xf32>,
    %227 = vector.broadcast %214 : vector<8x1xf32> to vector<8x256xf32>
    %228 = arith.mulf %196, %227 : vector<8x256xf32>
    %229 = vector.broadcast %217 : vector<8x1xf32> to vector<8x256xf32>
    %230 = arith.addf %228, %229 : vector<8x256xf32>
    %cst_179 = arith.constant 0.000000e+00 : f32
    %231 = vector.broadcast %cst_179 : f32 to vector<8x256xf32>
    %232 = arith.maximumf %230, %231 : vector<8x256xf32>
    %c1_180 = arith.constant 1 : index
    %c0_181 = arith.constant 0 : index
    %c0_182 = arith.constant 0 : index
    %233 = vector.load %arg15[%c1_180, %c0_181, %c0_182] : memref<2x8x256xf32, #tpu.memory_space<vmem>>, vector<1x8x256xf32>
    %234 = vector.shape_cast %233 : vector<1x8x256xf32> to vector<8x256xf32>
    %235 = vector.shape_cast %232 : vector<8x256xf32> to vector<1x8x256xf32>
    tpu.vector_store %arg15[%c1_180, %c0_181, %c0_182], %235 {strides = array<i32>} : memref<2x8x256xf32, #tpu.memory_space<vmem>>, vector<1x8x256xf32>,
    return
  }
}

</mosaic_0001>

<bundles_post_ra>
// kernel: tpu_custom_call.1
= control target key start
LH: loop header
LB: loop body
LE: loop exit
PB: predicated region body
PF: predicated region fallthrough
CT: control target
= control target key end

     0   :  { %20 = vsyncpa [#allocation4], 0  ;;  %s9959_s0 = inlined_call_operand.vmem [shape: f32[8,128], index: 0, kind: input, shape index: {}]   ;;  %s9960_s1 = inlined_call_operand.vmem [shape: f32[8,896], index: 1, kind: input, shape index: {}]   ;;  %s9961_s2 = inlined_call_operand.vmem [shape: f32[2,8], index: 2, kind: input, shape index: {}]   ;;  %s9962_s3 = inlined_call_operand.hbm [shape: f32[128,896], index: 3, kind: input, shape index: {}]   ;;  %s9963_s4 = inlined_call_operand.vmem [shape: f32[1,648], index: 4, kind: input, shape index: {}]   ;;  %s9964_s5 = inlined_call_operand.hbm [shape: f32[324,256], index: 5, kind: input, shape index: {}]   ;;  %s9965_s6 = inlined_call_operand.vmem [shape: f32[9,8,8], index: 6, kind: input, shape index: {}]   ;;  %s9966_s7 = inlined_call_operand.vmem [shape: f32[9,8,2], index: 7, kind: input, shape index: {}]   ;;  %s9967_s8 = inlined_call_operand.vmem [shape: f32[8,1], index: 8, kind: input, shape index: {}]   ;;  %s9968_s9 = inlined_call_operand.vmem [shape: f32[8,1], index: 9, kind: input, shape index: {}]   ;;  %s9969_s10 = inlined_call_operand.vmem [shape: f32[8,1], index: 10, kind: input, shape index: {}]   ;;  %s9970_s11 = inlined_call_operand.vmem [shape: f32[9,8,8], index: 11, kind: input, shape index: {}]   ;;  %s9971_s12 = inlined_call_operand.vmem [shape: f32[8,1], index: 12, kind: input, shape index: {}]   ;;  %s9972_s13 = inlined_call_operand.vmem [shape: f32[8,1], index: 13, kind: input, shape index: {}]   ;;  %s9973_s14 = inlined_call_operand.vmem [shape: f32[8,1], index: 14, kind: input, shape index: {}]   ;;  %s9974_s15 = inlined_call_operand.hbm [shape: f32[2,8,256], index: 15, kind: output, shape index: {}]  }
   0x1   :  { %21 = vsyncpa [#allocation7], 0 }
   0x2   :  { %22 = vsyncpa [#allocation5], 0  ;;  %s8635_s18 = smov [#allocation3]   ;;  %s8563_s22 = scalar_lea.hbm %s9962_s3, 14336 }
   0x3   :  { %s34_s19 = sshll.u32 %s8635_s18, 4  ;;  %p8564_p0 = scmp.ne.s32.totalorder %s9962_s3, %s8563_s22  ;;  %s35_s19 = int_to_ptr.vmem [resolvable:$true] %s34_s19 }
   0x4   :  { %p8567_p1 = scmp.lt.u32.totalorder %s8563_s22, %s9962_s3 }
   0x6   :  { %p8569_p2 = pnand %p8567_p1, %p8564_p0 }
   0x8   :  { %8572 = shalt.err (!%p8569_p2)
}
   0x9   :  { %s8573_s27 = scalar_lea.vmem %s35_s19, 14336  ;;  %p8578_p4 = scmp.lt.s32.totalorder %s35_s19, %s35_s19 }
   0xa   :  { %p8574_p3 = scmp.ne.s32.totalorder %s35_s19, %s8573_s27  ;;  %p8579_p5 = scmp.lt.s32.totalorder %s8573_s27, %s8573_s27 }
   0xc   :  { %p8580_p6 = por %p8579_p5, %p8578_p4 }
   0xe   :  { %p8581_p7 = pnand %p8580_p6, %p8574_p3 }
  0x10   :  { %8584 = shalt.err (!%p8581_p7)
}
  0x11   :  { %s8636_s28 = smov 896   ;;  %s8637_s29 = smov 56  }
  0x12   :  { %40 = dma.hbm_to_vmem [thread:$0]  %s9962_s3, 14336, %s35_s19, [#allocation4], %s8636_s28, %s8636_s28, %s8637_s29  }
  0x13   :  { %s8638_s17 = smov [#allocation6]   ;;  %s8585_s22 = scalar_lea.hbm %s9964_s5, 10496 }
  0x14   :  { %s48_s18 = sshll.u32 %s8638_s17, 4  ;;  %p8586_p8 = scmp.ne.s32.totalorder %s9964_s5, %s8585_s22  ;;  %s49_s18 = int_to_ptr.vmem [resolvable:$true] %s48_s18 }
  0x15   :  { %p8589_p9 = scmp.lt.u32.totalorder %s8585_s22, %s9964_s5 }
  0x17   :  { %p8591_p10 = pnand %p8589_p9, %p8586_p8 }
  0x19   :  { %8594 = shalt.err (!%p8591_p10)
}
  0x1a   :  { %s8595_s27 = scalar_lea.vmem %s49_s18, 10496  ;;  %p8600_p12 = scmp.lt.s32.totalorder %s49_s18, %s49_s18 }
  0x1b   :  { %p8596_p11 = scmp.ne.s32.totalorder %s49_s18, %s8595_s27  ;;  %p8601_p13 = scmp.lt.s32.totalorder %s8595_s27, %s8595_s27 }
  0x1d   :  { %p8602_p0 = por %p8601_p13, %p8600_p12 }
  0x1f   :  { %p8603_p1 = pnand %p8602_p0, %p8596_p11 }
  0x21   :  { %8606 = shalt.err (!%p8603_p1)
}
  0x22   :  { %s8639_s3 = smov 256   ;;  %s8640_s19 = smov 16  }
  0x23   :  { %54 = dma.hbm_to_vmem [thread:$0]  %s9964_s5, 10496, %s49_s18, [#allocation7], %s8639_s3, %s8639_s3, %s8640_s19  }
  0x24   :  { %8629 = dma.done.wait [#allocation4], 14336  }
  0x25   :  { %8630 = vsyncadd [#allocation4], 4294952960 }
  0x26   :  { %8631 = dma.done.wait [#allocation7], 10496  }
  0x27   :  { %8632 = vsyncadd [#allocation7], 4294956800  ;;  %v8641_v0 = vmov 0.0   ;;  %vm8642_vm0 = vmmov 0   ;;  %vm81_vm1 = vcmask 64512   ;;  %v80_v1 = vld [vmem:[%s9959_s0] sm:$0xff] }
  0x28   :  { %8056 = vmatprep.subr.mxu0 %v8641_v0  ;;  %5162 = vst [vmem:[#allocation2] sm:$0xff] %v8641_v0  ;;  %8058 = vmatprep.mubr.msk.f32.mxu0 %vm8642_vm0, %v8641_v0  ;;  %v79_v2 = vld [vmem:[%s9961_s2] sm:$0x3]  ;;  %v163_v4 = vld [vmem:[#allocation3 + $0x40] sm:$0xff]  ;;  %v158_v5 = vld [vmem:[#allocation3 + $0x18] sm:$0xff]  ;;  %s8644_s21 = smov 19  }
  0x29   :  { %331 = vmatprep.mubr.f32.mxu1 %v8641_v0  ;;  %v156_v3 = vld [vmem:[#allocation3 + $0x8] sm:$0xff]  ;;  %8057 = vmatpush3.msra.mxu0 %v80_v1  ;;  %v165_v6 = vld [vmem:[#allocation3 + $0x50] sm:$0xff]  ;;  %v155_v9 = vld [vmem:[#allocation3] sm:$0xff]  ;;  %s8645_s30 = smov 18   ;;  %s8646_s16 = smov 17   ;;  %vm587_vm2 = vcmask 1041408  }
  0x2a   :  { %8059 = vmatmul.mubr.msk.f32.vlgmr.msra.gmra.mrb[0].mxu0 %vm81_vm1, %v79_v2  ;;  %v8096_v7 = vpack.c.bf16 %v163_v4, %v156_v3  ;;  %v8128_v8 = vpack.c.bf16 %v165_v6, %v158_v5  ;;  %v162_v10 = vld [vmem:[#allocation3 + $0x38] sm:$0xff]  ;;  %v157_v11 = vld [vmem:[#allocation3 + $0x10] sm:$0xff]  ;;  %v164_v13 = vld [vmem:[#allocation3 + $0x48] sm:$0xff]  ;;  %s8647_s5 = smov 1   ;;  %s8649_s2 = smov 111   ;;  %vm577_vm3 = vcmask 154624  }
  0x2b   :  { %v8098_v12 = vpack.c.bf16 %v162_v10, %v155_v9  ;;  %v170_v14 = vld [vmem:[#allocation3 + $0x78] sm:$0xff]  ;;  %v177_v15 = vld [vmem:[#allocation3 + $0xb0] sm:$0xff]  ;;  %402 = vmatprep.mubr.f32.mxu0 %v8641_v0  ;;  %v8130_v16 = vpack.c.bf16 %v164_v13, %v157_v11  ;;  %v172_v18 = vld [vmem:[#allocation3 + $0x88] sm:$0xff]  ;;  %s8650_s18 = smov 110   ;;  %vm583_vm4 = vcmask 15360   ;;  %s8651_s23 = smov 109  }
  0x2c   :  { %8097 = vmatprep.subr.bf16.mxu1 %v8096_v7  ;;  %8129 = vmatprep.subr.bf16.mxu0 %v8128_v8  ;;  %v8100_v17 = vpack.c.bf16 %v177_v15, %v170_v14  ;;  %v179_v19 = vld [vmem:[#allocation3 + $0xc0] sm:$0xff]  ;;  %v169_v20 = vld [vmem:[#allocation3 + $0x70] sm:$0xff]  ;;  %v176_v22 = vld [vmem:[#allocation3 + $0xa8] sm:$0xff]  ;;  %vm1072_vm5 = vcmask 146432   ;;  %vm1573_vm6 = vcmask 138240   ;;  %vm2090_vm7 = vcmask 7168  }
  0x2d   :  { %8099 = vmatpush1.bf16.msra.mxu1 %v8098_v12  ;;  %v8132_v21 = vpack.c.bf16 %v179_v19, %v172_v18  ;;  %v171_v23 = vld [vmem:[#allocation3 + $0x80] sm:$0xff]  ;;  %v178_v24 = vld [vmem:[#allocation3 + $0xb8] sm:$0xff]  ;;  %8131 = vmatpush1.bf16.msra.mxu0 %v8130_v16  ;;  %v8102_v25 = vpack.c.bf16 %v176_v22, %v169_v20  ;;  %v184_v27 = vld [vmem:[#allocation3 + $0xe8] sm:$0xff]  ;;  %vm3056_vm8 = vcmask 1039360   ;;  %vm3557_vm9 = vcmask 908288   ;;  %s8654_s29 = smov [#allocation8]  }
  0x2e   :  { %8101 = vmatprep.subr.bf16.mxu1 %v8100_v17  ;;  %v8134_v26 = vpack.c.bf16 %v178_v24, %v171_v23  ;;  %v191_v28 = vld [vmem:[#allocation3 + $0x120] sm:$0xff]  ;;  %v186_v29 = vld [vmem:[#allocation3 + $0xf8] sm:$0xff]  ;;  %v193_v31 = vld [vmem:[#allocation3 + $0x130] sm:$0xff]  ;;  %vm4058_vm10 = vcmask 900096   ;;  %vm4559_vm11 = vcmask 891904   ;;  %vm5163_vm12 = vcmask 1047616  }
  0x2f   :  { %8133 = vmatprep.subr.bf16.mxu0 %v8132_v21  ;;  %v8104_v30 = vpack.c.bf16 %v191_v28, %v184_v27  ;;  %v183_v32 = vld [vmem:[#allocation3 + $0xe0] sm:$0xff]  ;;  %v190_v33 = vld [vmem:[#allocation3 + $0x118] sm:$0xff]  ;;  %v8136_v34 = vpack.c.bf16 %v193_v31, %v186_v29  ;;  %v185_v35 = vld [vmem:[#allocation3 + $0xf0] sm:$0xff]  ;;  %vm7485_vm13 = vcmask 1043456   ;;  %vm7481_vm14 = vcmask 556032  }
  0x30   :  { %v192_v36 = vld [vmem:[#allocation3 + $0x128] sm:$0xff]  ;;  %v198_v37 = vld [vmem:[#allocation3 + $0x158] sm:$0xff]  ;;  %v8106_v38 = vpack.c.bf16 %v190_v33, %v183_v32  ;;  %v205_v39 = vld [vmem:[#allocation3 + $0x190] sm:$0xff]  ;;  %vm7655_vm15 = vcmask 490496  }
  0x31   :  { %8103 = vmatpush1.bf16.msra.mxu1 %v8102_v25  ;;  %v200_v40 = vld [vmem:[#allocation3 + $0x168] sm:$0xff]  ;;  %v207_v41 = vld [vmem:[#allocation3 + $0x1a0] sm:$0xff]  ;;  %8135 = vmatpush1.bf16.msra.mxu0 %v8134_v26  ;;  %v8138_v42 = vpack.c.bf16 %v192_v36, %v185_v35  ;;  %v8108_v43 = vpack.c.bf16 %v205_v39, %v198_v37  ;;  %v197_v44 = vld [vmem:[#allocation3 + $0x150] sm:$0xff]  ;;  %v8643_v39 = vmov 0.0|0.0  }
  0x32   :  { %8105 = vmatprep.subr.bf16.mxu1 %v8104_v30  ;;  %v204_v45 = vld [vmem:[#allocation3 + $0x188] sm:$0xff]  ;;  %v199_v46 = vld [vmem:[#allocation3 + $0x160] sm:$0xff]  ;;  %8137 = vmatprep.subr.bf16.mxu0 %v8136_v34  ;;  %v8140_v47 = vpack.c.bf16 %v207_v41, %v200_v40  ;;  %v206_v48 = vld [vmem:[#allocation3 + $0x198] sm:$0xff] }
  0x33   :  { %v212_v49 = vld [vmem:[#allocation3 + $0x1c8] sm:$0xff]  ;;  %v219_v50 = vld [vmem:[#allocation3 + $0x200] sm:$0xff]  ;;  %v214_v51 = vld [vmem:[#allocation3 + $0x1d8] sm:$0xff]  ;;  %v8110_v53 = vpack.c.bf16 %v204_v45, %v197_v44  ;;  %v8142_v54 = vpack.c.bf16 %v206_v48, %v199_v46 }
  0x34   :  { %v221_v52 = vld [vmem:[#allocation3 + $0x210] sm:$0xff]  ;;  %v8112_v55 = vpack.c.bf16 %v219_v50, %v212_v49  ;;  %v211_v56 = vld [vmem:[#allocation3 + $0x1c0] sm:$0xff]  ;;  %v218_v57 = vld [vmem:[#allocation3 + $0x1f8] sm:$0xff] }
  0x35   :  { %8107 = vmatpush1.bf16.msra.mxu1 %v8106_v38  ;;  %8139 = vmatpush1.bf16.msra.mxu0 %v8138_v42  ;;  %v213_v58 = vld [vmem:[#allocation3 + $0x1d0] sm:$0xff]  ;;  %v8144_v59 = vpack.c.bf16 %v221_v52, %v214_v51  ;;  %v220_v60 = vld [vmem:[#allocation3 + $0x208] sm:$0xff]  ;;  %v226_v61 = vld [vmem:[#allocation3 + $0x238] sm:$0xff]  ;;  %v8114_v2 = vpack.c.bf16 %v218_v57, %v211_v56 }
  0x36   :  { %8109 = vmatprep.subr.bf16.mxu1 %v8108_v43  ;;  %8141 = vmatprep.subr.bf16.mxu0 %v8140_v47  ;;  %v233_v62 = vld [vmem:[#allocation3 + $0x270] sm:$0xff]  ;;  %v228_v63 = vld [vmem:[#allocation3 + $0x248] sm:$0xff]  ;;  %v235_v1 = vld [vmem:[#allocation3 + $0x280] sm:$0xff]  ;;  %v8146_v3 = vpack.c.bf16 %v220_v60, %v213_v58 }
  0x37   :  { %v8116_v4 = vpack.c.bf16 %v233_v62, %v226_v61  ;;  %v225_v5 = vld [vmem:[#allocation3 + $0x230] sm:$0xff]  ;;  %v232_v6 = vld [vmem:[#allocation3 + $0x268] sm:$0xff]  ;;  %v227_v7 = vld [vmem:[#allocation3 + $0x240] sm:$0xff]  ;;  %v8148_v8 = vpack.c.bf16 %v235_v1, %v228_v63 }
  0x38   :  { %v234_v9 = vld [vmem:[#allocation3 + $0x278] sm:$0xff]  ;;  %v240_v10 = vld [vmem:[#allocation3 + $0x2a8] sm:$0xff]  ;;  %v247_v11 = vld [vmem:[#allocation3 + $0x2e0] sm:$0xff]  ;;  %v8118_v14 = vpack.c.bf16 %v232_v6, %v225_v5 }
  0x39   :  { %8111 = vmatpush1.bf16.msra.mxu1 %v8110_v53  ;;  %8143 = vmatpush1.bf16.msra.mxu0 %v8142_v54  ;;  %v242_v12 = vld [vmem:[#allocation3 + $0x2b8] sm:$0xff]  ;;  %v249_v13 = vld [vmem:[#allocation3 + $0x2f0] sm:$0xff]  ;;  %v8150_v15 = vpack.c.bf16 %v234_v9, %v227_v7  ;;  %v8120_v16 = vpack.c.bf16 %v247_v11, %v240_v10  ;;  %v239_v17 = vld [vmem:[#allocation3 + $0x2a0] sm:$0xff] }
  0x3a   :  { %8113 = vmatprep.subr.bf16.mxu1 %v8112_v55  ;;  %8145 = vmatprep.subr.bf16.mxu0 %v8144_v59  ;;  %v246_v18 = vld [vmem:[#allocation3 + $0x2d8] sm:$0xff]  ;;  %v241_v19 = vld [vmem:[#allocation3 + $0x2b0] sm:$0xff]  ;;  %v8152_v20 = vpack.c.bf16 %v249_v13, %v242_v12  ;;  %v248_v21 = vld [vmem:[#allocation3 + $0x2e8] sm:$0xff] }
  0x3b   :  { %v254_v22 = vld [vmem:[#allocation3 + $0x318] sm:$0xff]  ;;  %v261_v23 = vld [vmem:[#allocation3 + $0x350] sm:$0xff]  ;;  %v256_v24 = vld [vmem:[#allocation3 + $0x328] sm:$0xff]  ;;  %v8122_v26 = vpack.c.bf16 %v246_v18, %v239_v17  ;;  %v8154_v27 = vpack.c.bf16 %v248_v21, %v241_v19 }
  0x3c   :  { %v263_v25 = vld [vmem:[#allocation3 + $0x360] sm:$0xff]  ;;  %v8124_v28 = vpack.c.bf16 %v261_v23, %v254_v22  ;;  %v253_v29 = vld [vmem:[#allocation3 + $0x310] sm:$0xff]  ;;  %v260_v30 = vld [vmem:[#allocation3 + $0x348] sm:$0xff] }
  0x3d   :  { %8115 = vmatpush1.bf16.msra.mxu1 %v8114_v2  ;;  %8147 = vmatpush1.bf16.msra.mxu0 %v8146_v3  ;;  %v8156_v31 = vpack.c.bf16 %v263_v25, %v256_v24  ;;  %v255_v32 = vld [vmem:[#allocation3 + $0x320] sm:$0xff]  ;;  %v262_v33 = vld [vmem:[#allocation3 + $0x358] sm:$0xff]  ;;  %v8126_v34 = vpack.c.bf16 %v260_v30, %v253_v29  ;;  %v160_v36 = vld [vmem:[#allocation3 + $0x28] sm:$0xff] }
  0x3e   :  { %8117 = vmatprep.subr.bf16.mxu1 %v8116_v4  ;;  %8149 = vmatprep.subr.bf16.mxu0 %v8148_v8  ;;  %v8158_v35 = vpack.c.bf16 %v262_v33, %v255_v32  ;;  %v167_v37 = vld [vmem:[#allocation3 + $0x60] sm:$0xff]  ;;  %v8779_v40 = vld [vmem:[%s9960_s1 + $0x10] sm:$0xff]  ;;  %v8784_v41 = vld [vmem:[%s9960_s1 + $0x8] sm:$0xff] }
  0x3f   :  { %v8160_v38 = vpack.c.bf16 %v167_v37, %v160_v36  ;;  %823 = vrot.lane.b32.xlu1 %v8779_v40, %s8644_s21  ;;  %821 = vrot.lane.b32.xlu0 %v8784_v41, %s8644_s21  ;;  %v8793_v42 = vld [vmem:[%s9960_s1 + $0x18] sm:$0xff]  ;;  %v8798_v43 = vld [vmem:[%s9960_s1] sm:$0xff]  ;;  %v166_v47 = vld [vmem:[#allocation3 + $0x58] sm:$0xff] }
  0x40   :  { %v8807_v44 = vld [vmem:[%s9960_s1 + $0x28] sm:$0xff]  ;;  %v8812_v45 = vld [vmem:[%s9960_s1 + $0x20] sm:$0xff]  ;;  %v159_v46 = vld [vmem:[#allocation3 + $0x20] sm:$0xff] }
  0x41   :  { %8119 = vmatpush1.bf16.msra.mxu1 %v8118_v14  ;;  %8151 = vmatpush1.bf16.msra.mxu0 %v8150_v15  ;;  %v161_v48 = vld [vmem:[#allocation3 + $0x30] sm:$0xff]  ;;  %v168_v49 = vld [vmem:[#allocation3 + $0x68] sm:$0xff]  ;;  %v174_v50 = vld [vmem:[#allocation3 + $0x98] sm:$0xff]  ;;  %v8162_v52 = vpack.c.bf16 %v166_v47, %v159_v46 }
  0x42   :  { %8121 = vmatprep.subr.bf16.mxu1 %v8120_v16  ;;  %8153 = vmatprep.subr.bf16.mxu0 %v8152_v20  ;;  %v181_v51 = vld [vmem:[#allocation3 + $0xd0] sm:$0xff]  ;;  %v8193_v53 = vpack.c.bf16 %v168_v49, %v161_v48  ;;  %v180_v56 = vld [vmem:[#allocation3 + $0xc8] sm:$0xff]  ;;  %v175_v57 = vld [vmem:[#allocation3 + $0xa0] sm:$0xff] }
  0x43   :  { %825 = vrot.lane.b32.xlu1 %v8793_v42, %s8644_s21  ;;  %819 = vrot.lane.b32.xlu0 %v8798_v43, %s8644_s21  ;;  %v173_v54 = vld [vmem:[#allocation3 + $0x90] sm:$0xff]  ;;  %v8164_v55 = vpack.c.bf16 %v181_v51, %v174_v50  ;;  %v182_v58 = vld [vmem:[#allocation3 + $0xd8] sm:$0xff]  ;;  %v188_v60 = vld [vmem:[#allocation3 + $0x108] sm:$0xff] }
  0x44   :  { %v195_v61 = vld [vmem:[#allocation3 + $0x140] sm:$0xff]  ;;  %v8166_v63 = vpack.c.bf16 %v180_v56, %v173_v54  ;;  %v8196_v1 = vpack.c.bf16 %v182_v58, %v175_v57  ;;  %v194_v4 = vld [vmem:[#allocation3 + $0x138] sm:$0xff]  ;;  %v189_v5 = vld [vmem:[#allocation3 + $0x110] sm:$0xff] }
  0x45   :  { %8123 = vmatpush1.bf16.msra.mxu1 %v8122_v26  ;;  %8155 = vmatpush1.bf16.msra.mxu0 %v8154_v27  ;;  %v187_v2 = vld [vmem:[#allocation3 + $0x100] sm:$0xff]  ;;  %v8168_v3 = vpack.c.bf16 %v195_v61, %v188_v60  ;;  %v196_v6 = vld [vmem:[#allocation3 + $0x148] sm:$0xff]  ;;  %v202_v7 = vld [vmem:[#allocation3 + $0x178] sm:$0xff] }
  0x46   :  { %8125 = vmatprep.subr.bf16.mxu1 %v8124_v28  ;;  %8157 = vmatprep.subr.bf16.mxu0 %v8156_v31  ;;  %v209_v8 = vld [vmem:[#allocation3 + $0x1b0] sm:$0xff]  ;;  %v8170_v9 = vpack.c.bf16 %v194_v4, %v187_v2  ;;  %v8199_v10 = vpack.c.bf16 %v196_v6, %v189_v5  ;;  %v208_v13 = vld [vmem:[#allocation3 + $0x1a8] sm:$0xff]  ;;  %v203_v14 = vld [vmem:[#allocation3 + $0x180] sm:$0xff] }
  0x47   :  { %829 = vrot.lane.b32.xlu1 %v8807_v44, %s8644_s21  ;;  %827 = vrot.lane.b32.xlu0 %v8812_v45, %s8644_s21  ;;  %v201_v11 = vld [vmem:[#allocation3 + $0x170] sm:$0xff]  ;;  %v8172_v12 = vpack.c.bf16 %v209_v8, %v202_v7  ;;  %v210_v15 = vld [vmem:[#allocation3 + $0x1b8] sm:$0xff]  ;;  %v216_v16 = vld [vmem:[#allocation3 + $0x1e8] sm:$0xff] }
  0x48   :  { %v223_v17 = vld [vmem:[#allocation3 + $0x220] sm:$0xff]  ;;  %v8174_v18 = vpack.c.bf16 %v208_v13, %v201_v11  ;;  %v8202_v19 = vpack.c.bf16 %v210_v15, %v203_v14  ;;  %v222_v22 = vld [vmem:[#allocation3 + $0x218] sm:$0xff]  ;;  %v217_v23 = vld [vmem:[#allocation3 + $0x1f0] sm:$0xff] }
  0x49   :  { %8127 = vmatpush1.bf16.msra.mxu1 %v8126_v34  ;;  %8159 = vmatpush1.bf16.msra.mxu0 %v8158_v35  ;;  %v215_v20 = vld [vmem:[#allocation3 + $0x1e0] sm:$0xff]  ;;  %v8176_v21 = vpack.c.bf16 %v223_v17, %v216_v16  ;;  %v224_v24 = vld [vmem:[#allocation3 + $0x228] sm:$0xff]  ;;  %v230_v25 = vld [vmem:[#allocation3 + $0x258] sm:$0xff] }
  0x4a   :  { %8161 = vmatprep.subr.bf16.mxu1 %v8160_v38  ;;  %8192 = vmatprep.subr.bf16.mxu0 %v8643_v39  ;;  %v237_v26 = vld [vmem:[#allocation3 + $0x290] sm:$0xff]  ;;  %v8178_v27 = vpack.c.bf16 %v222_v22, %v215_v20  ;;  %v8205_v28 = vpack.c.bf16 %v224_v24, %v217_v23  ;;  %v236_v31 = vld [vmem:[#allocation3 + $0x288] sm:$0xff]  ;;  %v231_v32 = vld [vmem:[#allocation3 + $0x260] sm:$0xff] }
  0x4b   :  { %1064 = vrot.lane.b32.xlu1 %v8779_v40, %s8645_s30  ;;  %1062 = vrot.lane.b32.xlu0 %v8784_v41, %s8645_s30  ;;  %v229_v29 = vld [vmem:[#allocation3 + $0x250] sm:$0xff]  ;;  %v8180_v30 = vpack.c.bf16 %v237_v26, %v230_v25  ;;  %v238_v33 = vld [vmem:[#allocation3 + $0x298] sm:$0xff]  ;;  %v244_v34 = vld [vmem:[#allocation3 + $0x2c8] sm:$0xff] }
  0x4c   :  { %v251_v35 = vld [vmem:[#allocation3 + $0x300] sm:$0xff]  ;;  %v8182_v36 = vpack.c.bf16 %v236_v31, %v229_v29  ;;  %v8208_v37 = vpack.c.bf16 %v238_v33, %v231_v32  ;;  %v250_v47 = vld [vmem:[#allocation3 + $0x2f8] sm:$0xff]  ;;  %v245_v48 = vld [vmem:[#allocation3 + $0x2d0] sm:$0xff] }
  0x4d   :  { %v243_v38 = vld [vmem:[#allocation3 + $0x2c0] sm:$0xff]  ;;  %v8184_v46 = vpack.c.bf16 %v251_v35, %v244_v34  ;;  %v252_v49 = vld [vmem:[#allocation3 + $0x308] sm:$0xff]  ;;  %v258_v50 = vld [vmem:[#allocation3 + $0x338] sm:$0xff] }
  0x4e   :  { %v265_v51 = vld [vmem:[#allocation3 + $0x370] sm:$0xff]  ;;  %v264_v56 = vld [vmem:[#allocation3 + $0x368] sm:$0xff]  ;;  %v259_v57 = vld [vmem:[#allocation3 + $0x340] sm:$0xff] }
  0x4f   :  { %1066 = vrot.lane.b32.xlu1 %v8793_v42, %s8645_s30  ;;  %1060 = vrot.lane.b32.xlu0 %v8798_v43, %s8645_s30  ;;  %v257_v54 = vld [vmem:[#allocation3 + $0x330] sm:$0xff]  ;;  %v266_v58 = vld [vmem:[#allocation3 + $0x378] sm:$0xff]  ;;  %v558_v29 = vld [vmem:[%s9966_s7] sm:$0xff] }
  0x50   :  { %v8190_v60 = vpack.c.bf16 %v264_v56, %v257_v54  ;;  %v8214_v61 = vpack.c.bf16 %v266_v58, %v259_v57  ;;  %v8918_v5 = vld [vmem:[%s9960_s1 + $0x30] sm:$0xff]  ;;  %s8648_s1 = smov 127  }
  0x53   :  { %1070 = vrot.lane.b32.xlu1 %v8807_v44, %s8645_s30  ;;  %1068 = vrot.lane.b32.xlu0 %v8812_v45, %s8645_s30 }
  0x57   :  { %1565 = vrot.lane.b32.xlu1 %v8779_v40, %s8646_s16  ;;  %1563 = vrot.lane.b32.xlu0 %v8784_v41, %s8646_s16 }
  0x5b   :  { %1567 = vrot.lane.b32.xlu1 %v8793_v42, %s8646_s16  ;;  %1561 = vrot.lane.b32.xlu0 %v8798_v43, %s8646_s16 }
  0x5f   :  { %1571 = vrot.lane.b32.xlu1 %v8807_v44, %s8646_s16  ;;  %1569 = vrot.lane.b32.xlu0 %v8812_v45, %s8646_s16 }
  0xb1   :  { %v8922_v6 = vpop.permute.xlu0 %821  ;;  %v8933_v7 = vpop.permute.xlu1 %823 }
  0xfd   :  { %v8842_v59 = vpop.f32.mrb[0].mxu0 }
  0xfe   :  { %v8060_v62 = vpop.f32.mrb[1].mxu0  ;;  %332 = vmatmul.mubr.f32.vlgmr.msra.gmra.mrb[0].mxu1 %v8842_v59  ;;  %403 = vmatmul.mubr.f32.vlgmr.msra.gmra.mrb[2].mxu0 %v8842_v59 }
  0xff   :  { %8163 = vmatpush1.bf16.msra.mxu1 %v8162_v52  ;;  %8194 = vmatpush3.bf16.msra.mxu0 %v8193_v53  ;;  %v8186_v52 = vpack.c.bf16 %v250_v47, %v243_v38  ;;  %v8211_v53 = vpack.c.bf16 %v252_v49, %v245_v48  ;;  %v832_v48 = vsel %vm577_vm3, %v8922_v6, %v8933_v7 }
 0x100   :  { %8165 = vmatprep.subr.bf16.mxu1 %v8164_v55  ;;  %8195 = vmatprep.subr.bf16.mxu0 %v8643_v39  ;;  %v8188_v55 = vpack.c.bf16 %v265_v51, %v258_v50 }
 0x101   :  { %473 = vmatprep.mubr.f32.mxu1 %v8641_v0  ;;  %8093 = vmatprep.mubr.msk.f32.mxu0 %vm8642_vm0, %v8641_v0 }
 0x103   :  { %8167 = vmatpush1.bf16.msra.mxu1 %v8166_v63  ;;  %8197 = vmatpush3.bf16.msra.mxu0 %v8196_v1 }
 0x104   :  { %8169 = vmatprep.subr.bf16.mxu1 %v8168_v3  ;;  %8198 = vmatprep.subr.bf16.mxu0 %v8643_v39 }
 0x107   :  { %8171 = vmatpush1.bf16.msra.mxu1 %v8170_v9  ;;  %8200 = vmatpush3.bf16.msra.mxu0 %v8199_v10  ;;  %v8943_v9 = vpop.permute.xlu1 %825 }
 0x108   :  { %8173 = vmatprep.subr.bf16.mxu1 %v8172_v12  ;;  %8201 = vmatprep.subr.bf16.mxu0 %v8643_v39 }
 0x10b   :  { %8175 = vmatpush1.bf16.msra.mxu1 %v8174_v18  ;;  %8203 = vmatpush3.bf16.msra.mxu0 %v8202_v19  ;;  %v8953_v11 = vpop.permute.xlu1 %829 }
 0x10c   :  { %8177 = vmatprep.subr.bf16.mxu1 %v8176_v21  ;;  %8204 = vmatprep.subr.bf16.mxu0 %v8643_v39 }
 0x10f   :  { %8179 = vmatpush1.bf16.msra.mxu1 %v8178_v27  ;;  %8206 = vmatpush3.bf16.msra.mxu0 %v8205_v28  ;;  %v8963_v13 = vpop.permute.xlu1 %1064 }
 0x110   :  { %8181 = vmatprep.subr.bf16.mxu1 %v8180_v30  ;;  %8207 = vmatprep.subr.bf16.mxu0 %v8643_v39 }
 0x113   :  { %8183 = vmatpush1.bf16.msra.mxu1 %v8182_v36  ;;  %8209 = vmatpush3.bf16.msra.mxu0 %v8208_v37  ;;  %v8973_v15 = vpop.permute.xlu1 %1066 }
 0x114   :  { %8185 = vmatprep.subr.bf16.mxu1 %v8184_v46  ;;  %8210 = vmatprep.subr.bf16.mxu0 %v8643_v39 }
 0x117   :  { %8187 = vmatpush1.bf16.msra.mxu1 %v8186_v52  ;;  %8212 = vmatpush3.bf16.msra.mxu0 %v8211_v53  ;;  %v8983_v17 = vpop.permute.xlu1 %1070  ;;  %v833_v52 = vsel %vm577_vm3, %v8933_v7, %v8943_v9  ;;  %v551_v53 = vld [vmem:[%s9965_s6] sm:$0xff] }
 0x118   :  { %8189 = vmatprep.subr.bf16.mxu1 %v8188_v55  ;;  %8213 = vmatprep.subr.bf16.mxu0 %v8643_v39 }
 0x11b   :  { %8191 = vmatpush1.bf16.msra.mxu1 %v8190_v60  ;;  %8215 = vmatpush3.bf16.msra.mxu0 %v8214_v61  ;;  %v8991_v19 = vpop.permute.xlu1 %1565 }
 0x11e   :  { %474 = vmatmul.mubr.f32.vlgmr.msra.gmra.mrb[2].mxu1 %v8842_v59  ;;  %8094 = vmatmul.mubr.f32.vlgmr.msra.gmra.mrb[4].mxu0 %v8842_v59 }
 0x11f   :  { %664 = vmatprep.mubr.f32.mxu1 %v8641_v0  ;;  %735 = vmatprep.mubr.f32.mxu0 %v8641_v0  ;;  %v9003_v21 = vpop.permute.xlu1 %1567 }
 0x123   :  { %v9009_v23 = vpop.permute.xlu1 %1571 }
 0x1d1   :  { %v333_v62 = vpop.f32.mrb[0].mxu1  ;;  %v8860_v63 = vpop.f32.mrb[2].mxu0 }
 0x1d2   :  { %565 = vrot.lane.b32.xlu1 %v333_v62, %s8644_s21  ;;  %v8863_v1 = vpop.f32.mrb[1].mxu1  ;;  %569 = vrot.lane.b32.xlu0 %v8860_v63, %s8644_s21  ;;  %v8867_v39 = vpop.f32.mrb[3].mxu0 }
 0x1d6   :  { %1312 = vrot.lane.b32.xlu1 %v8860_v63, %s8645_s30  ;;  %1308 = vrot.lane.b32.xlu0 %v333_v62, %s8645_s30 }
 0x1da   :  { %567 = vrot.lane.b32.xlu0 %v8863_v1, %s8644_s21  ;;  %571 = vrot.lane.b32.xlu1 %v8867_v39, %s8644_s21 }
 0x1de   :  { %1310 = vrot.lane.b32.xlu0 %v8863_v1, %s8645_s30  ;;  %1314 = vrot.lane.b32.xlu1 %v8867_v39, %s8645_s30 }
 0x1e2   :  { %1811 = vrot.lane.b32.xlu0 %v8863_v1, %s8646_s16 }
 0x1f1   :  { %v8882_v59 = vpop.f32.mrb[2].mxu1  ;;  %v8884_v2 = vpop.f32.mrb[4].mxu0 }
 0x1f2   :  { %v8886_v3 = vpop.f32.mrb[3].mxu1  ;;  %573 = vrot.lane.b32.xlu0 %v8882_v59, %s8644_s21  ;;  %v8095_v4 = vpop.f32.mrb[5].mxu0 }
 0x1f3   :  { %575 = vrot.lane.b32.xlu1 %v8886_v3, %s8644_s21  ;;  %v1075_v4 = vsel %vm1072_vm5, %v8963_v13, %v8973_v15 }
 0x1f6   :  { %1316 = vrot.lane.b32.xlu0 %v8882_v59, %s8645_s30 }
 0x1f7   :  { %1813 = vrot.lane.b32.xlu1 %v8860_v63, %s8646_s16 }
 0x1fa   :  { %1809 = vrot.lane.b32.xlu0 %v333_v62, %s8646_s16 }
 0x1fb   :  { %1815 = vrot.lane.b32.xlu1 %v8867_v39, %s8646_s16 }
 0x1fe   :  { %1817 = vrot.lane.b32.xlu0 %v8882_v59, %s8646_s16 }
 0x1ff   :  { %2080 = vrot.lane.b32.xlu1 %v8779_v40, %s8647_s5 }
 0x202   :  { %2078 = vrot.lane.b32.xlu0 %v8784_v41, %s8647_s5 }
 0x203   :  { %2082 = vrot.lane.b32.xlu1 %v8793_v42, %s8647_s5 }
 0x206   :  { %2076 = vrot.lane.b32.xlu0 %v8798_v43, %s8647_s5  ;;  %v8929_v43 = vpop.permute.xlu0 %819 }
 0x207   :  { %2086 = vrot.lane.b32.xlu1 %v8807_v44, %s8647_s5  ;;  %v831_v51 = vsel %vm577_vm3, %v8929_v43, %v8922_v6  ;;  %v7884_v43 = vld [vmem:[%s9965_s6 + $0x8] sm:$0xff] }
 0x20a   :  { %2084 = vrot.lane.b32.xlu0 %v8812_v45, %s8647_s5  ;;  %v8939_v8 = vpop.permute.xlu0 %827 }
 0x20b   :  { %1318 = vrot.lane.b32.xlu1 %v8886_v3, %s8645_s30  ;;  %v834_v49 = vsel %vm577_vm3, %v8943_v9, %v8939_v8  ;;  %v835_v57 = vsel %vm577_vm3, %v8939_v8, %v8953_v11 }
 0x20e   :  { %2088 = vrot.lane.b32.xlu0 %v8918_v5, %s8647_s5  ;;  %v8949_v10 = vpop.permute.xlu0 %1062 }
 0x20f   :  { %2330 = vrot.lane.b32.xlu1 %v8863_v1, %s8647_s5  ;;  %v1074_v58 = vsel %vm1072_vm5, %v8949_v10, %v8963_v13 }
 0x212   :  { %2332 = vrot.lane.b32.xlu0 %v8860_v63, %s8647_s5  ;;  %v8959_v12 = vpop.permute.xlu0 %1060 }
 0x213   :  { %2328 = vrot.lane.b32.xlu1 %v333_v62, %s8647_s5  ;;  %v1073_v62 = vsel %vm1072_vm5, %v8959_v12, %v8949_v10 }
 0x216   :  { %2334 = vrot.lane.b32.xlu0 %v8867_v39, %s8647_s5  ;;  %v8969_v14 = vpop.permute.xlu0 %1068 }
 0x217   :  { %2336 = vrot.lane.b32.xlu1 %v8882_v59, %s8647_s5  ;;  %v1076_v54 = vsel %vm1072_vm5, %v8973_v15, %v8969_v14  ;;  %v1077_v9 = vsel %vm1072_vm5, %v8969_v14, %v8983_v17 }
 0x21a   :  { %3046 = vrot.lane.b32.xlu0 %v8779_v40, %s8648_s1  ;;  %v8979_v16 = vpop.permute.xlu0 %1563 }
 0x21b   :  { %1819 = vrot.lane.b32.xlu1 %v8886_v3, %s8646_s16 }
 0x21e   :  { %3044 = vrot.lane.b32.xlu0 %v8784_v41, %s8648_s1  ;;  %v8989_v18 = vpop.permute.xlu0 %1561 }
 0x21f   :  { %2340 = vrot.lane.b32.xlu1 %v8884_v2, %s8647_s5 }
 0x222   :  { %3052 = vrot.lane.b32.xlu0 %v8807_v44, %s8648_s1  ;;  %v8999_v20 = vpop.permute.xlu0 %1569 }
 0x223   :  { %3048 = vrot.lane.b32.xlu1 %v8793_v42, %s8648_s1  ;;  %v1577_v15 = vsel %vm1573_vm6, %v9003_v21, %v8999_v20 }
 0x226   :  { %3294 = vrot.lane.b32.xlu0 %v8860_v63, %s8648_s1 }
 0x227   :  { %3050 = vrot.lane.b32.xlu1 %v8812_v45, %s8648_s1 }
 0x22a   :  { %2338 = vrot.lane.b32.xlu0 %v8886_v3, %s8647_s5 }
 0x22b   :  { %3054 = vrot.lane.b32.xlu1 %v8918_v5, %s8648_s1 }
 0x22e   :  { %3292 = vrot.lane.b32.xlu0 %v8863_v1, %s8648_s1 }
 0x22f   :  { %3296 = vrot.lane.b32.xlu1 %v8867_v39, %s8648_s1 }
 0x232   :  { %3547 = vrot.lane.b32.xlu0 %v8779_v40, %s8649_s2 }
 0x233   :  { %3298 = vrot.lane.b32.xlu1 %v8882_v59, %s8648_s1 }
 0x236   :  { %3545 = vrot.lane.b32.xlu0 %v8784_v41, %s8649_s2 }
 0x237   :  { %3302 = vrot.lane.b32.xlu1 %v8884_v2, %s8648_s1 }
 0x23a   :  { %3553 = vrot.lane.b32.xlu0 %v8807_v44, %s8649_s2 }
 0x23b   :  { %3549 = vrot.lane.b32.xlu1 %v8793_v42, %s8649_s2 }
 0x23e   :  { %3795 = vrot.lane.b32.xlu0 %v8860_v63, %s8649_s2 }
 0x23f   :  { %3551 = vrot.lane.b32.xlu1 %v8812_v45, %s8649_s2 }
 0x242   :  { %3793 = vrot.lane.b32.xlu0 %v8863_v1, %s8649_s2 }
 0x243   :  { %3555 = vrot.lane.b32.xlu1 %v8918_v5, %s8649_s2 }
 0x244   :  { %v570_v22 = vpop.permute.xlu0 %569  ;;  %v566_v25 = vpop.permute.xlu1 %565 }
 0x246   :  { %4048 = vrot.lane.b32.xlu0 %v8779_v40, %s8650_s18 }
 0x247   :  { %3797 = vrot.lane.b32.xlu1 %v8867_v39, %s8649_s2 }
 0x248   :  { %v9015_v24 = vpop.permute.xlu0 %1308  ;;  %v9038_v30 = vpop.permute.xlu1 %1312 }
 0x24a   :  { %3300 = vrot.lane.b32.xlu0 %v8886_v3, %s8648_s1 }
 0x24b   :  { %3799 = vrot.lane.b32.xlu1 %v8882_v59, %s8649_s2 }
 0x24c   :  { %v568_v26 = vpop.permute.xlu0 %567  ;;  %v572_v32 = vpop.permute.xlu1 %571 }
 0x24d   :  { %v578_v27 = vsel %vm577_vm3, %v566_v25, %v568_v26  ;;  %v579_v28 = vsel %vm577_vm3, %v568_v26, %v570_v22  ;;  %v580_v38 = vsel %vm577_vm3, %v570_v22, %v572_v32 }
 0x24e   :  { %4046 = vrot.lane.b32.xlu0 %v8784_v41, %s8650_s18  ;;  %7872 = vmatprep.subr.msk.mxu1 %vm587_vm2, %v579_v28  ;;  %v8652_v28 = vmov 0  }
 0x24f   :  { %3803 = vrot.lane.b32.xlu1 %v8884_v2, %s8649_s2  ;;  %7873 = vmatpush1.msk.msra.mxu1 %vm587_vm2, %v578_v27  ;;  %v1575_v27 = vsel %vm1573_vm6, %v8979_v16, %v8991_v19 }
 0x250   :  { %7874 = vmatmul.mubr.msk.f32.vlgmr.msra.gmra.mrb[4].mxu1 %vm583_vm4, %v558_v29  ;;  %v9044_v31 = vpop.permute.xlu0 %1310  ;;  %v9056_v34 = vpop.permute.xlu1 %1314  ;;  %8550 = vset.pattern.permute.xlu0 %v8652_v28 }
 0x251   :  { %806 = vmatprep.mubr.f32.mxu1 %v8641_v0  ;;  %v1321_v10 = vsel %vm1072_vm5, %v9044_v31, %v9038_v30  ;;  %v1320_v13 = vsel %vm1072_vm5, %v9015_v24, %v9044_v31  ;;  %v1322_v14 = vsel %vm1072_vm5, %v9038_v30, %v9056_v34  ;;  %v1574_v30 = vsel %vm1573_vm6, %v8989_v18, %v8979_v16  ;;  %v5046_v16 = vld [vmem:[%s9967_s8] sm:$0xff] }
 0x252   :  { %4054 = vrot.lane.b32.xlu0 %v8807_v44, %s8650_s18  ;;  %v1576_v31 = vsel %vm1573_vm6, %v8991_v19, %v9003_v21  ;;  %v1578_v21 = vsel %vm1573_vm6, %v8999_v20, %v9009_v23  ;;  %8551 = vset.pattern.permute.xlu1 %v8652_v28 }
 0x253   :  { %4050 = vrot.lane.b32.xlu1 %v8793_v42, %s8650_s18 }
 0x254   :  { %v9054_v33 = vpop.permute.xlu0 %1811 }
 0x256   :  { %4296 = vrot.lane.b32.xlu0 %v8860_v63, %s8650_s18 }
 0x257   :  { %4052 = vrot.lane.b32.xlu1 %v8812_v45, %s8650_s18 }
 0x25a   :  { %3801 = vrot.lane.b32.xlu0 %v8886_v3, %s8649_s2 }
 0x25b   :  { %4056 = vrot.lane.b32.xlu1 %v8918_v5, %s8650_s18 }
 0x25e   :  { %4294 = vrot.lane.b32.xlu0 %v8863_v1, %s8650_s18 }
 0x25f   :  { %4298 = vrot.lane.b32.xlu1 %v8867_v39, %s8650_s18 }
 0x262   :  { %4549 = vrot.lane.b32.xlu0 %v8779_v40, %s8651_s23 }
 0x263   :  { %4300 = vrot.lane.b32.xlu1 %v8882_v59, %s8650_s18 }
 0x264   :  { %v574_v35 = vpop.permute.xlu0 %573 }
 0x265   :  { %v576_v36 = vpop.permute.xlu1 %575  ;;  %v581_v37 = vsel %vm577_vm3, %v572_v32, %v574_v35 }
 0x266   :  { %v582_v46 = vsel %vm577_vm3, %v574_v35, %v576_v36  ;;  %4547 = vrot.lane.b32.xlu0 %v8784_v41, %s8651_s23  ;;  %7875 = vmatprep.subr.msk.mxu0 %vm587_vm2, %v581_v37 }
 0x267   :  { %7878 = vmatprep.subr.msk.mxu1 %vm587_vm2, %v576_v36  ;;  %7876 = vmatpush1.msk.msra.mxu0 %vm587_vm2, %v580_v38  ;;  %v9234_v36 = vld [vmem:[#allocation2] sm:$0xff] }
 0x268   :  { %7879 = vmatpush1.msk.msra.mxu1 %vm587_vm2, %v582_v46  ;;  %4304 = vrot.lane.b32.xlu1 %v8884_v2, %s8650_s18  ;;  %v9073_v47 = vpop.permute.xlu0 %1316  ;;  %v7902_v46 = vld [vmem:[%s9966_s7 + $0x10] sm:$0xff]  ;;  %5164 = vst.msk [vmem:[#allocation2 + $0x30] sm:$0xff] %vm5163_vm12, %v9234_v36 }
 0x269   :  { %7877 = vmatmul.mubr.msk.f32.vlgmr.msra.gmra.mrb[6].mxu0 %vm583_vm4, %v558_v29  ;;  %7880 = vmatmul.mubr.msk.f32.vlgmr.msra.gmra.mrb[6].mxu1 %vm583_vm4, %v558_v29  ;;  %v9083_v50 = vpop.permute.xlu1 %1813  ;;  %v1323_v6 = vsel %vm1072_vm5, %v9056_v34, %v9073_v47  ;;  %v7898_v34 = vld [vmem:[%s9965_s6 + $0x10] sm:$0xff] }
 0x26a   :  { %845 = vmatprep.subr.mxu1 %v832_v48  ;;  %916 = vmatprep.subr.mxu0 %v834_v49  ;;  %v1822_v35 = vsel %vm1573_vm6, %v9054_v33, %v9083_v50 }
 0x26b   :  { %846 = vmatpush1.msra.mxu1 %v831_v51  ;;  %917 = vmatpush1.msra.mxu0 %v833_v52 }
 0x26c   :  { %4302 = vrot.lane.b32.xlu0 %v8886_v3, %s8650_s18  ;;  %987 = vmatprep.subr.mxu1 %v8953_v11  ;;  %v9100_v55 = vpop.permute.xlu0 %1809 }
 0x26d   :  { %1158 = vmatprep.subr.mxu0 %v1076_v54  ;;  %909 = vmatprep.mubr.f32.mxu1 %v8641_v0  ;;  %v9103_v56 = vpop.permute.xlu1 %1815 }
 0x26e   :  { %4551 = vrot.lane.b32.xlu1 %v8793_v42, %s8651_s23  ;;  %7881 = vmatmul.mubr.msk.f32.vlgmr.msra.gmra.mrb[4].mxu1 %vm81_vm1, %v551_v53 }
 0x26f   :  { %988 = vmatpush1.msra.mxu1 %v835_v57  ;;  %980 = vmatprep.mubr.f32.mxu0 %v8641_v0 }
 0x270   :  { %1087 = vmatprep.subr.mxu1 %v1074_v58  ;;  %4555 = vrot.lane.b32.xlu0 %v8807_v44, %s8651_s23  ;;  %v9117_v60 = vpop.permute.xlu0 %1817 }
 0x271   :  { %1051 = vmatprep.mubr.f32.mxu1 %v8641_v0  ;;  %7882 = vmatmul.mubr.msk.f32.vlgmr.msra.gmra.mrb[6].mxu0 %vm81_vm1, %v551_v53  ;;  %v9121_v61 = vpop.permute.xlu1 %2080  ;;  %v1824_v32 = vsel %vm1573_vm6, %v9103_v56, %v9117_v60 }
 0x272   :  { %4553 = vrot.lane.b32.xlu1 %v8812_v45, %s8651_s23  ;;  %7883 = vmatmul.mubr.msk.f32.vlgmr.msra.gmra.mrb[6].mxu1 %vm81_vm1, %v551_v53 }
 0x273   :  { %1088 = vmatpush1.msra.mxu1 %v1073_v62  ;;  %1159 = vmatpush1.msra.mxu0 %v1075_v4 }
 0x274   :  { %1229 = vmatprep.subr.mxu1 %v8983_v17  ;;  %7892 = vmatprep.subr.msk.mxu0 %vm587_vm2, %v1323_v6  ;;  %v9140_v7 = vpop.permute.xlu0 %2078  ;;  %v7888_v17 = vld [vmem:[%s9966_s7 + $0x8] sm:$0xff] }
 0x275   :  { %4797 = vrot.lane.b32.xlu0 %v8860_v63, %s8651_s23  ;;  %1151 = vmatprep.mubr.f32.mxu1 %v8641_v0  ;;  %v9145_v8 = vpop.permute.xlu1 %2082  ;;  %v2092_v49 = vsel %vm2090_vm7, %v9140_v7, %v9121_v61 }
 0x276   :  { %4557 = vrot.lane.b32.xlu1 %v8918_v5, %s8651_s23  ;;  %7885 = vmatmul.mubr.msk.f32.vlgmr.msra.gmra.mrb[4].mxu1 %vm81_vm1, %v7884_v43  ;;  %v2093_v51 = vsel %vm2090_vm7, %v9121_v61, %v9145_v8 }
 0x277   :  { %1230 = vmatpush1.msra.mxu1 %v1077_v9  ;;  %1222 = vmatprep.mubr.f32.mxu0 %v8641_v0 }
 0x278   :  { %7889 = vmatprep.subr.msk.mxu1 %vm587_vm2, %v1321_v10  ;;  %1293 = vmatprep.mubr.f32.mxu1 %v8641_v0  ;;  %v9159_v11 = vpop.permute.xlu0 %2076 }
 0x279   :  { %4795 = vrot.lane.b32.xlu0 %v8863_v1, %s8651_s23  ;;  %7886 = vmatmul.mubr.msk.f32.vlgmr.msra.gmra.mrb[6].mxu0 %vm81_vm1, %v7884_v43  ;;  %v9164_v12 = vpop.permute.xlu1 %2086  ;;  %v2091_v53 = vsel %vm2090_vm7, %v9159_v11, %v9140_v7  ;;  %v7916_v7 = vld [vmem:[%s9966_s7 + $0x18] sm:$0xff] }
 0x27a   :  { %4799 = vrot.lane.b32.xlu1 %v8867_v39, %s8651_s23  ;;  %7887 = vmatmul.mubr.msk.f32.vlgmr.msra.gmra.mrb[6].mxu1 %vm81_vm1, %v7884_v43 }
 0x27b   :  { %7890 = vmatpush1.msk.msra.mxu1 %vm587_vm2, %v1320_v13  ;;  %7893 = vmatpush1.msk.msra.mxu0 %vm587_vm2, %v1322_v14 }
 0x27c   :  { %1659 = vmatprep.subr.mxu0 %v1577_v15  ;;  %1404 = vmatprep.mubr.f32.mxu1 %v8641_v0  ;;  %v9184_v22 = vpop.permute.xlu0 %2084 }
 0x27d   :  { %4803 = vrot.lane.b32.xlu0 %v8886_v3, %s8651_s23  ;;  %v1319_v24 = vpop.permute.xlu1 %1318  ;;  %1475 = vmatprep.mubr.f32.mxu0 %v8641_v0  ;;  %v2094_v38 = vsel %vm2090_vm7, %v9145_v8, %v9184_v22 }
 0x27e   :  { %4801 = vrot.lane.b32.xlu1 %v8882_v59, %s8651_s23  ;;  %7891 = vmatmul.mubr.msk.f32.vlgmr.msra.gmra.mrb[4].mxu1 %vm583_vm4, %v7888_v17  ;;  %v1324_v25 = vsel %vm1072_vm5, %v9073_v47, %v1319_v24 }
 0x27f   :  { %7895 = vmatprep.subr.msk.mxu1 %vm587_vm2, %v1319_v24  ;;  %1546 = vmatprep.mubr.f32.mxu1 %v8641_v0 }
 0x280   :  { %7896 = vmatpush1.msk.msra.mxu1 %vm587_vm2, %v1324_v25  ;;  %v9197_v26 = vpop.permute.xlu0 %2088 }
 0x281   :  { %7894 = vmatmul.mubr.msk.f32.vlgmr.msra.gmra.mrb[6].mxu0 %vm583_vm4, %v7888_v17  ;;  %1588 = vmatprep.subr.mxu1 %v1575_v27  ;;  %v9203_v29 = vpop.permute.xlu1 %2330 }
 0x282   :  { %4805 = vrot.lane.b32.xlu1 %v8884_v2, %s8651_s23  ;;  %7897 = vmatmul.mubr.msk.f32.vlgmr.msra.gmra.mrb[6].mxu1 %vm583_vm4, %v7888_v17 }
 0x283   :  { %1660 = vmatpush1.msra.mxu0 %v1576_v31  ;;  %1589 = vmatpush1.msra.mxu1 %v1574_v30  ;;  %v7944_v30 = vld [vmem:[%s9966_s7 + $0x28] sm:$0xff] }
 0x284   :  { %7906 = vmatprep.subr.msk.mxu0 %vm587_vm2, %v1824_v32  ;;  %1730 = vmatprep.subr.mxu1 %v9009_v23  ;;  %v2333_v18 = vpop.permute.xlu0 %2332  ;;  %v1821_v23 = vsel %vm1573_vm6, %v9100_v55, %v9054_v33  ;;  %v2096_v55 = vsel %vm2090_vm7, %v9164_v12, %v9197_v26 }
 0x285   :  { %1652 = vmatprep.mubr.f32.mxu1 %v8641_v0  ;;  %v2329_v19 = vpop.permute.xlu1 %2328  ;;  %1723 = vmatprep.mubr.f32.mxu0 %v8641_v0  ;;  %v1823_v0 = vsel %vm1573_vm6, %v9083_v50, %v9103_v56  ;;  %v7912_v56 = vld [vmem:[%s9965_s6 + $0x18] sm:$0xff]  ;;  %v2343_v61 = vsel %vm2090_vm7, %v9203_v29, %v2333_v18 }
 0x286   :  { %7899 = vmatmul.mubr.msk.f32.vlgmr.msra.gmra.mrb[4].mxu1 %vm81_vm1, %v7898_v34  ;;  %5049 = vperm.xlu0 %8550, %v5046_v16   ;;  %v2342_v43 = vsel %vm2090_vm7, %v2329_v19, %v9203_v29 }
 0x287   :  { %1731 = vmatpush1.msra.mxu1 %v1578_v21  ;;  %1794 = vmatprep.mubr.f32.mxu1 %v9234_v36 }
 0x288   :  { %7903 = vmatprep.subr.msk.mxu1 %vm587_vm2, %v1822_v35  ;;  %v2335_v37 = vpop.permute.xlu0 %2334 }
 0x289   :  { %7900 = vmatmul.mubr.msk.f32.vlgmr.msra.gmra.mrb[6].mxu0 %vm81_vm1, %v7898_v34  ;;  %v2337_v20 = vpop.permute.xlu1 %2336  ;;  %v2344_v4 = vsel %vm2090_vm7, %v2333_v18, %v2335_v37 }
 0x28a   :  { %7901 = vmatmul.mubr.msk.f32.vlgmr.msra.gmra.mrb[6].mxu1 %vm81_vm1, %v7898_v34  ;;  %7907 = vmatpush1.msk.msra.mxu0 %vm587_vm2, %v1823_v0  ;;  %v2345_v54 = vsel %vm2090_vm7, %v2335_v37, %v2337_v20 }
 0x28b   :  { %7904 = vmatpush1.msk.msra.mxu1 %vm587_vm2, %v1821_v23  ;;  %2177 = vmatprep.subr.mxu0 %v2094_v38  ;;  %v7954_v23 = vld [vmem:[%s9965_s6 + $0x30] sm:$0xff] }
 0x28c   :  { %1905 = vmatprep.mubr.f32.mxu1 %v9234_v36  ;;  %v9255_v47 = vpop.permute.xlu0 %3046  ;;  %1976 = vmatprep.mubr.f32.mxu0 %v9234_v36 }
 0x28d   :  { %v1820_v33 = vpop.permute.xlu1 %1819 }
 0x28e   :  { %7905 = vmatmul.mubr.msk.f32.vlgmr.msra.gmra.mrb[4].mxu1 %vm583_vm4, %v7902_v46  ;;  %v1825_v48 = vsel %vm1573_vm6, %v9117_v60, %v1820_v33  ;;  %7909 = vmatprep.subr.msk.mxu1 %vm587_vm2, %v1820_v33  ;;  %v2095_v60 = vsel %vm2090_vm7, %v9184_v22, %v9164_v12 }
 0x28f   :  { %7910 = vmatpush1.msk.msra.mxu1 %vm587_vm2, %v1825_v48  ;;  %2047 = vmatprep.mubr.f32.mxu1 %v9234_v36 }
 0x290   :  { %v9267_v50 = vpop.permute.xlu0 %3044  ;;  %2106 = vmatprep.subr.mxu1 %v2092_v49 }
 0x291   :  { %7908 = vmatmul.mubr.msk.f32.vlgmr.msra.gmra.mrb[6].mxu0 %vm583_vm4, %v7902_v46  ;;  %v2341_v52 = vpop.permute.xlu1 %2340  ;;  %v3057_v17 = vsel %vm3056_vm8, %v9267_v50, %v9255_v47 }
 0x292   :  { %7911 = vmatmul.mubr.msk.f32.vlgmr.msra.gmra.mrb[6].mxu1 %vm583_vm4, %v7902_v46  ;;  %2178 = vmatpush1.msra.mxu0 %v2093_v51  ;;  %v7958_v51 = vld [vmem:[%s9966_s7 + $0x30] sm:$0xff] }
 0x293   :  { %2107 = vmatpush1.msra.mxu1 %v2091_v53  ;;  %7920 = vmatprep.subr.msk.mxu0 %vm587_vm2, %v2345_v54 }
 0x294   :  { %2248 = vmatprep.subr.mxu1 %v2096_v55  ;;  %2170 = vmatprep.mubr.f32.mxu1 %v9234_v36  ;;  %v9286_v57 = vpop.permute.xlu0 %3052 }
 0x295   :  { %v9288_v58 = vpop.permute.xlu1 %3048  ;;  %2241 = vmatprep.mubr.f32.mxu0 %v9234_v36 }
 0x296   :  { %7913 = vmatmul.mubr.msk.f32.vlgmr.msra.gmra.mrb[4].mxu1 %vm81_vm1, %v7912_v56 }
 0x297   :  { %2249 = vmatpush1.msra.mxu1 %v2095_v60  ;;  %2312 = vmatprep.mubr.f32.mxu1 %v9234_v36 }
 0x298   :  { %7917 = vmatprep.subr.msk.mxu1 %vm587_vm2, %v2343_v61  ;;  %v9299_v62 = vpop.permute.xlu0 %3294 }
 0x299   :  { %7914 = vmatmul.mubr.msk.f32.vlgmr.msra.gmra.mrb[6].mxu0 %vm81_vm1, %v7912_v56  ;;  %v3051_v6 = vpop.permute.xlu1 %3050 }
 0x29a   :  { %7915 = vmatmul.mubr.msk.f32.vlgmr.msra.gmra.mrb[6].mxu1 %vm81_vm1, %v7912_v56  ;;  %7921 = vmatpush1.msk.msra.mxu0 %vm587_vm2, %v2344_v4 }
 0x29b   :  { %7918 = vmatpush1.msk.msra.mxu1 %vm587_vm2, %v2342_v43  ;;  %2427 = vmatprep.mubr.f32.mxu1 %v9234_v36 }
 0x29c   :  { %v2339_v8 = vpop.permute.xlu0 %2338  ;;  %2498 = vmatprep.mubr.f32.mxu0 %v9234_v36  ;;  %2658 = vmatprep.subr.mxu0 %v8812_v45  ;;  %v7926_v45 = vld [vmem:[%s9965_s6 + $0x20] sm:$0xff] }
 0x29d   :  { %v2346_v9 = vsel %vm2090_vm7, %v2337_v20, %v2339_v8  ;;  %v3055_v10 = vpop.permute.xlu1 %3054  ;;  %v2347_v11 = vsel %vm2090_vm7, %v2339_v8, %v2341_v52 }
 0x29e   :  { %7919 = vmatmul.mubr.msk.f32.vlgmr.msra.gmra.mrb[4].mxu1 %vm583_vm4, %v7916_v7  ;;  %7923 = vmatprep.subr.msk.mxu1 %vm587_vm2, %v2347_v11  ;;  %v3061_v25 = vsel %vm3056_vm8, %v9286_v57, %v3055_v10 }
 0x29f   :  { %7924 = vmatpush1.msk.msra.mxu1 %vm587_vm2, %v2346_v9  ;;  %2569 = vmatprep.mubr.f32.mxu1 %v9234_v36 }
 0x2a0   :  { %v3293_v12 = vpop.permute.xlu0 %3292  ;;  %2587 = vmatprep.subr.mxu1 %v8779_v40 }
 0x2a1   :  { %7922 = vmatmul.mubr.msk.f32.vlgmr.msra.gmra.mrb[6].mxu0 %vm583_vm4, %v7916_v7  ;;  %v9322_v13 = vpop.permute.xlu1 %3296  ;;  %v3304_v29 = vsel %vm3056_vm8, %v3293_v12, %v9299_v62 }
 0x2a2   :  { %7925 = vmatmul.mubr.msk.f32.vlgmr.msra.gmra.mrb[6].mxu1 %vm583_vm4, %v7916_v7  ;;  %2659 = vmatpush1.msra.mxu0 %v8793_v42  ;;  %v3305_v26 = vsel %vm3056_vm8, %v9299_v62, %v9322_v13 }
 0x2a3   :  { %7934 = vmatprep.subr.msk.mxu0 %vm587_vm2, %v8882_v59  ;;  %2588 = vmatpush1.msra.mxu1 %v8784_v41  ;;  %v3060_v59 = vsel %vm3056_vm8, %v3051_v6, %v9286_v57 }
 0x2a4   :  { %2651 = vmatprep.mubr.f32.mxu1 %v9234_v36  ;;  %2729 = vmatprep.subr.mxu1 %v8918_v5  ;;  %v9334_v40 = vpop.permute.xlu0 %3547 }
 0x2a5   :  { %v3299_v14 = vpop.permute.xlu1 %3298  ;;  %2722 = vmatprep.mubr.f32.mxu0 %v9234_v36 }
 0x2a6   :  { %7927 = vmatmul.mubr.msk.f32.vlgmr.msra.gmra.mrb[4].mxu1 %vm81_vm1, %v7926_v45  ;;  %v3306_v18 = vsel %vm3056_vm8, %v9322_v13, %v3299_v14  ;;  %v7972_v13 = vld [vmem:[%s9966_s7 + $0x38] sm:$0xff] }
 0x2a7   :  { %2730 = vmatpush1.msra.mxu1 %v8807_v44  ;;  %2793 = vmatprep.mubr.f32.mxu1 %v9234_v36  ;;  %v7930_v44 = vld [vmem:[%s9966_s7 + $0x20] sm:$0xff] }
 0x2a8   :  { %7931 = vmatprep.subr.msk.mxu1 %vm587_vm2, %v8860_v63  ;;  %v9342_v41 = vpop.permute.xlu0 %3545 }
 0x2a9   :  { %7928 = vmatmul.mubr.msk.f32.vlgmr.msra.gmra.mrb[6].mxu0 %vm81_vm1, %v7926_v45  ;;  %v3303_v42 = vpop.permute.xlu1 %3302  ;;  %v3558_v20 = vsel %vm3557_vm9, %v9342_v41, %v9334_v40 }
 0x2aa   :  { %7929 = vmatmul.mubr.msk.f32.vlgmr.msra.gmra.mrb[6].mxu1 %vm81_vm1, %v7926_v45  ;;  %7935 = vmatpush1.msk.msra.mxu0 %vm587_vm2, %v8867_v39 }
 0x2ab   :  { %7932 = vmatpush1.msk.msra.mxu1 %vm587_vm2, %v8863_v1  ;;  %3142 = vmatprep.subr.mxu0 %v3060_v59  ;;  %v3058_v1 = vsel %vm3056_vm8, %v9255_v47, %v9288_v58 }
 0x2ac   :  { %7937 = vmatprep.subr.msk.mxu1 %vm587_vm2, %v8884_v2  ;;  %2887 = vmatprep.mubr.f32.mxu1 %v9234_v36  ;;  %v9358_v63 = vpop.permute.xlu0 %3553  ;;  %v3059_v2 = vsel %vm3056_vm8, %v9288_v58, %v3051_v6  ;;  %v7968_v6 = vld [vmem:[%s9965_s6 + $0x38] sm:$0xff] }
 0x2ad   :  { %v3550_v5 = vpop.permute.xlu1 %3549  ;;  %2958 = vmatprep.mubr.f32.mxu0 %v9234_v36 }
 0x2ae   :  { %7933 = vmatmul.mubr.msk.f32.vlgmr.msra.gmra.mrb[4].mxu1 %vm583_vm4, %v7930_v44  ;;  %v3559_v19 = vsel %vm3557_vm9, %v9334_v40, %v3550_v5 }
 0x2af   :  { %7938 = vmatpush1.msk.msra.mxu1 %vm587_vm2, %v8886_v3  ;;  %3029 = vmatprep.mubr.f32.mxu1 %v9234_v36  ;;  %v7940_v3 = vld [vmem:[%s9965_s6 + $0x28] sm:$0xff] }
 0x2b0   :  { %3071 = vmatprep.subr.mxu1 %v3058_v1  ;;  %v9368_v39 = vpop.permute.xlu0 %3795 }
 0x2b1   :  { %7936 = vmatmul.mubr.msk.f32.vlgmr.msra.gmra.mrb[6].mxu0 %vm583_vm4, %v7930_v44  ;;  %v3552_v15 = vpop.permute.xlu1 %3551 }
 0x2b2   :  { %7939 = vmatmul.mubr.msk.f32.vlgmr.msra.gmra.mrb[6].mxu1 %vm583_vm4, %v7930_v44  ;;  %3143 = vmatpush1.msra.mxu0 %v3059_v2  ;;  %v3561_v35 = vsel %vm3557_vm9, %v3552_v15, %v9358_v63  ;;  %v3560_v37 = vsel %vm3557_vm9, %v3550_v5, %v3552_v15  ;;  %v7982_v5 = vld [vmem:[%s9965_s6 + $0x40] sm:$0xff] }
 0x2b3   :  { %3072 = vmatpush1.msra.mxu1 %v3057_v17  ;;  %3135 = vmatprep.mubr.f32.mxu1 %v9234_v36 }
 0x2b4   :  { %3213 = vmatprep.subr.mxu1 %v3055_v10  ;;  %v3794_v22 = vpop.permute.xlu0 %3793  ;;  %3206 = vmatprep.mubr.f32.mxu0 %v9234_v36 }
 0x2b5   :  { %v3556_v24 = vpop.permute.xlu1 %3555  ;;  %v3805_v50 = vsel %vm3557_vm9, %v3794_v22, %v9368_v39 }
 0x2b6   :  { %7941 = vmatmul.mubr.msk.f32.vlgmr.msra.gmra.mrb[4].mxu1 %vm81_vm1, %v7940_v3  ;;  %v3562_v47 = vsel %vm3557_vm9, %v9358_v63, %v3556_v24 }
 0x2b7   :  { %3214 = vmatpush1.msra.mxu1 %v3061_v25  ;;  %3277 = vmatprep.mubr.f32.mxu1 %v9234_v36 }
 0x2b8   :  { %7945 = vmatprep.subr.msk.mxu1 %vm587_vm2, %v3305_v26  ;;  %v9390_v27 = vpop.permute.xlu0 %4048  ;;  %v7986_v26 = vld [vmem:[%s9966_s7 + $0x40] sm:$0xff] }
 0x2b9   :  { %7942 = vmatmul.mubr.msk.f32.vlgmr.msra.gmra.mrb[6].mxu0 %vm81_vm1, %v7940_v3  ;;  %v3798_v28 = vpop.permute.xlu1 %3797 }
 0x2ba   :  { %7943 = vmatmul.mubr.msk.f32.vlgmr.msra.gmra.mrb[6].mxu1 %vm81_vm1, %v7940_v3  ;;  %3459 = vmatprep.mubr.f32.mxu0 %v9234_v36  ;;  %v3806_v33 = vsel %vm3557_vm9, %v9368_v39, %v3798_v28 }
 0x2bb   :  { %7946 = vmatpush1.msk.msra.mxu1 %vm587_vm2, %v3304_v29  ;;  %3388 = vmatprep.mubr.f32.mxu1 %v9234_v36 }
 0x2bc   :  { %7951 = vmatprep.subr.msk.mxu1 %vm587_vm2, %v3303_v42  ;;  %v3301_v31 = vpop.permute.xlu0 %3300 }
 0x2bd   :  { %v3307_v32 = vsel %vm3056_vm8, %v3299_v14, %v3301_v31  ;;  %v3308_v34 = vsel %vm3056_vm8, %v3301_v31, %v3303_v42  ;;  %v3800_v16 = vpop.permute.xlu1 %3799 }
 0x2be   :  { %7947 = vmatmul.mubr.msk.f32.vlgmr.msra.gmra.mrb[4].mxu1 %vm583_vm4, %v7944_v30  ;;  %7948 = vmatprep.subr.msk.mxu0 %vm587_vm2, %v3307_v32  ;;  %v3807_v56 = vsel %vm3557_vm9, %v3798_v28, %v3800_v16 }
 0x2bf   :  { %7952 = vmatpush1.msk.msra.mxu1 %vm587_vm2, %v3308_v34  ;;  %7949 = vmatpush1.msk.msra.mxu0 %vm587_vm2, %v3306_v18 }
 0x2c0   :  { %3530 = vmatprep.mubr.f32.mxu1 %v9234_v36  ;;  %3572 = vmatprep.subr.mxu1 %v3559_v19  ;;  %v4047_v21 = vpop.permute.xlu0 %4046 }
 0x2c1   :  { %3643 = vmatprep.subr.mxu0 %v3561_v35  ;;  %7950 = vmatmul.mubr.msk.f32.vlgmr.msra.gmra.mrb[6].mxu0 %vm583_vm4, %v7944_v30  ;;  %v3804_v0 = vpop.permute.xlu1 %3803  ;;  %v4059_v4 = vsel %vm4058_vm10, %v4047_v21, %v9390_v27  ;;  %v550_v21 = vld [vmem:[%s9963_s4] sm:$0x3f] }
 0x2c2   :  { %7953 = vmatmul.mubr.msk.f32.vlgmr.msra.gmra.mrb[6].mxu1 %vm583_vm4, %v7944_v30  ;;  %3644 = vmatpush1.msra.mxu0 %v3560_v37 }
 0x2c3   :  { %3573 = vmatpush1.msra.mxu1 %v3558_v20  ;;  %3636 = vmatprep.mubr.f32.mxu1 %v9234_v36 }
 0x2c4   :  { %3714 = vmatprep.subr.mxu1 %v3556_v24  ;;  %v4055_v38 = vpop.permute.xlu0 %4054  ;;  %3707 = vmatprep.mubr.f32.mxu0 %v9234_v36 }
 0x2c5   :  { %v4051_v46 = vpop.permute.xlu1 %4050 }
 0x2c6   :  { %7955 = vmatmul.mubr.msk.f32.vlgmr.msra.gmra.mrb[4].mxu1 %vm81_vm1, %v7954_v23  ;;  %v4060_v57 = vsel %vm4058_vm10, %v9390_v27, %v4051_v46 }
 0x2c7   :  { %3715 = vmatpush1.msra.mxu1 %v3562_v47  ;;  %3778 = vmatprep.mubr.f32.mxu1 %v9234_v36 }
 0x2c8   :  { %7959 = vmatprep.subr.msk.mxu1 %vm587_vm2, %v3806_v33  ;;  %v4297_v48 = vpop.permute.xlu0 %4296 }
 0x2c9   :  { %7956 = vmatmul.mubr.msk.f32.vlgmr.msra.gmra.mrb[6].mxu0 %vm81_vm1, %v7954_v23  ;;  %v4053_v49 = vpop.permute.xlu1 %4052 }
 0x2ca   :  { %7957 = vmatmul.mubr.msk.f32.vlgmr.msra.gmra.mrb[6].mxu1 %vm81_vm1, %v7954_v23  ;;  %3960 = vmatprep.mubr.f32.mxu0 %v9234_v36  ;;  %v4062_v60 = vsel %vm4058_vm10, %v4053_v49, %v4055_v38  ;;  %v4061_v61 = vsel %vm4058_vm10, %v4051_v46, %v4053_v49 }
 0x2cb   :  { %7960 = vmatpush1.msk.msra.mxu1 %vm587_vm2, %v3805_v50  ;;  %3889 = vmatprep.mubr.f32.mxu1 %v9234_v36 }
 0x2cc   :  { %7965 = vmatprep.subr.msk.mxu1 %vm587_vm2, %v3804_v0  ;;  %v3802_v52 = vpop.permute.xlu0 %3801 }
 0x2cd   :  { %v3808_v53 = vsel %vm3557_vm9, %v3800_v16, %v3802_v52  ;;  %v3809_v54 = vsel %vm3557_vm9, %v3802_v52, %v3804_v0  ;;  %v4057_v55 = vpop.permute.xlu1 %4056  ;;  %v5059_v16 = vlaneseq }
 0x2ce   :  { %7961 = vmatmul.mubr.msk.f32.vlgmr.msra.gmra.mrb[4].mxu1 %vm583_vm4, %v7958_v51  ;;  %7962 = vmatprep.subr.msk.mxu0 %vm587_vm2, %v3808_v53  ;;  %v4063_v8 = vsel %vm4058_vm10, %v4055_v38, %v4057_v55 }
 0x2cf   :  { %7966 = vmatpush1.msk.msra.mxu1 %vm587_vm2, %v3809_v54  ;;  %7963 = vmatpush1.msk.msra.mxu0 %vm587_vm2, %v3807_v56  ;;  %v5060_v18 = vshrl.u32 %v5059_v16, 7 }
 0x2d0   :  { %4031 = vmatprep.mubr.f32.mxu1 %v9234_v36  ;;  %4073 = vmatprep.subr.mxu1 %v4060_v57  ;;  %v4295_v58 = vpop.permute.xlu0 %4294 }
 0x2d1   :  { %4144 = vmatprep.subr.mxu0 %v4062_v60  ;;  %7964 = vmatmul.mubr.msk.f32.vlgmr.msra.gmra.mrb[6].mxu0 %vm583_vm4, %v7958_v51  ;;  %v4299_v62 = vpop.permute.xlu1 %4298  ;;  %v4306_v11 = vsel %vm4058_vm10, %v4295_v58, %v4297_v48  ;;  %v5061_v19 = vsub.s32 0, %v5060_v18  ;;  %v5065_v35 = vsub.s32 1, %v5060_v18  ;;  %v5069_v20 = vsub.s32 2, %v5060_v18 }
 0x2d2   :  { %7967 = vmatmul.mubr.msk.f32.vlgmr.msra.gmra.mrb[6].mxu1 %vm583_vm4, %v7958_v51  ;;  %4145 = vmatpush1.msra.mxu0 %v4061_v61  ;;  %v4307_v9 = vsel %vm4058_vm10, %v4297_v48, %v4299_v62  ;;  %v5073_v46 = vsub.s32 3, %v5060_v18  ;;  %v5077_v49 = vsub.s32 4, %v5060_v18  ;;  %v5081_v52 = vsub.s32 5, %v5060_v18 }
 0x2d3   :  { %4074 = vmatpush1.msra.mxu1 %v4059_v4  ;;  %4137 = vmatprep.mubr.f32.mxu1 %v9234_v36  ;;  %v9529_v0 = vrot.slane %v550_v21, %v5061_v19  ;;  %v9531_v38 = vrot.slane %v550_v21, %v5065_v35  ;;  %v9537_v51 = vrot.slane %v550_v21, %v5069_v20 }
 0x2d4   :  { %4215 = vmatprep.subr.mxu1 %v4057_v55  ;;  %v4550_v43 = vpop.permute.xlu0 %4549  ;;  %4208 = vmatprep.mubr.f32.mxu0 %v9234_v36  ;;  %v9540_v55 = vrot.slane %v550_v21, %v5073_v46  ;;  %v9543_v4 = vrot.slane %v550_v21, %v5077_v49 }
 0x2d5   :  { %v4301_v7 = vpop.permute.xlu1 %4300 }
 0x2d6   :  { %7969 = vmatmul.mubr.msk.f32.vlgmr.msra.gmra.mrb[4].mxu1 %vm81_vm1, %v7968_v6  ;;  %v4308_v41 = vsel %vm4058_vm10, %v4299_v62, %v4301_v7 }
 0x2d7   :  { %4216 = vmatpush1.msra.mxu1 %v4063_v8  ;;  %4279 = vmatprep.mubr.f32.mxu1 %v9234_v36 }
 0x2d8   :  { %7973 = vmatprep.subr.msk.mxu1 %vm587_vm2, %v4307_v9  ;;  %v4548_v10 = vpop.permute.xlu0 %4547 }
 0x2d9   :  { %7970 = vmatmul.mubr.msk.f32.vlgmr.msra.gmra.mrb[6].mxu0 %vm81_vm1, %v7968_v6  ;;  %v4560_v44 = vsel %vm4559_vm11, %v4548_v10, %v4550_v43 }
 0x2da   :  { %7971 = vmatmul.mubr.msk.f32.vlgmr.msra.gmra.mrb[6].mxu1 %vm81_vm1, %v7968_v6  ;;  %v4305_v12 = vpop.permute.xlu1 %4304  ;;  %4461 = vmatprep.mubr.f32.mxu0 %v9234_v36 }
 0x2db   :  { %7974 = vmatpush1.msk.msra.mxu1 %vm587_vm2, %v4306_v11  ;;  %4390 = vmatprep.mubr.f32.mxu1 %v9234_v36 }
 0x2dc   :  { %7979 = vmatprep.subr.msk.mxu1 %vm587_vm2, %v4305_v12 }
 0x2de   :  { %v4303_v45 = vpop.permute.xlu0 %4302  ;;  %7975 = vmatmul.mubr.msk.f32.vlgmr.msra.gmra.mrb[4].mxu1 %vm583_vm4, %v7972_v13 }
 0x2df   :  { %v4309_v40 = vsel %vm4058_vm10, %v4301_v7, %v4303_v45  ;;  %v4310_v14 = vsel %vm4058_vm10, %v4303_v45, %v4305_v12  ;;  %4532 = vmatprep.mubr.f32.mxu1 %v9234_v36  ;;  %v9546_v7 = vrot.slane %v550_v21, %v5081_v52 }
 0x2e0   :  { %v4552_v42 = vpop.permute.xlu1 %4551  ;;  %7976 = vmatprep.subr.msk.mxu0 %vm587_vm2, %v4309_v40  ;;  %7980 = vmatpush1.msk.msra.mxu1 %vm587_vm2, %v4310_v14 }
 0x2e1   :  { %7977 = vmatpush1.msk.msra.mxu0 %vm587_vm2, %v4308_v41  ;;  %v4561_v59 = vsel %vm4559_vm11, %v4550_v43, %v4552_v42 }
 0x2e2   :  { %4574 = vmatprep.subr.mxu1 %v4561_v59  ;;  %v4556_v63 = vpop.permute.xlu0 %4555  ;;  %7981 = vmatmul.mubr.msk.f32.vlgmr.msra.gmra.mrb[6].mxu1 %vm583_vm4, %v7972_v13 }
 0x2e3   :  { %4575 = vmatpush1.msra.mxu1 %v4560_v44  ;;  %7978 = vmatmul.mubr.msk.f32.vlgmr.msra.gmra.mrb[6].mxu0 %vm583_vm4, %v7972_v13 }
 0x2e4   :  { %v4554_v1 = vpop.permute.xlu1 %4553  ;;  %4638 = vmatprep.mubr.f32.mxu1 %v9234_v36  ;;  %4709 = vmatprep.mubr.f32.mxu0 %v9234_v36 }
 0x2e5   :  { %v4562_v39 = vsel %vm4559_vm11, %v4552_v42, %v4554_v1  ;;  %v4563_v2 = vsel %vm4559_vm11, %v4554_v1, %v4556_v63 }
 0x2e6   :  { %4645 = vmatprep.subr.mxu0 %v4563_v2  ;;  %7983 = vmatmul.mubr.msk.f32.vlgmr.msra.gmra.mrb[4].mxu1 %vm81_vm1, %v7982_v5 }
 0x2e7   :  { %v4798_v15 = vpop.permute.xlu0 %4797  ;;  %4646 = vmatpush1.msra.mxu0 %v4562_v39  ;;  %4780 = vmatprep.mubr.f32.mxu1 %v9234_v36 }
 0x2e8   :  { %v4558_v17 = vpop.permute.xlu1 %4557 }
 0x2e9   :  { %v4564_v3 = vsel %vm4559_vm11, %v4556_v63, %v4558_v17  ;;  %4716 = vmatprep.subr.mxu1 %v4558_v17 }
 0x2ea   :  { %4717 = vmatpush1.msra.mxu1 %v4564_v3 }
 0x2eb   :  { %v4796_v22 = vpop.permute.xlu0 %4795  ;;  %7984 = vmatmul.mubr.msk.f32.vlgmr.msra.gmra.mrb[6].mxu0 %vm81_vm1, %v7982_v5  ;;  %7985 = vmatmul.mubr.msk.f32.vlgmr.msra.gmra.mrb[6].mxu1 %vm81_vm1, %v7982_v5 }
 0x2ec   :  { %v4800_v24 = vpop.permute.xlu1 %4799  ;;  %4891 = vmatprep.mubr.f32.mxu1 %v9234_v36  ;;  %4962 = vmatprep.mubr.f32.mxu0 %v9234_v36  ;;  %v4807_v27 = vsel %vm4559_vm11, %v4796_v22, %v4798_v15 }
 0x2ed   :  { %v4808_v25 = vsel %vm4559_vm11, %v4798_v15, %v4800_v24 }
 0x2ee   :  { %7987 = vmatprep.subr.msk.mxu1 %vm587_vm2, %v4808_v25 }
 0x2ef   :  { %v4804_v28 = vpop.permute.xlu0 %4803  ;;  %7988 = vmatpush1.msk.msra.mxu1 %vm587_vm2, %v4807_v27 }
 0x2f0   :  { %7989 = vmatmul.mubr.msk.f32.vlgmr.msra.gmra.mrb[4].mxu1 %vm583_vm4, %v7986_v26  ;;  %v4802_v29 = vpop.permute.xlu1 %4801 }
 0x2f1   :  { %v4809_v30 = vsel %vm4559_vm11, %v4800_v24, %v4802_v29  ;;  %v4810_v31 = vsel %vm4559_vm11, %v4802_v29, %v4804_v28  ;;  %5033 = vmatprep.mubr.f32.mxu1 %v9234_v36 }
 0x2f2   :  { %7990 = vmatprep.subr.msk.mxu0 %vm587_vm2, %v4810_v31 }
 0x2f3   :  { %7991 = vmatpush1.msk.msra.mxu0 %vm587_vm2, %v4809_v30  ;;  %v5121_v30 = vld [vmem:[%s9968_s9] sm:$0xff]  ;;  %s7858_s9 = sshll.u32 %s8654_s29, 4  ;;  %s7859_s9 = int_to_ptr.vmem [resolvable:$true] %s7858_s9 }
 0x2f4   :  { %7992 = vmatmul.mubr.msk.f32.vlgmr.msra.gmra.mrb[6].mxu0 %vm583_vm4, %v7986_v26  ;;  %v4806_v32 = vpop.permute.xlu1 %4805  ;;  %p8612_p3 = scmp.lt.s32.totalorder %s7859_s9, %s7859_s9 }
 0x2f5   :  { %v4811_v34 = vsel %vm4559_vm11, %v4804_v28, %v4806_v32  ;;  %7993 = vmatprep.subr.msk.mxu1 %vm587_vm2, %v4806_v32  ;;  %5276 = vmatprep.mubr.f32.mxu0 %v9234_v36 }
 0x2f6   :  { %7994 = vmatpush1.msk.msra.mxu1 %vm587_vm2, %v4811_v34  ;;  %v5125_v34 = vld [vmem:[%s9969_s10] sm:$0xff] }
 0x2f7   :  { %7995 = vmatmul.mubr.msk.f32.vlgmr.msra.gmra.mrb[6].mxu1 %vm583_vm4, %v7986_v26 }
 0x305   :  { %v5050_v37 = vpop.permute.xlu0 %5049 }
 0x3c3   :  { %v4893_v23 = vpop.f32.mrb[4].mxu1 }
 0x3c4   :  { %v9533_v47 = vadd.f32 %v5050_v37, %v4893_v23  ;;  %v4895_v33 = vpop.f32.mrb[5].mxu1 }
 0x3c5   :  { %v5053_v48 = vadd.f32 %v5050_v37, %v4895_v33 }
 0x3c6   :  { %v5089_v50 = vmul.f32 %v9529_v0, %v9533_v47 }
 0x3c7   :  { %v5090_v53 = vmul.f32 %v9531_v38, %v5053_v48  ;;  %v4964_v54 = vpop.f32.mrb[6].mxu0 }
 0x3c8   :  { %v5104_v56 = vmul.f32 %v5089_v50, %v9533_v47  ;;  %v5054_v57 = vadd.f32 %v5050_v37, %v4964_v54  ;;  %v4966_v58 = vpop.f32.mrb[7].mxu0 }
 0x3c9   :  { %v5095_v60 = vadd.f32 %v5090_v53, %v5089_v50  ;;  %v5105_v61 = vmul.f32 %v5090_v53, %v5053_v48  ;;  %v5055_v62 = vadd.f32 %v5050_v37, %v4966_v58 }
 0x3ca   :  { %v5091_v6 = vmul.f32 %v9537_v51, %v5054_v57  ;;  %v5035_v43 = vpop.f32.mrb[6].mxu1 }
 0x3cb   :  { %v5110_v8 = vadd.f32 %v5105_v61, %v5104_v56  ;;  %v5092_v9 = vmul.f32 %v9540_v55, %v5055_v62  ;;  %v5056_v10 = vadd.f32 %v5050_v37, %v5035_v43  ;;  %v5037_v11 = vpop.f32.mrb[7].mxu1 }
 0x3cc   :  { %v5096_v12 = vadd.f32 %v5095_v60, %v5091_v6  ;;  %v5106_v13 = vmul.f32 %v5091_v6, %v5054_v57  ;;  %v5057_v45 = vadd.f32 %v5050_v37, %v5037_v11  ;;  %v7401_v11 = vld [vmem:[#allocation6 + $0x10] sm:$0xff] }
 0x3cd   :  { %v5107_v40 = vmul.f32 %v5092_v9, %v5055_v62  ;;  %v5093_v14 = vmul.f32 %v9543_v4, %v5056_v10 }
 0x3ce   :  { %v5111_v41 = vadd.f32 %v5110_v8, %v5106_v13  ;;  %v5097_v42 = vadd.f32 %v5096_v12, %v5092_v9  ;;  %v5094_v59 = vmul.f32 %v9546_v7, %v5057_v45  ;;  %v7404_v12 = vld [vmem:[#allocation6 + $0x28] sm:$0xff]  ;;  %v7406_v13 = vld [vmem:[#allocation6 + $0x38] sm:$0xff] }
 0x3cf   :  { %v5108_v44 = vmul.f32 %v5093_v14, %v5056_v10 }
 0x3d0   :  { %v5112_v63 = vadd.f32 %v5111_v41, %v5107_v40  ;;  %v5109_v5 = vmul.f32 %v5094_v59, %v5057_v45  ;;  %v5098_v1 = vadd.f32 %v5097_v42, %v5093_v14  ;;  %v5099_v39 = vsel %vm81_vm1, %v5094_v59, 0.0  ;;  %v7403_v14 = vld [vmem:[#allocation6 + $0x20] sm:$0xff]  ;;  %v7405_v41 = vld [vmem:[#allocation6 + $0x30] sm:$0xff]  ;;  %v7408_v42 = vld [vmem:[#allocation6 + $0x48] sm:$0xff] }
 0x3d1   :  { %v9685_v40 = vpack.c.bf16 %v7406_v13, %v7404_v12  ;;  %v7410_v59 = vld [vmem:[#allocation6 + $0x58] sm:$0xff]  ;;  %v7432_v12 = vld [vmem:[#allocation6 + $0x108] sm:$0xff] }
 0x3d2   :  { %v5100_v2 = vadd.f32 %v5099_v39, %v5098_v1  ;;  %v5113_v15 = vadd.f32 %v5112_v63, %v5108_v44  ;;  %v5114_v17 = vsel %vm81_vm1, %v5109_v5, 0.0  ;;  %v9689_v44 = vpack.c.bf16 %v7405_v41, %v7403_v14  ;;  %v7407_v5 = vld [vmem:[#allocation6 + $0x40] sm:$0xff]  ;;  %v7409_v1 = vld [vmem:[#allocation6 + $0x50] sm:$0xff]  ;;  %v7412_v39 = vld [vmem:[#allocation6 + $0x68] sm:$0xff] }
 0x3d3   :  { %v9692_v63 = vpack.c.bf16 %v7410_v59, %v7408_v42  ;;  %v7434_v13 = vld [vmem:[#allocation6 + $0x118] sm:$0xff]  ;;  %v9735_v14 = vld [vmem:[#allocation2] sm:$0xff]  ;;  %v7431_v59 = vld [vmem:[#allocation6 + $0x100] sm:$0xff] }
 0x3d4   :  { %5101 = vadd.xlane.f32.xlu1 %v5100_v2  ;;  %v5115_v3 = vadd.f32 %v5114_v17, %v5113_v15  ;;  %v7414_v2 = vld [vmem:[#allocation6 + $0x78] sm:$0xff]  ;;  %v9695_v15 = vpack.c.bf16 %v7409_v1, %v7407_v5  ;;  %v9742_v42 = vpack.c.bf16 %v7434_v13, %v7432_v12  ;;  %v7433_v5 = vld [vmem:[#allocation6 + $0x110] sm:$0xff] }
 0x3d5   :  { %v8003_v12 = vld [vmem:[%s9970_s11 + $0x10] sm:$0xff] }
 0x3d6   :  { %5116 = vadd.xlane.f32.xlu0 %v5115_v3  ;;  %v9698_v3 = vpack.c.bf16 %v7414_v2, %v7412_v39  ;;  %v7436_v2 = vld [vmem:[#allocation6 + $0x128] sm:$0xff] }
 0x461   :  { %v5102_v22 = vpop.xlane.xlu1 %5101 }
 0x462   :  { %v5103_v24 = vmul.f32 0.001953125, %v5102_v22  ;;  %v7411_v22 = vld [vmem:[#allocation6 + $0x60] sm:$0xff] }
 0x463   :  { %v5117_v25 = vpop.xlane.xlu0 %5116 }
 0x464   :  { %v5119_v26 = vmul.f32 %v5103_v24, %v5103_v24  ;;  %v5118_v27 = vmul.f32 0.001953125, %v5117_v25  ;;  %v7416_v25 = vld [vmem:[#allocation6 + $0x88] sm:$0xff] }
 0x466   :  { %v5120_v28 = vsub.f32 %v5118_v27, %v5119_v26  ;;  %v7418_v26 = vld [vmem:[#allocation6 + $0x98] sm:$0xff] }
 0x468   :  { %v5122_v29 = vadd.f32 1e-05, %v5120_v28  ;;  %v9704_v28 = vpack.c.bf16 %v7418_v26, %v7416_v25  ;;  %v9752_v26 = vpack.c.bf16 %v7433_v5, %v7431_v59  ;;  %v7447_v5 = vld [vmem:[#allocation6 + $0x180] sm:$0xff] }
 0x46a   :  { %8557 = vrsqrt.f32 %v5122_v29  ;;  %v7415_v29 = vld [vmem:[#allocation6 + $0x80] sm:$0xff] }
 0x474   :  { %v8558_v31 = vpop.eup %8557 }
 0x475   :  { %v5124_v32 = vmul.f32 %v8558_v31, %v5121_v30  ;;  %v7417_v30 = vld [vmem:[#allocation6 + $0x90] sm:$0xff]  ;;  %v7420_v31 = vld [vmem:[#allocation6 + $0xa8] sm:$0xff] }
 0x477   :  { %5130 = vperm.xlu1 %8551, %v5124_v32   ;;  %v5126_v16 = vmul.f32 %v5124_v32, %v5103_v24  ;;  %v7413_v24 = vld [vmem:[#allocation6 + $0x70] sm:$0xff]  ;;  %v7422_v32 = vld [vmem:[#allocation6 + $0xb8] sm:$0xff] }
 0x478   :  { %v9701_v27 = vpack.c.bf16 %v7413_v24, %v7411_v22  ;;  %v5171_v24 = vld [vmem:[%s9970_s11] sm:$0xff] }
 0x479   :  { %v5127_v18 = vsub.f32 %v5125_v34, %v5126_v16 }
 0x47b   :  { %5141 = vperm.xlu0 %8550, %v5127_v18   ;;  %v9707_v18 = vpack.c.bf16 %v7417_v30, %v7415_v29  ;;  %v7435_v30 = vld [vmem:[#allocation6 + $0x120] sm:$0xff] }
 0x47f   :  { %5186 = vrot.lane.b32.xlu0 %v9234_v36, %s8645_s30 }
 0x4f6   :  { %v5131_v19 = vpop.permute.xlu1 %5130 }
 0x4f7   :  { %v5133_v21 = vmul.f32 %v5131_v19, %v9533_v47  ;;  %v5134_v35 = vmul.f32 %v5131_v19, %v5053_v48  ;;  %v5135_v37 = vmul.f32 %v5131_v19, %v5054_v57  ;;  %v5136_v20 = vmul.f32 %v5131_v19, %v5055_v62 }
 0x4f8   :  { %v5137_v23 = vmul.f32 %v5131_v19, %v5056_v10  ;;  %v5138_v46 = vmul.f32 %v5131_v19, %v5057_v45  ;;  %v9710_v19 = vpack.c.bf16 %v7422_v32, %v7420_v31  ;;  %v7437_v31 = vld [vmem:[#allocation6 + $0x130] sm:$0xff] }
 0x4fa   :  { %v5142_v33 = vpop.permute.xlu0 %5141 }
 0x4fb   :  { %v5144_v49 = vadd.f32 %v5142_v33, %v5133_v21  ;;  %v5145_v50 = vadd.f32 %v5142_v33, %v5134_v35  ;;  %v5146_v52 = vadd.f32 %v5142_v33, %v5135_v37  ;;  %v5147_v53 = vadd.f32 %v5142_v33, %v5136_v20  ;;  %v7419_v21 = vld [vmem:[#allocation6 + $0xa0] sm:$0xff]  ;;  %v7421_v35 = vld [vmem:[#allocation6 + $0xb0] sm:$0xff]  ;;  %v7424_v37 = vld [vmem:[#allocation6 + $0xc8] sm:$0xff] }
 0x4fc   :  { %v5148_v54 = vadd.f32 %v5142_v33, %v5137_v23  ;;  %v5149_v56 = vadd.f32 %v5142_v33, %v5138_v46  ;;  %v7426_v20 = vld [vmem:[#allocation6 + $0xd8] sm:$0xff] }
 0x4fd   :  { %v5150_v58 = vmax.f32 %v5144_v49, 0.0  ;;  %v5151_v60 = vmax.f32 %v5145_v50, 0.0  ;;  %v5152_v61 = vmax.f32 %v5146_v52, 0.0  ;;  %v5153_v6 = vmax.f32 %v5147_v53, 0.0  ;;  %v7996_v49 = vld [vmem:[%s9970_s11 + $0x8] sm:$0xff] }
 0x4fe   :  { %v5154_v43 = vmax.f32 %v5148_v54, 0.0  ;;  %v5155_v8 = vmax.f32 %v5149_v56, 0.0  ;;  %v5187_v17 = vpop.permute.xlu0 %5186  ;;  %v9717_v50 = vpack.c.bf16 %v7421_v35, %v7419_v21  ;;  %v9721_v53 = vpack.c.bf16 %v7426_v20, %v7424_v37  ;;  %v7423_v54 = vld [vmem:[#allocation6 + $0xc0] sm:$0xff]  ;;  %v7425_v56 = vld [vmem:[#allocation6 + $0xd0] sm:$0xff]  ;;  %v7442_v21 = vld [vmem:[#allocation6 + $0x158] sm:$0xff] }
 0x4ff   :  { %v9564_v47 = vmul.f32 %v5150_v58, %v9529_v0  ;;  %v9567_v48 = vmul.f32 %v5151_v60, %v9531_v38  ;;  %v9570_v57 = vmul.f32 %v5152_v61, %v9537_v51  ;;  %v9573_v62 = vmul.f32 %v5153_v6, %v9540_v55  ;;  %v7387_v38 = vld [vmem:[%s9971_s12] sm:$0xff]  ;;  %v7402_v55 = vld [vmem:[#allocation6 + $0x18] sm:$0xff] }
 0x500   :  { %v9576_v9 = vmul.f32 %v5154_v43, %v9543_v4  ;;  %v5161_v10 = vmul.f32 %v5155_v8, %v9546_v7  ;;  %v7400_v51 = vld [vmem:[#allocation6 + $0x8] sm:$0xff]  ;;  %v7399_v4 = vld [vmem:[#allocation6] sm:$0xff]  ;;  %v7430_v6 = vld [vmem:[#allocation6 + $0xf8] sm:$0xff]  ;;  %v9762_v20 = vpack.c.bf16 %v7437_v31, %v7435_v30 }
 0x501   :  { %5194 = vrot.lane.b32.xlu0 %v9573_v62, %s8645_s30  ;;  %5188 = vrot.lane.b32.xlu1 %v9564_v47, %s8645_s30  ;;  %v9681_v7 = vpack.c.bf16 %v7402_v55, %v7400_v51  ;;  %v9683_v45 = vpack.c.bf16 %v7401_v11, %v7399_v4  ;;  %v7428_v61 = vld [vmem:[#allocation6 + $0xe8] sm:$0xff]  ;;  %v7427_v51 = vld [vmem:[#allocation6 + $0xe0] sm:$0xff]  ;;  %v7429_v55 = vld [vmem:[#allocation6 + $0xf0] sm:$0xff] }
 0x502   :  { %5170 = vst.msk [vmem:[#allocation2 + $0x30] sm:$0xff] %vm81_vm1, %v5161_v10  ;;  %v9729_v10 = vpack.c.bf16 %v7425_v56, %v7423_v54  ;;  %v9739_v41 = vpack.c.bf16 %v7429_v55, %v7427_v51  ;;  %v7444_v54 = vld [vmem:[#allocation6 + $0x168] sm:$0xff]  ;;  %v7446_v56 = vld [vmem:[#allocation6 + $0x178] sm:$0xff] }
 0x503   :  { %8217 = vmatprep.subr.bf16.mxu1 %v9681_v7  ;;  %v7448_v55 = vld [vmem:[#allocation6 + $0x188] sm:$0xff] }
 0x504   :  { %8219 = vmatpush1.bf16.msra.mxu1 %v9683_v45 }
 0x505   :  { %5425 = vrot.lane.b32.xlu0 %v9234_v36, %s8644_s21  ;;  %5190 = vrot.lane.b32.xlu1 %v9567_v48, %s8645_s30 }
 0x506   :  { %8221 = vmatprep.subr.bf16.mxu1 %v9685_v40 }
 0x508   :  { %8223 = vmatpush1.bf16.msra.mxu1 %v9689_v44 }
 0x509   :  { %5427 = vrot.lane.b32.xlu0 %v9564_v47, %s8644_s21  ;;  %5192 = vrot.lane.b32.xlu1 %v9570_v57, %s8645_s30  ;;  %v9620_v0 = vld [vmem:[#allocation2 + $0x30] sm:$0xff] }
 0x50a   :  { %8225 = vmatprep.subr.bf16.mxu1 %v9692_v63 }
 0x50c   :  { %8227 = vmatpush1.bf16.msra.mxu1 %v9695_v15 }
 0x50d   :  { %5433 = vrot.lane.b32.xlu0 %v9573_v62, %s8644_s21  ;;  %5196 = vrot.lane.b32.xlu1 %v9576_v9, %s8645_s30 }
 0x50e   :  { %8229 = vmatprep.subr.bf16.mxu1 %v9698_v3 }
 0x510   :  { %8231 = vmatpush1.bf16.msra.mxu1 %v9701_v27 }
 0x511   :  { %5666 = vrot.lane.b32.xlu0 %v9234_v36, %s8646_s16  ;;  %5429 = vrot.lane.b32.xlu1 %v9567_v48, %s8644_s21 }
 0x512   :  { %8233 = vmatprep.subr.bf16.mxu1 %v9704_v28 }
 0x514   :  { %8235 = vmatpush1.bf16.msra.mxu1 %v9707_v18 }
 0x515   :  { %5668 = vrot.lane.b32.xlu0 %v9564_v47, %s8646_s16  ;;  %5431 = vrot.lane.b32.xlu1 %v9570_v57, %s8644_s21 }
 0x516   :  { %8237 = vmatprep.subr.bf16.mxu1 %v9710_v19 }
 0x518   :  { %8239 = vmatpush1.bf16.msra.mxu1 %v9717_v50 }
 0x519   :  { %5674 = vrot.lane.b32.xlu0 %v9573_v62, %s8646_s16  ;;  %5435 = vrot.lane.b32.xlu1 %v9576_v9, %s8644_s21 }
 0x51a   :  { %8241 = vmatprep.subr.bf16.mxu1 %v9721_v53 }
 0x51c   :  { %8243 = vmatpush1.bf16.msra.mxu1 %v9729_v10 }
 0x51d   :  { %5927 = vrot.lane.b32.xlu0 %v9234_v36, %s8647_s5  ;;  %5670 = vrot.lane.b32.xlu1 %v9567_v48, %s8646_s16 }
 0x521   :  { %5929 = vrot.lane.b32.xlu0 %v9564_v47, %s8647_s5  ;;  %5672 = vrot.lane.b32.xlu1 %v9570_v57, %s8646_s16 }
 0x525   :  { %5935 = vrot.lane.b32.xlu0 %v9573_v62, %s8647_s5  ;;  %5676 = vrot.lane.b32.xlu1 %v9576_v9, %s8646_s16 }
 0x529   :  { %5939 = vrot.lane.b32.xlu0 %v9620_v0, %s8647_s5  ;;  %5931 = vrot.lane.b32.xlu1 %v9567_v48, %s8647_s5 }
 0x52d   :  { %6405 = vrot.lane.b32.xlu0 %v9570_v57, %s8648_s1  ;;  %5933 = vrot.lane.b32.xlu1 %v9570_v57, %s8647_s5 }
 0x531   :  { %6407 = vrot.lane.b32.xlu0 %v9573_v62, %s8648_s1  ;;  %5937 = vrot.lane.b32.xlu1 %v9576_v9, %s8647_s5 }
 0x535   :  { %6411 = vrot.lane.b32.xlu0 %v9620_v0, %s8648_s1  ;;  %6403 = vrot.lane.b32.xlu1 %v9567_v48, %s8648_s1 }
 0x539   :  { %6652 = vrot.lane.b32.xlu0 %v9570_v57, %s8649_s2  ;;  %6401 = vrot.lane.b32.xlu1 %v9564_v47, %s8648_s1 }
 0x53d   :  { %6654 = vrot.lane.b32.xlu0 %v9573_v62, %s8649_s2  ;;  %6409 = vrot.lane.b32.xlu1 %v9576_v9, %s8648_s1 }
 0x541   :  { %6658 = vrot.lane.b32.xlu0 %v9620_v0, %s8649_s2  ;;  %6650 = vrot.lane.b32.xlu1 %v9567_v48, %s8649_s2 }
 0x545   :  { %6899 = vrot.lane.b32.xlu0 %v9570_v57, %s8650_s18  ;;  %6648 = vrot.lane.b32.xlu1 %v9564_v47, %s8649_s2 }
 0x549   :  { %6901 = vrot.lane.b32.xlu0 %v9573_v62, %s8650_s18  ;;  %6656 = vrot.lane.b32.xlu1 %v9576_v9, %s8649_s2 }
 0x54d   :  { %6905 = vrot.lane.b32.xlu0 %v9620_v0, %s8650_s18  ;;  %6897 = vrot.lane.b32.xlu1 %v9567_v48, %s8650_s18 }
 0x551   :  { %7146 = vrot.lane.b32.xlu0 %v9570_v57, %s8651_s23  ;;  %6895 = vrot.lane.b32.xlu1 %v9564_v47, %s8650_s18 }
 0x555   :  { %7148 = vrot.lane.b32.xlu0 %v9573_v62, %s8651_s23  ;;  %6903 = vrot.lane.b32.xlu1 %v9576_v9, %s8650_s18 }
 0x559   :  { %7152 = vrot.lane.b32.xlu0 %v9620_v0, %s8651_s23  ;;  %7144 = vrot.lane.b32.xlu1 %v9567_v48, %s8651_s23 }
 0x55d   :  { %7142 = vrot.lane.b32.xlu1 %v9564_v47, %s8651_s23 }
 0x561   :  { %7150 = vrot.lane.b32.xlu1 %v9576_v9, %s8651_s23 }
 0x565   :  { %7390 = vperm.xlu1 %8551, %v7387_v38   ;;  %v9731_v38 = vpack.c.bf16 %v7430_v6, %v7428_v61  ;;  %v9774_v61 = vpack.c.bf16 %v7446_v56, %v7444_v54  ;;  %v7443_v6 = vld [vmem:[#allocation6 + $0x160] sm:$0xff]  ;;  %v7457_v56 = vld [vmem:[#allocation6 + $0x1d0] sm:$0xff] }
 0x566   :  { %v7455_v54 = vld [vmem:[#allocation6 + $0x1c0] sm:$0xff] }
 0x567   :  { %8245 = vmatprep.subr.bf16.mxu1 %v9731_v38 }
 0x568   :  { %8247 = vmatpush1.bf16.msra.mxu1 %v9739_v41 }
 0x569   :  { %8249 = vmatprep.subr.bf16.mxu1 %v9742_v42 }
 0x56c   :  { %8251 = vmatpush1.bf16.msra.mxu1 %v9752_v26 }
 0x573   :  { %v5189_v34 = vpop.permute.xlu1 %5188  ;;  %v5195_v16 = vpop.permute.xlu0 %5194 }
 0x574   :  { %v5198_v52 = vsel %vm1072_vm5, %v5187_v17, %v5189_v34  ;;  %v7438_v17 = vld [vmem:[#allocation6 + $0x138] sm:$0xff] }
 0x575   :  { %v9755_v29 = vpack.c.bf16 %v7438_v17, %v7436_v2 }
 0x577   :  { %v5191_v23 = vpop.permute.xlu1 %5190  ;;  %v5426_v46 = vpop.permute.xlu0 %5425  ;;  %8253 = vmatprep.subr.bf16.mxu1 %v9755_v29 }
 0x578   :  { %v5199_v33 = vsel %vm1072_vm5, %v5189_v34, %v5191_v23  ;;  %8255 = vmatpush1.bf16.msra.mxu1 %v9762_v20 }
 0x579   :  { %5212 = vmatprep.subr.mxu0 %v5199_v33  ;;  %v7441_v33 = vld [vmem:[#allocation6 + $0x150] sm:$0xff] }
 0x57a   :  { %5213 = vmatpush1.msra.mxu0 %v5198_v52 }
 0x57b   :  { %v5193_v58 = vpop.permute.xlu1 %5192  ;;  %7997 = vmatmul.mubr.msk.f32.vlgmr.msra.gmra.mrb[8].mxu0 %vm81_vm1, %v7996_v49  ;;  %v5428_v60 = vpop.permute.xlu0 %5427 }
 0x57c   :  { %v5200_v43 = vsel %vm1072_vm5, %v5191_v23, %v5193_v58  ;;  %v5201_v8 = vsel %vm1072_vm5, %v5193_v58, %v5195_v16  ;;  %5347 = vmatprep.mubr.f32.mxu0 %v9234_v36  ;;  %v5437_v25 = vsel %vm577_vm3, %v5426_v46, %v5428_v60  ;;  %v7439_v46 = vld [vmem:[#allocation6 + $0x140] sm:$0xff] }
 0x57d   :  { %5283 = vmatprep.subr.mxu0 %v5201_v8 }
 0x57e   :  { %5284 = vmatpush1.msra.mxu0 %v5200_v43  ;;  %v7445_v43 = vld [vmem:[#allocation6 + $0x170] sm:$0xff] }
 0x57f   :  { %v5197_v4 = vpop.permute.xlu1 %5196  ;;  %7998 = vmatmul.mubr.msk.f32.vlgmr.msra.gmra.mrb[10].mxu0 %vm81_vm1, %v7996_v49  ;;  %v5434_v11 = vpop.permute.xlu0 %5433 }
 0x580   :  { %v5202_v36 = vsel %vm1072_vm5, %v5195_v16, %v5197_v4  ;;  %5354 = vmatprep.subr.mxu0 %v5197_v4  ;;  %5418 = vmatprep.mubr.f32.mxu0 %v9735_v14  ;;  %v7440_v16 = vld [vmem:[#allocation6 + $0x148] sm:$0xff]  ;;  %v7450_v4 = vld [vmem:[#allocation6 + $0x198] sm:$0xff] }
 0x581   :  { %5355 = vmatpush1.msra.mxu0 %v5202_v36  ;;  %v9765_v23 = vpack.c.bf16 %v7442_v21, %v7440_v16  ;;  %v9784_v36 = vpack.c.bf16 %v7445_v43, %v7443_v6  ;;  %v9787_v59 = vpack.c.bf16 %v7450_v4, %v7448_v55  ;;  %v8007_v43 = vld [vmem:[%s9970_s11 + $0x18] sm:$0xff]  ;;  %v9816_v55 = vpack.c.bf16 %v7457_v56, %v7455_v54 }
 0x583   :  { %v5430_v1 = vpop.permute.xlu1 %5429  ;;  %7999 = vmatmul.mubr.msk.f32.vlgmr.msra.gmra.mrb[12].mxu0 %vm81_vm1, %v7996_v49  ;;  %v5667_v39 = vpop.permute.xlu0 %5666  ;;  %8257 = vmatprep.subr.bf16.mxu1 %v9765_v23 }
 0x584   :  { %v5438_v22 = vsel %vm577_vm3, %v5428_v60, %v5430_v1  ;;  %5515 = vmatprep.mubr.f32.mxu0 %v9735_v14  ;;  %v9771_v60 = vpack.c.bf16 %v7441_v33, %v7439_v46 }
 0x585   :  { %5451 = vmatprep.subr.mxu0 %v5438_v22  ;;  %v7452_v22 = vld [vmem:[#allocation6 + $0x1a8] sm:$0xff] }
 0x586   :  { %5452 = vmatpush1.msra.mxu0 %v5437_v25  ;;  %8259 = vmatpush1.bf16.msra.mxu1 %v9771_v60 }
 0x587   :  { %v5432_v32 = vpop.permute.xlu1 %5431  ;;  %8000 = vmatmul.mubr.msk.f32.vlgmr.msra.gmra.mrb[8].mxu0 %vm81_vm1, %v5171_v24  ;;  %v5669_v34 = vpop.permute.xlu0 %5668  ;;  %8261 = vmatprep.subr.bf16.mxu1 %v9774_v61 }
 0x588   :  { %v5439_v35 = vsel %vm577_vm3, %v5430_v1, %v5432_v32  ;;  %v5440_v37 = vsel %vm577_vm3, %v5432_v32, %v5434_v11  ;;  %5586 = vmatprep.mubr.f32.mxu0 %v9735_v14  ;;  %v5678_v13 = vsel %vm1573_vm6, %v5667_v39, %v5669_v34  ;;  %v7449_v1 = vld [vmem:[#allocation6 + $0x190] sm:$0xff]  ;;  %v7451_v32 = vld [vmem:[#allocation6 + $0x1a0] sm:$0xff] }
 0x589   :  { %5522 = vmatprep.subr.mxu0 %v5440_v37  ;;  %v9794_v30 = vpack.c.bf16 %v7449_v1, %v7447_v5  ;;  %v7458_v37 = vld [vmem:[#allocation6 + $0x1d8] sm:$0xff] }
 0x58a   :  { %5523 = vmatpush1.msra.mxu0 %v5439_v35  ;;  %8263 = vmatpush1.bf16.msra.mxu1 %v9784_v36  ;;  %v7456_v35 = vld [vmem:[#allocation6 + $0x1c8] sm:$0xff] }
 0x58b   :  { %v5436_v49 = vpop.permute.xlu1 %5435  ;;  %8001 = vmatmul.mubr.msk.f32.vlgmr.msra.gmra.mrb[10].mxu0 %vm81_vm1, %v5171_v24  ;;  %v5675_v52 = vpop.permute.xlu0 %5674  ;;  %8265 = vmatprep.subr.bf16.mxu1 %v9787_v59 }
 0x58c   :  { %v5441_v58 = vsel %vm577_vm3, %v5434_v11, %v5436_v49  ;;  %5593 = vmatprep.subr.mxu0 %v5436_v49  ;;  %5657 = vmatprep.mubr.f32.mxu0 %v9735_v14  ;;  %v9806_v49 = vpack.c.bf16 %v7458_v37, %v7456_v35 }
 0x58d   :  { %5594 = vmatpush1.msra.mxu0 %v5441_v58 }
 0x58e   :  { %8267 = vmatpush1.bf16.msra.mxu1 %v9794_v30 }
 0x58f   :  { %v5671_v8 = vpop.permute.xlu1 %5670  ;;  %8002 = vmatmul.mubr.msk.f32.vlgmr.msra.gmra.mrb[12].mxu0 %vm81_vm1, %v5171_v24  ;;  %v5928_v51 = vpop.permute.xlu0 %5927  ;;  %v7454_v24 = vld [vmem:[#allocation6 + $0x1b8] sm:$0xff] }
 0x590   :  { %v5679_v11 = vsel %vm1573_vm6, %v5669_v34, %v5671_v8  ;;  %5756 = vmatprep.mubr.f32.mxu0 %v9735_v14  ;;  %v9797_v31 = vpack.c.bf16 %v7454_v24, %v7452_v22  ;;  %v7453_v34 = vld [vmem:[#allocation6 + $0x1b0] sm:$0xff]  ;;  %v8011_v24 = vld [vmem:[%s9970_s11 + $0x20] sm:$0xff] }
 0x591   :  { %5692 = vmatprep.subr.mxu0 %v5679_v11  ;;  %v9803_v33 = vpack.c.bf16 %v7453_v34, %v7451_v32 }
 0x592   :  { %5693 = vmatpush1.msra.mxu0 %v5678_v13  ;;  %8269 = vmatprep.subr.bf16.mxu1 %v9797_v31 }
 0x593   :  { %v5673_v2 = vpop.permute.xlu1 %5672  ;;  %8004 = vmatmul.mubr.msk.f32.vlgmr.msra.gmra.mrb[8].mxu0 %vm81_vm1, %v8003_v12  ;;  %v5930_v17 = vpop.permute.xlu0 %5929  ;;  %8271 = vmatpush1.bf16.msra.mxu1 %v9803_v33 }
 0x594   :  { %v5680_v39 = vsel %vm1573_vm6, %v5671_v8, %v5673_v2  ;;  %v5681_v25 = vsel %vm1573_vm6, %v5673_v2, %v5675_v52  ;;  %5827 = vmatprep.mubr.f32.mxu0 %v9735_v14  ;;  %v5941_v8 = vsel %vm2090_vm7, %v5928_v51, %v5930_v17  ;;  %8273 = vmatprep.subr.bf16.mxu1 %v9806_v49 }
 0x595   :  { %5763 = vmatprep.subr.mxu0 %v5681_v25 }
 0x596   :  { %5764 = vmatpush1.msra.mxu0 %v5680_v39 }
 0x597   :  { %v5677_v16 = vpop.permute.xlu1 %5676  ;;  %8005 = vmatmul.mubr.msk.f32.vlgmr.msra.gmra.mrb[10].mxu0 %vm81_vm1, %v8003_v12  ;;  %v5936_v21 = vpop.permute.xlu0 %5935  ;;  %8275 = vmatpush1.bf16.msra.mxu1 %v9816_v55 }
 0x598   :  { %v5682_v46 = vsel %vm1573_vm6, %v5675_v52, %v5677_v16  ;;  %5834 = vmatprep.subr.mxu0 %v5677_v16  ;;  %5898 = vmatprep.mubr.f32.mxu0 %v9735_v14 }
 0x599   :  { %5835 = vmatpush1.msra.mxu0 %v5682_v46 }
 0x59b   :  { %v5932_v58 = vpop.permute.xlu1 %5931  ;;  %8006 = vmatmul.mubr.msk.f32.vlgmr.msra.gmra.mrb[12].mxu0 %vm81_vm1, %v8003_v12  ;;  %v5940_v6 = vpop.permute.xlu0 %5939 }
 0x59c   :  { %v5942_v52 = vsel %vm2090_vm7, %v5930_v17, %v5932_v58  ;;  %6020 = vmatprep.mubr.f32.mxu0 %v9735_v14 }
 0x59d   :  { %5956 = vmatprep.subr.mxu0 %v5942_v52  ;;  %v8019_v52 = vld [vmem:[%s9970_s11 + $0x30] sm:$0xff] }
 0x59e   :  { %5957 = vmatpush1.msra.mxu0 %v5941_v8 }
 0x59f   :  { %v5934_v4 = vpop.permute.xlu1 %5933  ;;  %8008 = vmatmul.mubr.msk.f32.vlgmr.msra.gmra.mrb[8].mxu0 %vm81_vm1, %v8007_v43  ;;  %v6406_v11 = vpop.permute.xlu0 %6405 }
 0x5a0   :  { %v5943_v12 = vsel %vm2090_vm7, %v5932_v58, %v5934_v4  ;;  %v5944_v13 = vsel %vm2090_vm7, %v5934_v4, %v5936_v21  ;;  %6091 = vmatprep.mubr.f32.mxu0 %v9735_v14 }
 0x5a1   :  { %6027 = vmatprep.subr.mxu0 %v5944_v13 }
 0x5a2   :  { %6028 = vmatpush1.msra.mxu0 %v5943_v12 }
 0x5a3   :  { %v5938_v51 = vpop.permute.xlu1 %5937  ;;  %8009 = vmatmul.mubr.msk.f32.vlgmr.msra.gmra.mrb[10].mxu0 %vm81_vm1, %v8007_v43  ;;  %v6408_v5 = vpop.permute.xlu0 %6407 }
 0x5a4   :  { %v5945_v1 = vsel %vm2090_vm7, %v5936_v21, %v5938_v51  ;;  %v5946_v2 = vsel %vm2090_vm7, %v5938_v51, %v5940_v6  ;;  %6162 = vmatprep.mubr.f32.mxu0 %v9735_v14 }
 0x5a5   :  { %6098 = vmatprep.subr.mxu0 %v5946_v2 }
 0x5a6   :  { %6099 = vmatpush1.msra.mxu0 %v5945_v1 }
 0x5a7   :  { %v6404_v17 = vpop.permute.xlu1 %6403  ;;  %8010 = vmatmul.mubr.msk.f32.vlgmr.msra.gmra.mrb[12].mxu0 %vm81_vm1, %v8007_v43  ;;  %6180 = vmatprep.subr.mxu0 %v9567_v48  ;;  %v6412_v22 = vpop.permute.xlu0 %6411 }
 0x5a8   :  { %6181 = vmatpush1.msra.mxu0 %v9564_v47  ;;  %6244 = vmatprep.mubr.f32.mxu0 %v9735_v14  ;;  %v6414_v47 = vsel %vm3056_vm8, %v6404_v17, %v6406_v11 }
 0x5a9   :  { %6251 = vmatprep.subr.mxu0 %v9573_v62 }
 0x5ab   :  { %v6402_v39 = vpop.permute.xlu1 %6401  ;;  %8012 = vmatmul.mubr.msk.f32.vlgmr.msra.gmra.mrb[8].mxu0 %vm81_vm1, %v8011_v24  ;;  %v6653_v25 = vpop.permute.xlu0 %6652 }
 0x5ac   :  { %6252 = vmatpush1.msra.mxu0 %v9570_v57  ;;  %6315 = vmatprep.mubr.f32.mxu0 %v9735_v14  ;;  %v6413_v32 = vsel %vm3056_vm8, %v6402_v39, %v6404_v17  ;;  %v8023_v17 = vld [vmem:[%s9970_s11 + $0x38] sm:$0xff] }
 0x5ad   :  { %6322 = vmatprep.subr.mxu0 %v9620_v0  ;;  %v6415_v0 = vsel %vm3056_vm8, %v6406_v11, %v6408_v5 }
 0x5af   :  { %v6410_v48 = vpop.permute.xlu1 %6409  ;;  %8013 = vmatmul.mubr.msk.f32.vlgmr.msra.gmra.mrb[10].mxu0 %vm81_vm1, %v8011_v24  ;;  %v6655_v62 = vpop.permute.xlu0 %6654 }
 0x5b0   :  { %6323 = vmatpush1.msra.mxu0 %v9576_v9  ;;  %6386 = vmatprep.mubr.f32.mxu0 %v9735_v14  ;;  %v6416_v57 = vsel %vm3056_vm8, %v6408_v5, %v6410_v48  ;;  %v8015_v9 = vld [vmem:[%s9970_s11 + $0x28] sm:$0xff]  ;;  %v6417_v35 = vsel %vm3056_vm8, %v6410_v48, %v6412_v22  ;;  %v6662_v43 = vsel %vm3557_vm9, %v6653_v25, %v6655_v62 }
 0x5b1   :  { %6427 = vmatprep.subr.mxu0 %v6414_v47 }
 0x5b3   :  { %v6651_v34 = vpop.permute.xlu1 %6650  ;;  %8014 = vmatmul.mubr.msk.f32.vlgmr.msra.gmra.mrb[12].mxu0 %vm81_vm1, %v8011_v24  ;;  %v6659_v21 = vpop.permute.xlu0 %6658 }
 0x5b4   :  { %6428 = vmatpush1.msra.mxu0 %v6413_v32  ;;  %6491 = vmatprep.mubr.f32.mxu0 %v9735_v14  ;;  %v6661_v46 = vsel %vm3557_vm9, %v6651_v34, %v6653_v25 }
 0x5b5   :  { %6498 = vmatprep.subr.mxu0 %v6416_v57  ;;  %v8027_v57 = vld [vmem:[%s9970_s11 + $0x40] sm:$0xff]  ;;  %s8653_s11 = smov 60  }
 0x5b7   :  { %v6649_v16 = vpop.permute.xlu1 %6648  ;;  %8016 = vmatmul.mubr.msk.f32.vlgmr.msra.gmra.mrb[8].mxu0 %vm81_vm1, %v8015_v9  ;;  %v6900_v54 = vpop.permute.xlu0 %6899 }
 0x5b8   :  { %6499 = vmatpush1.msra.mxu0 %v6415_v0  ;;  %6562 = vmatprep.mubr.f32.mxu0 %v9735_v14  ;;  %v6660_v56 = vsel %vm3557_vm9, %v6649_v16, %v6651_v34 }
 0x5b9   :  { %6569 = vmatprep.subr.mxu0 %v6412_v22 }
 0x5bb   :  { %v6657_v37 = vpop.permute.xlu1 %6656  ;;  %8017 = vmatmul.mubr.msk.f32.vlgmr.msra.gmra.mrb[10].mxu0 %vm81_vm1, %v8015_v9  ;;  %v6902_v4 = vpop.permute.xlu0 %6901 }
 0x5bc   :  { %6570 = vmatpush1.msra.mxu0 %v6417_v35  ;;  %6633 = vmatprep.mubr.f32.mxu0 %v9735_v14  ;;  %v6663_v6 = vsel %vm3557_vm9, %v6655_v62, %v6657_v37  ;;  %v6664_v11 = vsel %vm3557_vm9, %v6657_v37, %v6659_v21  ;;  %v6909_v22 = vsel %vm4058_vm10, %v6900_v54, %v6902_v4  ;;  %v7473_v35 = vld [vmem:[#allocation6 + $0x250] sm:$0xff] }
 0x5bd   :  { %6674 = vmatprep.subr.mxu0 %v6661_v46 }
 0x5bf   :  { %v6898_v58 = vpop.permute.xlu1 %6897  ;;  %8018 = vmatmul.mubr.msk.f32.vlgmr.msra.gmra.mrb[12].mxu0 %vm81_vm1, %v8015_v9  ;;  %v6906_v51 = vpop.permute.xlu0 %6905 }
 0x5c0   :  { %6675 = vmatpush1.msra.mxu0 %v6660_v56  ;;  %6738 = vmatprep.mubr.f32.mxu0 %v9735_v14  ;;  %v6908_v13 = vsel %vm4058_vm10, %v6898_v58, %v6900_v54  ;;  %v7476_v54 = vld [vmem:[#allocation6 + $0x268] sm:$0xff]  ;;  %v7478_v56 = vld [vmem:[#allocation6 + $0x278] sm:$0xff] }
 0x5c1   :  { %6745 = vmatprep.subr.mxu0 %v6663_v6 }
 0x5c3   :  { %v6896_v8 = vpop.permute.xlu1 %6895  ;;  %8020 = vmatmul.mubr.msk.f32.vlgmr.msra.gmra.mrb[8].mxu0 %vm81_vm1, %v8019_v52  ;;  %v7147_v39 = vpop.permute.xlu0 %7146 }
 0x5c4   :  { %6746 = vmatpush1.msra.mxu0 %v6662_v43  ;;  %6809 = vmatprep.mubr.f32.mxu0 %v9735_v14  ;;  %v6907_v5 = vsel %vm4058_vm10, %v6896_v8, %v6898_v58  ;;  %v8292_v43 = vpack.c.bf16 %v7478_v56, %v7476_v54  ;;  %v7475_v8 = vld [vmem:[#allocation6 + $0x260] sm:$0xff] }
 0x5c5   :  { %6816 = vmatprep.subr.mxu0 %v6659_v21  ;;  %v7471_v21 = vld [vmem:[#allocation6 + $0x240] sm:$0xff] }
 0x5c7   :  { %v6904_v12 = vpop.permute.xlu1 %6903  ;;  %8021 = vmatmul.mubr.msk.f32.vlgmr.msra.gmra.mrb[10].mxu0 %vm81_vm1, %v8019_v52  ;;  %v7149_v62 = vpop.permute.xlu0 %7148 }
 0x5c8   :  { %6817 = vmatpush1.msra.mxu0 %v6664_v11  ;;  %6880 = vmatprep.mubr.f32.mxu0 %v9735_v14  ;;  %v6910_v2 = vsel %vm4058_vm10, %v6902_v4, %v6904_v12  ;;  %v6911_v25 = vsel %vm4058_vm10, %v6904_v12, %v6906_v51  ;;  %v7156_v9 = vsel %vm4559_vm11, %v7147_v39, %v7149_v62  ;;  %v7477_v4 = vld [vmem:[#allocation6 + $0x270] sm:$0xff] }
 0x5c9   :  { %6921 = vmatprep.subr.mxu0 %v6908_v13  ;;  %v8294_v12 = vpack.c.bf16 %v7477_v4, %v7475_v8  ;;  %v7480_v13 = vld [vmem:[#allocation6 + $0x288] sm:$0xf] }
 0x5cb   :  { %v7145_v1 = vpop.permute.xlu1 %7144  ;;  %8022 = vmatmul.mubr.msk.f32.vlgmr.msra.gmra.mrb[12].mxu0 %vm81_vm1, %v8019_v52  ;;  %v7153_v0 = vpop.permute.xlu0 %7152  ;;  %v8290_v52 = vpack.c.bf16 %v7473_v35, %v7471_v21 }
 0x5cc   :  { %6922 = vmatpush1.msra.mxu0 %v6907_v5  ;;  %6985 = vmatprep.mubr.f32.mxu0 %v9735_v14  ;;  %v7155_v48 = vsel %vm4559_vm11, %v7145_v1, %v7147_v39 }
 0x5cd   :  { %6992 = vmatprep.subr.mxu0 %v6910_v2 }
 0x5cf   :  { %v7143_v24 = vpop.permute.xlu1 %7142  ;;  %8024 = vmatmul.mubr.msk.f32.vlgmr.msra.gmra.mrb[8].mxu0 %vm81_vm1, %v8023_v17 }
 0x5d0   :  { %6993 = vmatpush1.msra.mxu0 %v6909_v22  ;;  %7056 = vmatprep.mubr.f32.mxu0 %v9735_v14  ;;  %v7154_v32 = vsel %vm4559_vm11, %v7143_v24, %v7145_v1 }
 0x5d1   :  { %7063 = vmatprep.subr.mxu0 %v6906_v51  ;;  %v7479_v51 = vld [vmem:[#allocation6 + $0x280] sm:$0xf] }
 0x5d3   :  { %8025 = vmatmul.mubr.msk.f32.vlgmr.msra.gmra.mrb[10].mxu0 %vm81_vm1, %v8023_v17  ;;  %v7151_v47 = vpop.permute.xlu1 %7150 }
 0x5d4   :  { %7064 = vmatpush1.msra.mxu0 %v6911_v25  ;;  %7127 = vmatprep.mubr.f32.mxu0 %v9735_v14  ;;  %v7157_v34 = vsel %vm4559_vm11, %v7149_v62, %v7151_v47  ;;  %v7158_v16 = vsel %vm4559_vm11, %v7151_v47, %v7153_v0 }
 0x5d5   :  { %7168 = vmatprep.subr.mxu0 %v7155_v48 }
 0x5d7   :  { %8026 = vmatmul.mubr.msk.f32.vlgmr.msra.gmra.mrb[12].mxu0 %vm81_vm1, %v8023_v17 }
 0x5d8   :  { %7169 = vmatpush1.msra.mxu0 %v7154_v32  ;;  %7232 = vmatprep.mubr.f32.mxu0 %v9735_v14 }
 0x5d9   :  { %7239 = vmatprep.subr.mxu0 %v7157_v34 }
 0x5db   :  { %8028 = vmatmul.mubr.msk.f32.vlgmr.msra.gmra.mrb[8].mxu0 %vm81_vm1, %v8027_v57 }
 0x5dc   :  { %7240 = vmatpush1.msra.mxu0 %v7156_v9  ;;  %7303 = vmatprep.mubr.f32.mxu0 %v9735_v14 }
 0x5dd   :  { %7310 = vmatprep.subr.mxu0 %v7153_v0 }
 0x5df   :  { %8029 = vmatmul.mubr.msk.f32.vlgmr.msra.gmra.mrb[10].mxu0 %vm81_vm1, %v8027_v57 }
 0x5e0   :  { %7311 = vmatpush1.msra.mxu0 %v7158_v16  ;;  %7374 = vmatprep.mubr.f32.mxu0 %v9735_v14 }
 0x5e1   :  { %8297 = vmatprep.subr.bf16.mxu0 %v9681_v7  ;;  %v7460_v7 = vld [vmem:[#allocation6 + $0x1e8] sm:$0xff] }
 0x5e3   :  { %8030 = vmatmul.mubr.msk.f32.vlgmr.msra.gmra.mrb[12].mxu0 %vm81_vm1, %v8027_v57 }
 0x5e4   :  { %8299 = vmatpush1.bf16.msra.mxu0 %v9683_v45  ;;  %v7462_v45 = vld [vmem:[#allocation6 + $0x1f8] sm:$0xff] }
 0x5e5   :  { %8301 = vmatprep.subr.bf16.mxu0 %v9685_v40  ;;  %v8276_v40 = vpack.c.bf16 %v7462_v45, %v7460_v7 }
 0x5e7   :  { %8277 = vmatprep.subr.bf16.mxu1 %v8276_v40 }
 0x5e8   :  { %8303 = vmatpush1.bf16.msra.mxu0 %v9689_v44  ;;  %v7459_v44 = vld [vmem:[#allocation6 + $0x1e0] sm:$0xff] }
 0x5e9   :  { %8305 = vmatprep.subr.bf16.mxu0 %v9692_v63  ;;  %v7461_v63 = vld [vmem:[#allocation6 + $0x1f0] sm:$0xff] }
 0x5ec   :  { %8307 = vmatpush1.bf16.msra.mxu0 %v9695_v15  ;;  %v8278_v15 = vpack.c.bf16 %v7461_v63, %v7459_v44 }
 0x5ed   :  { %8309 = vmatprep.subr.bf16.mxu0 %v9698_v3  ;;  %v7464_v3 = vld [vmem:[#allocation6 + $0x208] sm:$0xff] }
 0x5ee   :  { %8279 = vmatpush1.bf16.msra.mxu1 %v8278_v15 }
 0x5f0   :  { %8311 = vmatpush1.bf16.msra.mxu0 %v9701_v27  ;;  %v7466_v27 = vld [vmem:[#allocation6 + $0x218] sm:$0xff] }
 0x5f1   :  { %8313 = vmatprep.subr.bf16.mxu0 %v9704_v28  ;;  %v8280_v28 = vpack.c.bf16 %v7466_v27, %v7464_v3 }
 0x5f3   :  { %8281 = vmatprep.subr.bf16.mxu1 %v8280_v28 }
 0x5f4   :  { %8315 = vmatpush1.bf16.msra.mxu0 %v9707_v18  ;;  %v7463_v18 = vld [vmem:[#allocation6 + $0x200] sm:$0xff] }
 0x5f5   :  { %8317 = vmatprep.subr.bf16.mxu0 %v9710_v19  ;;  %v7465_v19 = vld [vmem:[#allocation6 + $0x210] sm:$0xff] }
 0x5f8   :  { %8319 = vmatpush1.bf16.msra.mxu0 %v9717_v50 }
 0x5f9   :  { %8321 = vmatprep.subr.bf16.mxu0 %v9721_v53  ;;  %v7468_v53 = vld [vmem:[#allocation6 + $0x228] sm:$0xff] }
 0x5fc   :  { %8323 = vmatpush1.bf16.msra.mxu0 %v9729_v10  ;;  %v7470_v10 = vld [vmem:[#allocation6 + $0x238] sm:$0xff] }
 0x5fd   :  { %8325 = vmatprep.subr.bf16.mxu0 %v9731_v38  ;;  %v7391_v38 = vpop.permute.xlu1 %7390 }
 0x600   :  { %8327 = vmatpush1.bf16.msra.mxu0 %v9739_v41 }
 0x601   :  { %8329 = vmatprep.subr.bf16.mxu0 %v9742_v42 }
 0x604   :  { %8331 = vmatpush1.bf16.msra.mxu0 %v9752_v26  ;;  %v8282_v26 = vpack.c.bf16 %v7465_v19, %v7463_v18 }
 0x605   :  { %8333 = vmatprep.subr.bf16.mxu0 %v9755_v29 }
 0x608   :  { %8335 = vmatpush1.bf16.msra.mxu0 %v9762_v20  ;;  %v8284_v20 = vpack.c.bf16 %v7470_v10, %v7468_v53 }
 0x609   :  { %8337 = vmatprep.subr.bf16.mxu0 %v9765_v23  ;;  %v7467_v23 = vld [vmem:[#allocation6 + $0x220] sm:$0xff] }
 0x60c   :  { %8339 = vmatpush1.bf16.msra.mxu0 %v9771_v60  ;;  %v7469_v60 = vld [vmem:[#allocation6 + $0x230] sm:$0xff] }
 0x60d   :  { %8341 = vmatprep.subr.bf16.mxu0 %v9774_v61 }
 0x610   :  { %8343 = vmatpush1.bf16.msra.mxu0 %v9784_v36  ;;  %v7472_v36 = vld [vmem:[#allocation6 + $0x248] sm:$0xff] }
 0x611   :  { %8345 = vmatprep.subr.bf16.mxu0 %v9787_v59  ;;  %v7474_v59 = vld [vmem:[#allocation6 + $0x258] sm:$0xff] }
 0x614   :  { %8347 = vmatpush1.bf16.msra.mxu0 %v9794_v30 }
 0x615   :  { %8349 = vmatprep.subr.bf16.mxu0 %v9797_v31 }
 0x618   :  { %8351 = vmatpush1.bf16.msra.mxu0 %v9803_v33 }
 0x619   :  { %8353 = vmatprep.subr.bf16.mxu0 %v9806_v49  ;;  %v8286_v49 = vpack.c.bf16 %v7469_v60, %v7467_v23  ;;  %v7823_v23 = vld [vmem:[%s9973_s14] sm:$0xff] }
 0x61c   :  { %8355 = vmatpush1.bf16.msra.mxu0 %v9816_v55  ;;  %v8288_v55 = vpack.c.bf16 %v7474_v59, %v7472_v36 }
 0x61d   :  { %8357 = vmatprep.subr.bf16.mxu0 %v8276_v40 }
 0x620   :  { %8359 = vmatpush1.bf16.msra.mxu0 %v8278_v15 }
 0x6ae   :  { %v7234_v50 = vpop.f32.mrb[8].mxu0 }
 0x6af   :  { %v7236_v41 = vpop.f32.mrb[9].mxu0  ;;  %v7393_v29 = vadd.f32 %v7391_v38, %v7234_v50 }
 0x6b0   :  { %v7394_v42 = vadd.f32 %v7391_v38, %v7236_v41 }
 0x6b2   :  { %v7305_v61 = vpop.f32.mrb[10].mxu0  ;;  %7556 = vmatprep.mubr.f32.mxu1 %v7394_v42 }
 0x6b3   :  { %v7395_v30 = vadd.f32 %v7391_v38, %v7305_v61  ;;  %v7307_v31 = vpop.f32.mrb[11].mxu0  ;;  %7557 = vmatmul.mubr.f32.vlgmr.msra.gmra.mrb[8].mxu1 %v7393_v29 }
 0x6b4   :  { %v7396_v33 = vadd.f32 %v7391_v38, %v7307_v31  ;;  %8283 = vmatpush1.bf16.msra.mxu1 %v8282_v26  ;;  %7627 = vmatprep.mubr.f32.mxu1 %v9735_v14 }
 0x6b5   :  { %8285 = vmatprep.subr.bf16.mxu1 %v8284_v20 }
 0x6b6   :  { %v8552_v37 = vpack.i.bf16 %v7395_v30, %v7396_v33  ;;  %v7376_v46 = vpop.f32.mrb[12].mxu0 }
 0x6b7   :  { %v7397_v58 = vadd.f32 %v7391_v38, %v7376_v46  ;;  %v7378_v6 = vpop.f32.mrb[13].mxu0 }
 0x6b8   :  { %8287 = vmatpush1.bf16.msra.mxu1 %v8286_v49  ;;  %8553 = vrot.lane.b32.xlu0 %v8552_v37, %s8653_s11  ;;  %v7398_v11 = vadd.f32 %v7391_v38, %v7378_v6 }
 0x6b9   :  { %7651 = vrot.lane.b32.xlu1 %v7397_v58, %s8653_s11  ;;  %8289 = vmatprep.subr.bf16.mxu1 %v8288_v55 }
 0x6bc   :  { %8291 = vmatpush1.bf16.msra.mxu1 %v8290_v52  ;;  %7653 = vrot.lane.b32.xlu0 %v7398_v11, %s8653_s11 }
 0x6bd   :  { %8293 = vmatprep.subr.bf16.mxu1 %v8292_v43 }
 0x6c0   :  { %8295 = vmatpush1.bf16.msra.mxu1 %v8294_v12 }
 0x6c1   :  { %8031 = vmatprep.subr.msk.mxu1 %vm7485_vm13, %v7480_v13 }
 0x6c4   :  { %8032 = vmatpush1.msk.msra.mxu1 %vm7485_vm13, %v7479_v51 }
 0x6c5   :  { %8033 = vmatmul.mubr.msk.f32.vlgmr.msra.gmra.mrb[8].mxu1 %vm7481_vm14, %v7395_v30  ;;  %8361 = vmatprep.subr.bf16.mxu1 %v8280_v28 }
 0x6c6   :  { %8363 = vmatpush1.bf16.msra.mxu1 %v8282_v26  ;;  %7798 = vmatprep.mubr.f32.mxu1 %v9735_v14  ;;  %v7819_v26 = vld [vmem:[%s9972_s13] sm:$0xff]  ;;  %s8607_s13 = scalar_lea.vmem %s7859_s9, 512 }
 0x6c7   :  { %8365 = vmatprep.subr.bf16.mxu1 %v8284_v20  ;;  %p8608_p2 = scmp.ne.s32.totalorder %s7859_s9, %s8607_s13  ;;  %p8613_p4 = scmp.lt.s32.totalorder %s8607_s13, %s8607_s13 }
 0x6c9   :  { %p8614_p5 = por %p8613_p4, %p8612_p3 }
 0x6ca   :  { %8367 = vmatpush1.bf16.msra.mxu1 %v8286_v49 }
 0x6cb   :  { %8369 = vmatprep.subr.bf16.mxu1 %v8288_v55  ;;  %p8615_p6 = pnand %p8614_p5, %p8608_p2 }
 0x6ce   :  { %8371 = vmatpush1.bf16.msra.mxu1 %v8290_v52 }
 0x6cf   :  { %8373 = vmatprep.subr.bf16.mxu1 %v8292_v43 }
 0x6d2   :  { %8375 = vmatpush1.bf16.msra.mxu1 %v8294_v12 }
 0x6d3   :  { %8034 = vmatprep.subr.msk.mxu1 %vm7485_vm13, %v7480_v13 }
 0x6d6   :  { %8035 = vmatpush1.msk.msra.mxu1 %vm7485_vm13, %v7479_v51 }
 0x72a   :  { %v8554_v5 = vpop.permute.xlu0 %8553 }
 0x72b   :  { %v8556_v1 = vunpack.i.h.bf16 %v8554_v5  ;;  %v8555_v2 = vunpack.i.l.bf16 %v8554_v5  ;;  %v7652_v17 = vpop.permute.xlu1 %7651 }
 0x72d   :  { %v7657_v22 = vsel %vm7655_vm15, %v8555_v2, %v7652_v17  ;;  %v7656_v24 = vsel %vm7655_vm15, %v8556_v1, %v8555_v2 }
 0x72e   :  { %v7654_v39 = vpop.permute.xlu0 %7653  ;;  %7727 = vmatprep.mubr.f32.mxu0 %v7657_v22 }
 0x72f   :  { %v7658_v14 = vsel %vm7655_vm15, %v7652_v17, %v7654_v39  ;;  %7728 = vmatmul.mubr.f32.vlgmr.msra.gmra.mrb[14].mxu0 %v7656_v24 }
 0x730   :  { %8036 = vmatmul.mubr.msk.f32.vlgmr.msra.gmra.mrb[10].mxu1 %vm7481_vm14, %v7658_v14 }
 0x798   :  { %v7629_v25 = vpop.f32.mrb[8].mxu1 }
 0x799   :  { %v7638_v48 = vmul.f32 %v7629_v25, %v7629_v25  ;;  %v7631_v47 = vpop.f32.mrb[9].mxu1 }
 0x79a   :  { %v7634_v62 = vadd.f32 %v7631_v47, %v7629_v25  ;;  %v7639_v32 = vmul.f32 %v7631_v47, %v7631_v47 }
 0x79c   :  { %7635 = vadd.xlane.f32.xlu1 %v7634_v62  ;;  %v7640_v34 = vadd.f32 %v7639_v32, %v7638_v48 }
 0x802   :  { %v7729_v57 = vpop.f32.mrb[14].mxu0 }
 0x803   :  { %v7731_v9 = vpop.f32.mrb[15].mxu0  ;;  %v7800_v0 = vpop.f32.mrb[10].mxu1 }
 0x804   :  { %v7801_v16 = vadd.f32 %v7800_v0, %v7729_v57  ;;  %v7802_v7 = vpop.f32.mrb[11].mxu1 }
 0x805   :  { %v7803_v45 = vadd.f32 %v7802_v7, %v7731_v9 }
 0x806   :  { %v7809_v40 = vmul.f32 %v7801_v16, %v7801_v16 }
 0x807   :  { %v7810_v44 = vmul.f32 %v7803_v45, %v7803_v45  ;;  %v7805_v63 = vadd.f32 %v7803_v45, %v7801_v16 }
 0x809   :  { %7806 = vadd.xlane.f32.xlu0 %v7805_v63  ;;  %v7811_v15 = vadd.f32 %v7810_v44, %v7809_v40 }
 0x80b   :  { %7812 = vadd.xlane.f32.xlu1 %v7811_v15 }
 0x80d   :  { %7641 = vadd.xlane.f32.xlu0 %v7640_v34 }
 0x829   :  { %v7636_v3 = vpop.xlane.xlu1 %7635 }
 0x896   :  { %v7807_v27 = vpop.xlane.xlu0 %7806 }
 0x897   :  { %v7808_v28 = vadd.f32 %v7807_v27, %v7636_v3 }
 0x898   :  { %v7813_v19 = vpop.xlane.xlu1 %7812 }
 0x899   :  { %v7815_v18 = vmul.f32 0.001953125, %v7808_v28 }
 0x89a   :  { %v7642_v50 = vpop.xlane.xlu0 %7641 }
 0x89b   :  { %v7814_v53 = vadd.f32 %v7813_v19, %v7642_v50  ;;  %v7817_v10 = vmul.f32 %v7815_v18, %v7815_v18 }
 0x89d   :  { %v7816_v38 = vmul.f32 0.001953125, %v7814_v53 }
 0x89f   :  { %v7818_v41 = vsub.f32 %v7816_v38, %v7817_v10 }
 0x8a1   :  { %v7820_v42 = vadd.f32 1e-05, %v7818_v41 }
 0x8a3   :  { %8559 = vrsqrt.f32 %v7820_v42 }
 0x8ad   :  { %v8560_v29 = vpop.eup %8559 }
 0x8ae   :  { %v7822_v20 = vmul.f32 %v8560_v29, %v7819_v26 }
 0x8b0   :  { %7828 = vperm.xlu0 %8550, %v7822_v20   ;;  %v7824_v60 = vmul.f32 %v7822_v20, %v7815_v18 }
 0x8b2   :  { %v7825_v61 = vsub.f32 %v7823_v23, %v7824_v60 }
 0x8b4   :  { %7835 = vperm.xlu1 %8551, %v7825_v61  }
 0x92f   :  { %v7829_v36 = vpop.permute.xlu0 %7828 }
 0x930   :  { %v7831_v59 = vmul.f32 %v7829_v36, %v7629_v25  ;;  %v7832_v30 = vmul.f32 %v7829_v36, %v7631_v47  ;;  %v7844_v31 = vmul.f32 %v7829_v36, %v7801_v16  ;;  %v7845_v33 = vmul.f32 %v7829_v36, %v7803_v45 }
 0x933   :  { %v7836_v49 = vpop.permute.xlu1 %7835 }
 0x934   :  { %v7838_v55 = vadd.f32 %v7836_v49, %v7831_v59  ;;  %v7839_v21 = vadd.f32 %v7836_v49, %v7832_v30  ;;  %v7846_v35 = vadd.f32 %v7844_v31, %v7836_v49  ;;  %v7847_v37 = vadd.f32 %v7845_v33, %v7836_v49 }
 0x936   :  { %v7840_v46 = vmax.f32 %v7838_v55, 0.0  ;;  %v7841_v54 = vmax.f32 %v7839_v21, 0.0  ;;  %v7848_v56 = vmax.f32 %v7846_v35, 0.0  ;;  %v7849_v58 = vmax.f32 %v7847_v37, 0.0 }
 0x938   :  { %7842 = vst [vmem:[#allocation8] sm:$0xff] %v7840_v46  ;;  %7843 = vst [vmem:[#allocation8 + $0x8] sm:$0xff] %v7841_v54 }
 0x939   :  { %7851 = vst [vmem:[#allocation8 + $0x10] sm:$0xff] %v7848_v56  ;;  %7852 = vst [vmem:[#allocation8 + $0x18] sm:$0xff] %v7849_v58 }
 0x93a   :  { %8618 = shalt.err (!%p8615_p6)
}
 0x93b   :  { %s8619_s12 = scalar_lea.hbm %s9974_s15, 512 }
 0x93c   :  { %p8620_p7 = scmp.ne.s32.totalorder %s9974_s15, %s8619_s12  ;;  %p8623_p8 = scmp.lt.u32.totalorder %s8619_s12, %s9974_s15 }
 0x93e   :  { %p8625_p9 = pnand %p8623_p8, %p8620_p7 }
 0x940   :  { %8628 = shalt.err (!%p8625_p9)
}
 0x941   :  { %7864 = dma.vmem_to_hbm [thread:$0]  %s7859_s9, 512, %s9974_s15, [#allocation5], %s8639_s3, %s8639_s3, %s8640_s19  }
 0x942   :  { %8633 = dma.done.wait [#allocation5], 512  }
 0x943   :  { %8634 = vsyncadd [#allocation5], 4294966784 }
 0x944   :  { %7868 = vsyncpa [#allocation4], 1 }
 0x945   :  { %7869 = vsyncpa [#allocation7], 1 }
 0x946   :  { %7870 = vsyncpa [#allocation5], 1 }

</bundles_post_ra>
